<compile_context>
chip_gen: v7x
topology: tpu7x:2x2x1
jax: 0.10.0
libtpu: 0.0.40
codegen_flags: <defaults>
</compile_context>

<pallas_src>
import functools

import jax
import jax.numpy as jnp
from jax import lax
from jax.experimental import pallas as pl
from jax.experimental.pallas import tpu as pltpu

EPS = 1e-5          # nn.GroupNorm default eps
NEG_SLOPE = 0.01    # nn.LeakyReLU default negative_slope
GROUPS = 8
_HI = lax.Precision.HIGHEST


def _leaky(y):
    return jnp.where(y >= 0, y, NEG_SLOPE * y)


# ---------------------------------------------------------------------------
# Fused conv(3x3 or 1x1) + GroupNorm(8) [+ LeakyReLU / +t / +residual / pool]
# ---------------------------------------------------------------------------
def _conv_gn_kernel(*refs, taps, n_planes, slab_len, wext, valid_w, rows,
                    inv_n, act_pre, act_post, pool, has_tb, has_res):
    planes = refs[:n_planes]
    i = n_planes
    w_ref = refs[i]; i += 1          # (T, Cin, Cout)
    b_ref = refs[i]; i += 1          # (1, Cout)
    g_ref = refs[i]; i += 1          # (1, Cout)
    be_ref = refs[i]; i += 1         # (1, Cout)
    m_ref = refs[i]; i += 1          # (Cout, Cout) group membership
    tb_ref = None
    if has_tb:
        tb_ref = refs[i]; i += 1     # (1, 1, Cout) per-sample t-projection
    res_ref = None
    if has_res:
        res_ref = refs[i]; i += 1    # (1, out_rows, Cout) residual/shortcut
    o_ref = refs[i]

    # Conv as a sum of shifted contiguous-slab matmuls on the MXU.
    # Default precision (single bf16 pass) with f32 accumulation.
    p0, off0 = taps[0]
    y = jnp.dot(planes[p0][0, pl.ds(off0, slab_len), :], w_ref[0],
                preferred_element_type=jnp.float32)
    for k in range(1, len(taps)):
        p, off = taps[k]
        y = y + jnp.dot(planes[p][0, pl.ds(off, slab_len), :], w_ref[k],
                        preferred_element_type=jnp.float32)
    y = y + b_ref[...]

    C = y.shape[-1]
    # Drop the wrap-around (padding) columns produced by the slab trick.
    if valid_w != wext:
        y = y.reshape(rows, wext, C)[:, :valid_w, :].reshape(rows * valid_w, C)

    # GroupNorm(8) stats for this sample at full (pre-pool) resolution; group
    # broadcast is done with a (C, C) membership matmul (no in-kernel reshape).
    s1 = jnp.sum(y, axis=0, keepdims=True)
    s2 = jnp.sum(y * y, axis=0, keepdims=True)
    mean = jnp.dot(s1, m_ref[...], preferred_element_type=jnp.float32,
                   precision=_HI) * inv_n
    ex2 = jnp.dot(s2, m_ref[...], preferred_element_type=jnp.float32,
                  precision=_HI) * inv_n
    inv = lax.rsqrt(ex2 - mean * mean + EPS)

    if pool:
        # 0.5x bilinear (align_corners=False, even H/W) == exact 2x2 mean.
        # GN affine params are per-channel constants, so normalizing the
        # pooled values with the full-resolution stats is exact.
        yh = y.reshape(rows * valid_w // 2, 2, C)
        y = yh[:, 0, :] + yh[:, 1, :]                      # horizontal pairs
        wo = valid_w // 2
        yv = y.reshape(rows // 2, 2 * wo, C)
        y = (yv[:, :wo, :] + yv[:, wo:, :]) * 0.25         # vertical pairs
        y = y.reshape((rows // 2) * wo, C)

    y = (y - mean) * inv * g_ref[...] + be_ref[...]
    if act_pre:                      # conv1: LeakyReLU before the +t add
        y = _leaky(y)
    if has_tb:
        y = y + tb_ref[0]
    if has_res:
        y = y + res_ref[0]
    if act_post:                     # final: LeakyReLU after the residual add
        y = _leaky(y)
    o_ref[0] = y.astype(o_ref.dtype)


# ---------------------------------------------------------------------------
# Host-side helpers (cheap glue, no data duplication)
# ---------------------------------------------------------------------------
def _prep_3x3_planes(x_nhwc, stride):
    """Flattened padded plane(s) + tap table for a 3x3 / padding=1 conv.

    Each tap is (plane_index, flat_row_offset): the conv becomes 9 shifted
    (P, Cin) x (Cin, Cout) matmuls over contiguous row slabs, with no im2col
    duplication in HBM.  Returns (planes, taps, slab_len, wext, valid_w, rows).
    """
    B, H, W, C = x_nhwc.shape
    if stride == 1:
        xp = jnp.pad(x_nhwc, ((0, 0), (1, 2), (1, 1), (0, 0)))   # (B,H+3,W+2,C)
        wp = W + 2
        planes = [xp.reshape(B, (H + 3) * wp, C)]
        taps = tuple((0, dy * wp + dx) for dy in range(3) for dx in range(3))
        return planes, taps, H * wp, wp, W, H
    assert stride == 2 and H % 2 == 0 and W % 2 == 0
    Ho, Wo = H // 2, W // 2
    xp = jnp.pad(x_nhwc, ((0, 0), (1, 3), (1, 1), (0, 0)))       # (B,H+4,W+2,C)
    wp = Wo + 1
    planes = [xp[:, r::2, c::2, :].reshape(B, (Ho + 2) * wp, C)
              for r in (0, 1) for c in (0, 1)]                   # parity planes
    taps = tuple(((dy % 2) * 2 + (dx % 2), (dy // 2) * wp + (dx // 2))
                 for dy in range(3) for dx in range(3))
    return planes, taps, Ho * wp, wp, Wo, Ho


def _fused_conv_gn(planes, taps, slab_len, wext, valid_w, rows,
                   w_stack, b, gamma, beta, memb, cg, cout, *,
                   tb=None, res=None, act_pre=False, act_post=False,
                   pool=False):
    B, Lp, cin = planes[0].shape
    n_planes = len(planes)
    ntaps = len(taps)
    out_rows = rows * valid_w // (4 if pool else 1)
    inv_n = 1.0 / (rows * valid_w * cg)

    kernel = functools.partial(
        _conv_gn_kernel, taps=taps, n_planes=n_planes, slab_len=slab_len,
        wext=wext, valid_w=valid_w, rows=rows, inv_n=inv_n,
        act_pre=act_pre, act_post=act_post, pool=pool,
        has_tb=tb is not None, has_res=res is not None)

    in_specs = [pl.BlockSpec((1, Lp, cin), lambda i: (i, 0, 0))
                for _ in range(n_planes)]
    in_specs += [
        pl.BlockSpec((ntaps, cin, cout), lambda i: (0, 0, 0)),
        pl.BlockSpec((1, cout), lambda i: (0, 0)),
        pl.BlockSpec((1, cout), lambda i: (0, 0)),
        pl.BlockSpec((1, cout), lambda i: (0, 0)),
        pl.BlockSpec((cout, cout), lambda i: (0, 0)),
    ]
    args = list(planes) + [w_stack, b.reshape(1, cout), gamma.reshape(1, cout),
                           beta.reshape(1, cout), memb]
    if tb is not None:
        in_specs.append(pl.BlockSpec((1, 1, cout), lambda i: (i, 0, 0)))
        args.append(tb)
    if res is not None:
        in_specs.append(pl.BlockSpec((1, out_rows, cout), lambda i: (i, 0, 0)))
        args.append(res)

    # Explicit scoped-VMEM limit: double-buffered blocks + in-kernel temps.
    f32b = 4
    blk_bytes = (n_planes * Lp * cin + ntaps * cin * cout + 3 * cout
                 + cout * cout + cout + out_rows * cout + out_rows * cout) * f32b
    interm_bytes = 4 * slab_len * cout * f32b
    vmem_limit = int(min(max(2 * blk_bytes + interm_bytes + (8 << 20),
                             32 << 20), 64 << 20))

    return pl.pallas_call(
        kernel,
        out_shape=jax.ShapeDtypeStruct((B, out_rows, cout), jnp.float32),
        grid=(B,),
        in_specs=in_specs,
        out_specs=pl.BlockSpec((1, out_rows, cout), lambda i: (i, 0, 0)),
        compiler_params=pltpu.CompilerParams(
            dimension_semantics=("parallel",),
            vmem_limit_bytes=vmem_limit),
    )(*args)


# ---------------------------------------------------------------------------
# ResTimeBlock forward
# ---------------------------------------------------------------------------
def res_time_block(params, x_nchw, t, *, stride):
    B, Cin, H, W = x_nchw.shape
    Cout = params['w1'].shape[-1]
    assert Cout % GROUPS == 0
    assert stride in (1, 2)
    if stride != 1:
        # 0.5x bilinear == exact 2x2 mean only for even spatial dims.
        assert H % 2 == 0 and W % 2 == 0, "stride-2 path requires even H, W"
    Cg = Cout // GROUPS
    Ho, Wo = H // stride, W // stride

    x = jnp.transpose(x_nchw, (0, 2, 3, 1)).astype(jnp.float32)    # NHWC

    gidx = jnp.arange(Cout) // Cg
    memb = (gidx[:, None] == gidx[None, :]).astype(jnp.float32)

    # t-projection hoisted: one tiny matmul for the whole batch.
    tb = (jnp.dot(t.astype(jnp.float32), params['wt'], precision=_HI)
          + params['bt']).reshape(B, 1, Cout)

    # ---- conv1: 3x3/stride + GN + LeakyReLU, then + t_proj ----------------
    planes1, taps1, sl1, we1, vw1, rw1 = _prep_3x3_planes(x, stride)
    h1 = _fused_conv_gn(planes1, taps1, sl1, we1, vw1, rw1,
                        params['w1'].reshape(9, Cin, Cout),
                        params['b1'], params['g1'], params['be1'],
                        memb, Cg, Cout, tb=tb, act_pre=True)   # (B, Ho*Wo, C)

    # ---- shortcut path, produced directly at conv2 resolution -------------
    if 'wsc' in params:
        # 1x1 conv + GN, with the 0.5x bilinear (2x2 mean) fused in-kernel.
        res = _fused_conv_gn([x.reshape(B, H * W, Cin)], ((0, 0),),
                             H * W, W, W, H,
                             params['wsc'].reshape(1, Cin, Cout),
                             params['bsc'], params['gsc'], params['besc'],
                             memb, Cg, Cout, pool=(stride != 1))
    else:
        # identity shortcut (in_channels == out_channels)
        if stride != 1:
            res = x.reshape(B, Ho, 2, Wo, 2, Cout).mean(axis=(2, 4))
            res = res.reshape(B, Ho * Wo, Cout)
        else:
            res = x.reshape(B, H * W, Cout)

    # ---- conv2: 3x3/1 + GN, fused residual add + final LeakyReLU ----------
    h1img = h1.reshape(B, Ho, Wo, Cout)
    planes2, taps2, sl2, we2, vw2, rw2 = _prep_3x3_planes(h1img, 1)
    out = _fused_conv_gn(planes2, taps2, sl2, we2, vw2, rw2,
                         params['w2'].reshape(9, Cout, Cout),
                         params['b2'], params['g2'], params['be2'],
                         memb, Cg, Cout, res=res, act_post=True)

    return jnp.transpose(out.reshape(B, Ho, Wo, Cout), (0, 3, 1, 2))  # NCHW


# ---------------------------------------------------------------------------
# Deterministic parameter init (shapes follow the nn.Module __init__)
# ---------------------------------------------------------------------------
def init_params(key, in_c, out_c, t_c):
    ks = jax.random.split(key, 14)
    nrm = lambda k, s, sc=0.1: (sc * jax.random.normal(k, s)).astype(jnp.float32)
    p = {
        'w1': nrm(ks[0], (3, 3, in_c, out_c)),     # conv1 weight (HWIO)
        'b1': nrm(ks[1], (out_c,)),
        'g1': 1.0 + nrm(ks[2], (out_c,)),          # GN1 gamma
        'be1': nrm(ks[3], (out_c,)),               # GN1 beta
        'wt': nrm(ks[4], (t_c, out_c)),            # t_proj weight
        'bt': nrm(ks[5], (out_c,)),
        'w2': nrm(ks[6], (3, 3, out_c, out_c)),
        'b2': nrm(ks[7], (out_c,)),
        'g2': 1.0 + nrm(ks[8], (out_c,)),
        'be2': nrm(ks[9], (out_c,)),
    }
    if in_c != out_c:
        p['wsc'] = nrm(ks[10], (in_c, out_c))      # 1x1 conv weight
        p['bsc'] = nrm(ks[11], (out_c,))
        p['gsc'] = 1.0 + nrm(ks[12], (out_c,))
        p['besc'] = nrm(ks[13], (out_c,))
    return p


# ---------------------------------------------------------------------------
# Pure-JAX reference (mirrors the PyTorch forward) for the correctness check
# ---------------------------------------------------------------------------
def ref_forward(params, x_nchw, t, *, stride):
    x = x_nchw.astype(jnp.float32)

    def gn(y, gamma, beta):
        B, C, H, W = y.shape
        yg = y.reshape(B, GROUPS, C // GROUPS, H, W)
        mean = yg.mean(axis=(2, 3, 4), keepdims=True)
        var = yg.var(axis=(2, 3, 4), keepdims=True)
        yn = ((yg - mean) / jnp.sqrt(var + EPS)).reshape(B, C, H, W)
        return yn * gamma[None, :, None, None] + beta[None, :, None, None]

    def conv(y, w_hwio, b, s, pad):
        o = lax.conv_general_dilated(
            y, w_hwio, window_strides=(s, s), padding=((pad, pad), (pad, pad)),
            dimension_numbers=('NCHW', 'HWIO', 'NCHW'), precision=_HI)
        return o + b[None, :, None, None]

    r = _leaky(gn(conv(x, params['w1'], params['b1'], stride, 1),
                  params['g1'], params['be1']))
    tb = jnp.dot(t.astype(jnp.float32), params['wt'], precision=_HI) + params['bt']
    r = r + tb[:, :, None, None]
    r = gn(conv(r, params['w2'], params['b2'], 1, 1), params['g2'], params['be2'])
    if 'wsc' in params:
        wsc = params['wsc'].reshape(1, 1, *params['wsc'].shape)
        xs = gn(conv(x, wsc, params['bsc'], 1, 0), params['gsc'], params['besc'])
    else:
        xs = x
    if stride != 1:
        B, C, H, W = xs.shape
        xs = xs.reshape(B, C, H // 2, 2, W // 2, 2).mean(axis=(3, 5))
    return _leaky(xs + r)


if __name__ == "__main__":
    key = jax.random.PRNGKey(0)
    B = 2
    configs = [
        # (in_c, out_c, t_c, H, W, stride)
        (4, 16, 8, 16, 16, 2),    # shortcut conv + in-kernel pooled residual
        (8, 16, 8, 16, 16, 1),    # shortcut conv, no pooling
        (16, 16, 8, 16, 16, 1),   # identity shortcut
        (16, 16, 8, 16, 16, 2),   # identity shortcut, pooled
    ]
    for idx, (cin, cout, tc, H, W, stride) in enumerate(configs):
        kx, kt, kp, key = jax.random.split(key, 4)
        x = jax.random.normal(kx, (B, cin, H, W), jnp.float32)
        t = jax.random.normal(kt, (B, tc), jnp.float32)
        params = init_params(kp, cin, cout, tc)

        out = jax.block_until_ready(res_time_block(params, x, t, stride=stride))
        ref = jax.block_until_ready(ref_forward(params, x, t, stride=stride))

        assert out.shape == (B, cout, H // stride, W // stride), out.shape
        err = float(jnp.max(jnp.abs(out - ref)))
        # Kernel matmuls run at default (bf16-pass) MXU precision vs. an f32
        # HIGHEST-precision reference, so allow bf16-level tolerance.
        assert err < 5e-2, f"config {idx}: max abs err {err}"
    print("KERNEL_OK")
</pallas_src>

<mosaic_0001>
module attributes {stable_mosaic.version = 11 : i64} {
  func.func @_conv_gn_kernel(%arg0: i32, %arg1: memref<1x90x4xf32, #tpu.memory_space<vmem>>, %arg2: memref<1x90x4xf32, #tpu.memory_space<vmem>>, %arg3: memref<1x90x4xf32, #tpu.memory_space<vmem>>, %arg4: memref<1x90x4xf32, #tpu.memory_space<vmem>>, %arg5: memref<9x4x16xf32, #tpu.memory_space<vmem>>, %arg6: memref<1x16xf32, #tpu.memory_space<vmem>>, %arg7: memref<1x16xf32, #tpu.memory_space<vmem>>, %arg8: memref<1x16xf32, #tpu.memory_space<vmem>>, %arg9: memref<16x16xf32, #tpu.memory_space<vmem>>, %arg10: memref<1x1x16xf32, #tpu.memory_space<vmem>>, %arg11: memref<1x64x16xf32, #tpu.memory_space<vmem>>) attributes {dimension_semantics = [#tpu.dimension_semantics<parallel>], iteration_bounds = array<i64: 2>, scalar_prefetch = 0 : i64, scratch_operands = 0 : i64, tpu.core_type = #tpu.core_type<tc>, window_params = [{transform_indices = @transform_0, window_bounds = array<i64: 1, 90, 4>}, {transform_indices = @transform_1, window_bounds = array<i64: 1, 90, 4>}, {transform_indices = @transform_2, window_bounds = array<i64: 1, 90, 4>}, {transform_indices = @transform_3, window_bounds = array<i64: 1, 90, 4>}, {pipeline_mode = #tpu.pipeline_mode<synchronous>, transform_indices = @transform_4, window_bounds = array<i64: 9, 4, 16>}, {pipeline_mode = #tpu.pipeline_mode<synchronous>, transform_indices = @transform_5, window_bounds = array<i64: 1, 16>}, {pipeline_mode = #tpu.pipeline_mode<synchronous>, transform_indices = @transform_6, window_bounds = array<i64: 1, 16>}, {pipeline_mode = #tpu.pipeline_mode<synchronous>, transform_indices = @transform_7, window_bounds = array<i64: 1, 16>}, {pipeline_mode = #tpu.pipeline_mode<synchronous>, transform_indices = @transform_8, window_bounds = array<i64: 16, 16>}, {transform_indices = @transform_9, window_bounds = array<i64: 1, 1, 16>}, {transform_indices = @transform_10, window_bounds = array<i64: 1, 64, 16>}]} {
    %c0 = arith.constant 0 : index
    %c0_0 = arith.constant 0 : index
    %c0_1 = arith.constant 0 : index
    %0 = vector.load %arg1[%c0, %c0_0, %c0_1] : memref<1x90x4xf32, #tpu.memory_space<vmem>>, vector<1x72x4xf32>
    %1 = vector.shape_cast %0 : vector<1x72x4xf32> to vector<72x4xf32>
    %c0_2 = arith.constant 0 : index
    %c0_3 = arith.constant 0 : index
    %c0_4 = arith.constant 0 : index
    %2 = vector.load %arg5[%c0_2, %c0_3, %c0_4] : memref<9x4x16xf32, #tpu.memory_space<vmem>>, vector<1x4x16xf32>
    %3 = vector.shape_cast %2 : vector<1x4x16xf32> to vector<4x16xf32>
    %cst = arith.constant dense<0.000000e+00> : vector<72x16xf32>
    %4 = tpu.matmul %1, %3, %cst {dimension_numbers = #tpu.dot_dimension_numbers<[1], [0], [0], [1], [0, 0, 1, 1], [], []>} : vector<72x4xf32>, vector<4x16xf32>, vector<72x16xf32> -> vector<72x16xf32>
    %c0_5 = arith.constant 0 : index
    %c0_6 = arith.constant 0 : index
    %c0_7 = arith.constant 0 : index
    %5 = vector.load %arg2[%c0_5, %c0_6, %c0_7] : memref<1x90x4xf32, #tpu.memory_space<vmem>>, vector<1x72x4xf32>
    %6 = vector.shape_cast %5 : vector<1x72x4xf32> to vector<72x4xf32>
    %c1 = arith.constant 1 : index
    %c0_8 = arith.constant 0 : index
    %c0_9 = arith.constant 0 : index
    %7 = vector.load %arg5[%c1, %c0_8, %c0_9] : memref<9x4x16xf32, #tpu.memory_space<vmem>>, vector<1x4x16xf32>
    %8 = vector.shape_cast %7 : vector<1x4x16xf32> to vector<4x16xf32>
    %cst_10 = arith.constant dense<0.000000e+00> : vector<72x16xf32>
    %9 = tpu.matmul %6, %8, %cst_10 {dimension_numbers = #tpu.dot_dimension_numbers<[1], [0], [0], [1], [0, 0, 1, 1], [], []>} : vector<72x4xf32>, vector<4x16xf32>, vector<72x16xf32> -> vector<72x16xf32>
    %10 = arith.addf %4, %9 : vector<72x16xf32>
    %c0_11 = arith.constant 0 : index
    %c1_12 = arith.constant 1 : index
    %c0_13 = arith.constant 0 : index
    %11 = vector.load %arg1[%c0_11, %c1_12, %c0_13] : memref<1x90x4xf32, #tpu.memory_space<vmem>>, vector<1x72x4xf32>
    %12 = vector.shape_cast %11 : vector<1x72x4xf32> to vector<72x4xf32>
    %c2 = arith.constant 2 : index
    %c0_14 = arith.constant 0 : index
    %c0_15 = arith.constant 0 : index
    %13 = vector.load %arg5[%c2, %c0_14, %c0_15] : memref<9x4x16xf32, #tpu.memory_space<vmem>>, vector<1x4x16xf32>
    %14 = vector.shape_cast %13 : vector<1x4x16xf32> to vector<4x16xf32>
    %cst_16 = arith.constant dense<0.000000e+00> : vector<72x16xf32>
    %15 = tpu.matmul %12, %14, %cst_16 {dimension_numbers = #tpu.dot_dimension_numbers<[1], [0], [0], [1], [0, 0, 1, 1], [], []>} : vector<72x4xf32>, vector<4x16xf32>, vector<72x16xf32> -> vector<72x16xf32>
    %16 = arith.addf %10, %15 : vector<72x16xf32>
    %c0_17 = arith.constant 0 : index
    %c0_18 = arith.constant 0 : index
    %c0_19 = arith.constant 0 : index
    %17 = vector.load %arg3[%c0_17, %c0_18, %c0_19] : memref<1x90x4xf32, #tpu.memory_space<vmem>>, vector<1x72x4xf32>
    %18 = vector.shape_cast %17 : vector<1x72x4xf32> to vector<72x4xf32>
    %c3 = arith.constant 3 : index
    %c0_20 = arith.constant 0 : index
    %c0_21 = arith.constant 0 : index
    %19 = vector.load %arg5[%c3, %c0_20, %c0_21] : memref<9x4x16xf32, #tpu.memory_space<vmem>>, vector<1x4x16xf32>
    %20 = vector.shape_cast %19 : vector<1x4x16xf32> to vector<4x16xf32>
    %cst_22 = arith.constant dense<0.000000e+00> : vector<72x16xf32>
    %21 = tpu.matmul %18, %20, %cst_22 {dimension_numbers = #tpu.dot_dimension_numbers<[1], [0], [0], [1], [0, 0, 1, 1], [], []>} : vector<72x4xf32>, vector<4x16xf32>, vector<72x16xf32> -> vector<72x16xf32>
    %22 = arith.addf %16, %21 : vector<72x16xf32>
    %c0_23 = arith.constant 0 : index
    %c0_24 = arith.constant 0 : index
    %c0_25 = arith.constant 0 : index
    %23 = vector.load %arg4[%c0_23, %c0_24, %c0_25] : memref<1x90x4xf32, #tpu.memory_space<vmem>>, vector<1x72x4xf32>
    %24 = vector.shape_cast %23 : vector<1x72x4xf32> to vector<72x4xf32>
    %c4 = arith.constant 4 : index
    %c0_26 = arith.constant 0 : index
    %c0_27 = arith.constant 0 : index
    %25 = vector.load %arg5[%c4, %c0_26, %c0_27] : memref<9x4x16xf32, #tpu.memory_space<vmem>>, vector<1x4x16xf32>
    %26 = vector.shape_cast %25 : vector<1x4x16xf32> to vector<4x16xf32>
    %cst_28 = arith.constant dense<0.000000e+00> : vector<72x16xf32>
    %27 = tpu.matmul %24, %26, %cst_28 {dimension_numbers = #tpu.dot_dimension_numbers<[1], [0], [0], [1], [0, 0, 1, 1], [], []>} : vector<72x4xf32>, vector<4x16xf32>, vector<72x16xf32> -> vector<72x16xf32>
    %28 = arith.addf %22, %27 : vector<72x16xf32>
    %c0_29 = arith.constant 0 : index
    %c1_30 = arith.constant 1 : index
    %c0_31 = arith.constant 0 : index
    %29 = vector.load %arg3[%c0_29, %c1_30, %c0_31] : memref<1x90x4xf32, #tpu.memory_space<vmem>>, vector<1x72x4xf32>
    %30 = vector.shape_cast %29 : vector<1x72x4xf32> to vector<72x4xf32>
    %c5 = arith.constant 5 : index
    %c0_32 = arith.constant 0 : index
    %c0_33 = arith.constant 0 : index
    %31 = vector.load %arg5[%c5, %c0_32, %c0_33] : memref<9x4x16xf32, #tpu.memory_space<vmem>>, vector<1x4x16xf32>
    %32 = vector.shape_cast %31 : vector<1x4x16xf32> to vector<4x16xf32>
    %cst_34 = arith.constant dense<0.000000e+00> : vector<72x16xf32>
    %33 = tpu.matmul %30, %32, %cst_34 {dimension_numbers = #tpu.dot_dimension_numbers<[1], [0], [0], [1], [0, 0, 1, 1], [], []>} : vector<72x4xf32>, vector<4x16xf32>, vector<72x16xf32> -> vector<72x16xf32>
    %34 = arith.addf %28, %33 : vector<72x16xf32>
    %c0_35 = arith.constant 0 : index
    %c9 = arith.constant 9 : index
    %c0_36 = arith.constant 0 : index
    %35 = vector.load %arg1[%c0_35, %c9, %c0_36] : memref<1x90x4xf32, #tpu.memory_space<vmem>>, vector<1x72x4xf32>
    %36 = vector.shape_cast %35 : vector<1x72x4xf32> to vector<72x4xf32>
    %c6 = arith.constant 6 : index
    %c0_37 = arith.constant 0 : index
    %c0_38 = arith.constant 0 : index
    %37 = vector.load %arg5[%c6, %c0_37, %c0_38] : memref<9x4x16xf32, #tpu.memory_space<vmem>>, vector<1x4x16xf32>
    %38 = vector.shape_cast %37 : vector<1x4x16xf32> to vector<4x16xf32>
    %cst_39 = arith.constant dense<0.000000e+00> : vector<72x16xf32>
    %39 = tpu.matmul %36, %38, %cst_39 {dimension_numbers = #tpu.dot_dimension_numbers<[1], [0], [0], [1], [0, 0, 1, 1], [], []>} : vector<72x4xf32>, vector<4x16xf32>, vector<72x16xf32> -> vector<72x16xf32>
    %40 = arith.addf %34, %39 : vector<72x16xf32>
    %c0_40 = arith.constant 0 : index
    %c9_41 = arith.constant 9 : index
    %c0_42 = arith.constant 0 : index
    %41 = vector.load %arg2[%c0_40, %c9_41, %c0_42] : memref<1x90x4xf32, #tpu.memory_space<vmem>>, vector<1x72x4xf32>
    %42 = vector.shape_cast %41 : vector<1x72x4xf32> to vector<72x4xf32>
    %c7 = arith.constant 7 : index
    %c0_43 = arith.constant 0 : index
    %c0_44 = arith.constant 0 : index
    %43 = vector.load %arg5[%c7, %c0_43, %c0_44] : memref<9x4x16xf32, #tpu.memory_space<vmem>>, vector<1x4x16xf32>
    %44 = vector.shape_cast %43 : vector<1x4x16xf32> to vector<4x16xf32>
    %cst_45 = arith.constant dense<0.000000e+00> : vector<72x16xf32>
    %45 = tpu.matmul %42, %44, %cst_45 {dimension_numbers = #tpu.dot_dimension_numbers<[1], [0], [0], [1], [0, 0, 1, 1], [], []>} : vector<72x4xf32>, vector<4x16xf32>, vector<72x16xf32> -> vector<72x16xf32>
    %46 = arith.addf %40, %45 : vector<72x16xf32>
    %c0_46 = arith.constant 0 : index
    %c10 = arith.constant 10 : index
    %c0_47 = arith.constant 0 : index
    %47 = vector.load %arg1[%c0_46, %c10, %c0_47] : memref<1x90x4xf32, #tpu.memory_space<vmem>>, vector<1x72x4xf32>
    %48 = vector.shape_cast %47 : vector<1x72x4xf32> to vector<72x4xf32>
    %c8 = arith.constant 8 : index
    %c0_48 = arith.constant 0 : index
    %c0_49 = arith.constant 0 : index
    %49 = vector.load %arg5[%c8, %c0_48, %c0_49] : memref<9x4x16xf32, #tpu.memory_space<vmem>>, vector<1x4x16xf32>
    %50 = vector.shape_cast %49 : vector<1x4x16xf32> to vector<4x16xf32>
    %cst_50 = arith.constant dense<0.000000e+00> : vector<72x16xf32>
    %51 = tpu.matmul %48, %50, %cst_50 {dimension_numbers = #tpu.dot_dimension_numbers<[1], [0], [0], [1], [0, 0, 1, 1], [], []>} : vector<72x4xf32>, vector<4x16xf32>, vector<72x16xf32> -> vector<72x16xf32>
    %52 = arith.addf %46, %51 : vector<72x16xf32>
    %c0_51 = arith.constant 0 : index
    %c0_52 = arith.constant 0 : index
    %53 = vector.load %arg6[%c0_51, %c0_52] : memref<1x16xf32, #tpu.memory_space<vmem>>, vector<1x16xf32>
    %54 = vector.broadcast %53 : vector<1x16xf32> to vector<72x16xf32>
    %55 = arith.addf %52, %54 : vector<72x16xf32>
    %56 = vector.shape_cast %55 : vector<72x16xf32> to vector<8x9x16xf32>
    %57 = vector.extract_strided_slice %56 {offsets = [0, 0, 0], sizes = [8, 8, 16], strides = [1, 1, 1]} : vector<8x9x16xf32> to vector<8x8x16xf32>
    %58 = vector.shape_cast %57 : vector<8x8x16xf32> to vector<64x16xf32>
    %cst_53 = arith.constant dense<0.000000e+00> : vector<16xf32>
    %59 = vector.multi_reduction <add>, %58, %cst_53 [0] : vector<64x16xf32> to vector<16xf32>
    %60 = vector.shape_cast %59 : vector<16xf32> to vector<1x16xf32>
    %61 = arith.mulf %58, %58 : vector<64x16xf32>
    %cst_54 = arith.constant dense<0.000000e+00> : vector<16xf32>
    %62 = vector.multi_reduction <add>, %61, %cst_54 [0] : vector<64x16xf32> to vector<16xf32>
    %63 = vector.shape_cast %62 : vector<16xf32> to vector<1x16xf32>
    %c0_55 = arith.constant 0 : index
    %c0_56 = arith.constant 0 : index
    %64 = vector.load %arg9[%c0_55, %c0_56] : memref<16x16xf32, #tpu.memory_space<vmem>>, vector<16x16xf32>
    %cst_57 = arith.constant dense<0.000000e+00> : vector<1x16xf32>
    %65 = tpu.matmul %60, %64, %cst_57 {dimension_numbers = #tpu.dot_dimension_numbers<[1], [0], [0], [1], [0, 0, 1, 1], [], []>, precision = #tpu.contract_precision<fp32>} : vector<1x16xf32>, vector<16x16xf32>, vector<1x16xf32> -> vector<1x16xf32>
    %cst_58 = arith.constant 7.812500e-03 : f32
    %66 = vector.broadcast %cst_58 : f32 to vector<1x16xf32>
    %67 = arith.mulf %65, %66 : vector<1x16xf32>
    %c0_59 = arith.constant 0 : index
    %c0_60 = arith.constant 0 : index
    %68 = vector.load %arg9[%c0_59, %c0_60] : memref<16x16xf32, #tpu.memory_space<vmem>>, vector<16x16xf32>
    %cst_61 = arith.constant dense<0.000000e+00> : vector<1x16xf32>
    %69 = tpu.matmul %63, %68, %cst_61 {dimension_numbers = #tpu.dot_dimension_numbers<[1], [0], [0], [1], [0, 0, 1, 1], [], []>, precision = #tpu.contract_precision<fp32>} : vector<1x16xf32>, vector<16x16xf32>, vector<1x16xf32> -> vector<1x16xf32>
    %cst_62 = arith.constant 7.812500e-03 : f32
    %70 = vector.broadcast %cst_62 : f32 to vector<1x16xf32>
    %71 = arith.mulf %69, %70 : vector<1x16xf32>
    %72 = arith.mulf %67, %67 : vector<1x16xf32>
    %73 = arith.subf %71, %72 : vector<1x16xf32>
    %cst_63 = arith.constant 9.99999974E-6 : f32
    %74 = vector.broadcast %cst_63 : f32 to vector<1x16xf32>
    %75 = arith.addf %73, %74 : vector<1x16xf32>
    %76 = math.rsqrt %75 : vector<1x16xf32>
    %77 = vector.broadcast %67 : vector<1x16xf32> to vector<64x16xf32>
    %78 = arith.subf %58, %77 : vector<64x16xf32>
    %79 = vector.broadcast %76 : vector<1x16xf32> to vector<64x16xf32>
    %80 = arith.mulf %78, %79 : vector<64x16xf32>
    %c0_64 = arith.constant 0 : index
    %c0_65 = arith.constant 0 : index
    %81 = vector.load %arg7[%c0_64, %c0_65] : memref<1x16xf32, #tpu.memory_space<vmem>>, vector<1x16xf32>
    %82 = vector.broadcast %81 : vector<1x16xf32> to vector<64x16xf32>
    %83 = arith.mulf %80, %82 : vector<64x16xf32>
    %c0_66 = arith.constant 0 : index
    %c0_67 = arith.constant 0 : index
    %84 = vector.load %arg8[%c0_66, %c0_67] : memref<1x16xf32, #tpu.memory_space<vmem>>, vector<1x16xf32>
    %85 = vector.broadcast %84 : vector<1x16xf32> to vector<64x16xf32>
    %86 = arith.addf %83, %85 : vector<64x16xf32>
    %cst_68 = arith.constant 0.000000e+00 : f32
    %87 = vector.broadcast %cst_68 : f32 to vector<64x16xf32>
    %88 = arith.cmpf oge, %86, %87 : vector<64x16xf32>
    %cst_69 = arith.constant 0.00999999977 : f32
    %89 = vector.broadcast %cst_69 : f32 to vector<64x16xf32>
    %90 = arith.mulf %89, %86 : vector<64x16xf32>
    %91 = arith.select %88, %86, %90 : vector<64x16xi1>, vector<64x16xf32>
    %c0_70 = arith.constant 0 : index
    %c0_71 = arith.constant 0 : index
    %c0_72 = arith.constant 0 : index
    %92 = vector.load %arg10[%c0_70, %c0_71, %c0_72] : memref<1x1x16xf32, #tpu.memory_space<vmem>>, vector<1x1x16xf32>
    %93 = vector.shape_cast %92 : vector<1x1x16xf32> to vector<1x16xf32>
    %94 = vector.broadcast %93 : vector<1x16xf32> to vector<64x16xf32>
    %95 = arith.addf %91, %94 : vector<64x16xf32>
    %c0_73 = arith.constant 0 : index
    %c0_74 = arith.constant 0 : index
    %c0_75 = arith.constant 0 : index
    %96 = vector.load %arg11[%c0_73, %c0_74, %c0_75] : memref<1x64x16xf32, #tpu.memory_space<vmem>>, vector<1x64x16xf32>
    %97 = vector.shape_cast %96 : vector<1x64x16xf32> to vector<64x16xf32>
    %98 = vector.shape_cast %95 : vector<64x16xf32> to vector<1x64x16xf32>
    tpu.vector_store %arg11[%c0_73, %c0_74, %c0_75], %98 {strides = array<i32>} : memref<1x64x16xf32, #tpu.memory_space<vmem>>, vector<1x64x16xf32>,
    return
  }
  func.func @transform_0(%arg0: i32) -> (i32, i32, i32) {
    %c0_i32 = arith.constant 0 : i32
    %c0_i32_0 = arith.constant 0 : i32
    %c0_i32_1 = arith.constant 0 : i32
    return %arg0, %c0_i32, %c0_i32_0 : i32, i32, i32
  }
  func.func @transform_1(%arg0: i32) -> (i32, i32, i32) {
    %c0_i32 = arith.constant 0 : i32
    %c0_i32_0 = arith.constant 0 : i32
    %c0_i32_1 = arith.constant 0 : i32
    return %arg0, %c0_i32, %c0_i32_0 : i32, i32, i32
  }
  func.func @transform_2(%arg0: i32) -> (i32, i32, i32) {
    %c0_i32 = arith.constant 0 : i32
    %c0_i32_0 = arith.constant 0 : i32
    %c0_i32_1 = arith.constant 0 : i32
    return %arg0, %c0_i32, %c0_i32_0 : i32, i32, i32
  }
  func.func @transform_3(%arg0: i32) -> (i32, i32, i32) {
    %c0_i32 = arith.constant 0 : i32
    %c0_i32_0 = arith.constant 0 : i32
    %c0_i32_1 = arith.constant 0 : i32
    return %arg0, %c0_i32, %c0_i32_0 : i32, i32, i32
  }
  func.func @transform_4(%arg0: i32) -> (i32, i32, i32) {
    %c0_i32 = arith.constant 0 : i32
    %c0_i32_0 = arith.constant 0 : i32
    %c0_i32_1 = arith.constant 0 : i32
    %c0_i32_2 = arith.constant 0 : i32
    return %c0_i32, %c0_i32_0, %c0_i32_1 : i32, i32, i32
  }
  func.func @transform_5(%arg0: i32) -> (i32, i32) {
    %c0_i32 = arith.constant 0 : i32
    %c0_i32_0 = arith.constant 0 : i32
    %c0_i32_1 = arith.constant 0 : i32
    return %c0_i32, %c0_i32_0 : i32, i32
  }
  func.func @transform_6(%arg0: i32) -> (i32, i32) {
    %c0_i32 = arith.constant 0 : i32
    %c0_i32_0 = arith.constant 0 : i32
    %c0_i32_1 = arith.constant 0 : i32
    return %c0_i32, %c0_i32_0 : i32, i32
  }
  func.func @transform_7(%arg0: i32) -> (i32, i32) {
    %c0_i32 = arith.constant 0 : i32
    %c0_i32_0 = arith.constant 0 : i32
    %c0_i32_1 = arith.constant 0 : i32
    return %c0_i32, %c0_i32_0 : i32, i32
  }
  func.func @transform_8(%arg0: i32) -> (i32, i32) {
    %c0_i32 = arith.constant 0 : i32
    %c0_i32_0 = arith.constant 0 : i32
    %c0_i32_1 = arith.constant 0 : i32
    return %c0_i32, %c0_i32_0 : i32, i32
  }
  func.func @transform_9(%arg0: i32) -> (i32, i32, i32) {
    %c0_i32 = arith.constant 0 : i32
    %c0_i32_0 = arith.constant 0 : i32
    %c0_i32_1 = arith.constant 0 : i32
    return %arg0, %c0_i32, %c0_i32_0 : i32, i32, i32
  }
  func.func @transform_10(%arg0: i32) -> (i32, i32, i32) {
    %c0_i32 = arith.constant 0 : i32
    %c0_i32_0 = arith.constant 0 : i32
    %c0_i32_1 = arith.constant 0 : i32
    return %arg0, %c0_i32, %c0_i32_0 : i32, i32, i32
  }
}

</mosaic_0001>

<bundles_post_ra>
// kernel: tpu_custom_call.1
= control target key start
LH: loop header
LB: loop body
LE: loop exit
PB: predicated region body
PF: predicated region fallthrough
CT: control target
= control target key end

     0   :  { %s6418_s13 = smov 0   ;;  %s9764_s0 = inlined_call_operand.vmem [shape: f32[2,90,4], index: 0, kind: input, shape index: {}]   ;;  %s9765_s1 = inlined_call_operand.vmem [shape: f32[2,90,4], index: 1, kind: input, shape index: {}]   ;;  %s9766_s2 = inlined_call_operand.vmem [shape: f32[2,90,4], index: 2, kind: input, shape index: {}]   ;;  %s9767_s3 = inlined_call_operand.vmem [shape: f32[2,90,4], index: 3, kind: input, shape index: {}]   ;;  %s9768_s4 = inlined_call_operand.vmem [shape: f32[9,4,16], index: 4, kind: input, shape index: {}]   ;;  %s9769_s5 = inlined_call_operand.vmem [shape: f32[1,16], index: 5, kind: input, shape index: {}]   ;;  %s9770_s6 = inlined_call_operand.vmem [shape: f32[1,16], index: 6, kind: input, shape index: {}]   ;;  %s9771_s7 = inlined_call_operand.vmem [shape: f32[1,16], index: 7, kind: input, shape index: {}]   ;;  %s9772_s8 = inlined_call_operand.vmem [shape: f32[16,16], index: 8, kind: input, shape index: {}]   ;;  %s9773_s9 = inlined_call_operand.vmem [shape: f32[2,1,16], index: 9, kind: input, shape index: {}]   ;;  %s9774_s10 = inlined_call_operand.vmem [shape: f32[2,64,16], index: 10, kind: output, shape index: {}]  }
   0x1 LB: > { %s5683_s14 = sadd.s32 4294967295, %s6357_s13   ;;  %p5687_p0 = scmp.ge.s32.totalorder %s6357_s13, 1  ;;  %s6357_s13 = sphi %s6418_s13, %s20_s13  }
   0x2   : > { %p350_p1 = scmp.lt.s32.totalorder %s6357_s13, 3 }
   0x4   : > { %p351_p2 = pnand %p5687_p0, %p350_p1 }
   0x6   : > { %354 = sbr.rel (%p351_p2) target bundleno = 1023 (0x3ff), region = 60 }
   0xd   : > { %v5694_v0 = vld [vmem:[%s9768_s4 + $0x4] sm:$0xf]  ;;  %vm483_vm0 = vcmask 1043456   ;;  %p406_p3 = scmp.lt.s32.totalorder %s5683_s14, 1  ;;  %v9777_v1 = vmov 0.0   ;;  %vm6360_vm1 = vmmov 0  }
   0xe   : > { %5933 = vmatprep.subr.mxu0 %v9777_v1  ;;  %5935 = vmatprep.mubr.msk.f32.mxu0 %vm6360_vm1, %v9777_v1  ;;  %v443_v2 = vld [vmem:[%s9768_s4] sm:$0xf]  ;;  %vm455_vm2 = vcmask 31744   ;;  %v5726_v5 = vld [vmem:[%s9768_s4 + $0xc] sm:$0xf]  ;;  %vm9931_vm3 = vcmask 130048  }
   0xf   : > { %5934 = vmatpush3.msk.msra.mxu0 %vm483_vm0, %v5694_v0  ;;  %s10487_s14 = smov (!%p406_p3, %s5683_s14), 1  ;;  %6314 = vmatprep.subr.mxu1 %v9777_v1  ;;  %v5748_v22 = vld [vmem:[%s9768_s4 + $0x14] sm:$0xf]  ;;  %v5715_v25 = vld [vmem:[%s9768_s4 + $0x8] sm:$0xf] }
  0x10   : > { %5962 = vmatprep.subr.mxu0 %v9777_v1  ;;  %6315 = vmatpush3.msk.msra.mxu1 %vm483_vm0, %v443_v2  ;;  %s6442_s19 = smul.u32 96, %s10487_s14  ;;  %v5737_v28 = vld [vmem:[%s9768_s4 + $0x10] sm:$0xf]  ;;  %v5770_v43 = vld [vmem:[%s9768_s4 + $0x1c] sm:$0xf]  ;;  %s428_s18 = scalar_lea.vmem %s9773_s9, %s10487_s14 }
  0x11   : > { %5967 = vmatprep.mubr.msk.f32.mxu1 %vm6360_vm1, %v9777_v1  ;;  %6020 = vmatprep.subr.mxu1 %v9777_v1  ;;  %v5759_v48 = vld [vmem:[%s9768_s4 + $0x18] sm:$0xf] }
  0x12   : > { %s6451_s22 = scalar_lea.vmem %s9764_s0, %s6442_s19  ;;  %s6457_s25 = scalar_lea.vmem %s9765_s1, %s6442_s19 }
  0x13   : > { %v444_v3 = vld [vmem:[%s6457_s25] sm:$0xff]  ;;  %v435_v4 = vld [vmem:[%s6451_s22 + $0x8] sm:$0xff]  ;;  %v436_v7 = vld [vmem:[%s6451_s22 + $0x10] sm:$0xff]  ;;  %s6528_s30 = scalar_lea.vmem %s9766_s2, %s6442_s19  ;;  %s6663_s26 = scalar_lea.vmem %s9767_s3, %s6442_s19 }
  0x14   : > { %5936 = vmatmul.mubr.msk.f32.vlgmr.msra.gmra.mrb[0].mxu0 %vm455_vm2, %v444_v3  ;;  %5968 = vmatmul.mubr.msk.f32.vlgmr.msra.gmra.mrb[0].mxu1 %vm455_vm2, %v435_v4  ;;  %v445_v6 = vld [vmem:[%s6457_s25 + $0x8] sm:$0xff]  ;;  %v446_v8 = vld [vmem:[%s6457_s25 + $0x10] sm:$0xff]  ;;  %v437_v9 = vld [vmem:[%s6451_s22 + $0x18] sm:$0xff] }
  0x15   : > { %5963 = vmatpush3.msk.msra.mxu0 %vm483_vm0, %v443_v2  ;;  %5938 = vmatprep.mubr.msk.f32.mxu0 %vm6360_vm1, %v9777_v1  ;;  %v447_v10 = vld [vmem:[%s6457_s25 + $0x18] sm:$0xff]  ;;  %v438_v11 = vld [vmem:[%s6451_s22 + $0x20] sm:$0xff]  ;;  %v439_v13 = vld [vmem:[%s6451_s22 + $0x28] sm:$0xff] }
  0x16   : > { %5970 = vmatprep.mubr.msk.f32.mxu1 %vm6360_vm1, %v9777_v1  ;;  %5991 = vmatprep.subr.mxu0 %v9777_v1  ;;  %v448_v12 = vld [vmem:[%s6457_s25 + $0x20] sm:$0xff]  ;;  %v449_v14 = vld [vmem:[%s6457_s25 + $0x28] sm:$0xff]  ;;  %v440_v15 = vld [vmem:[%s6451_s22 + $0x30] sm:$0xff] }
  0x17   : > { %6021 = vmatpush3.msk.msra.mxu1 %vm483_vm0, %v5726_v5  ;;  %v450_v16 = vld [vmem:[%s6457_s25 + $0x30] sm:$0xff]  ;;  %v441_v17 = vld [vmem:[%s6451_s22 + $0x38] sm:$0xff]  ;;  %v442_v19 = vld [vmem:[%s6451_s22 + $0x40] sm:$0xff] }
  0x18   : > { %5939 = vmatmul.mubr.msk.f32.gmra.mrb[2].mxu0 %vm455_vm2, %v445_v6  ;;  %5971 = vmatmul.mubr.msk.f32.gmra.mrb[2].mxu1 %vm455_vm2, %v436_v7  ;;  %v451_v18 = vld [vmem:[%s6457_s25 + $0x38] sm:$0xff]  ;;  %v452_v20 = vld [vmem:[%s6457_s25 + $0x40] sm:$0xff]  ;;  %v898_v24 = vld [vmem:[%s6528_s30 + $0x8] sm:$0xff] }
  0x19   : > { %5941 = vmatprep.mubr.msk.f32.mxu0 %vm6360_vm1, %v9777_v1  ;;  %5973 = vmatprep.mubr.msk.f32.mxu1 %vm6360_vm1, %v9777_v1  ;;  %v897_v21 = vld [vmem:[%s6528_s30] sm:$0xff]  ;;  %v899_v27 = vld [vmem:[%s6528_s30 + $0x10] sm:$0xff]  ;;  %v900_v30 = vld [vmem:[%s6528_s30 + $0x18] sm:$0xff] }
  0x1a   : > { %6078 = vmatprep.subr.mxu1 %v9777_v1  ;;  %v434_v23 = vld [vmem:[%s6451_s22] sm:$0xff]  ;;  %v6573_v29 = vld [vmem:[%s6451_s22 + $0x9] sm:$0xff]  ;;  %v6585_v31 = vld [vmem:[%s6451_s22 + $0x11] sm:$0xff] }
  0x1b   : > { %v737_v26 = vld [vmem:[%s6451_s22 + $0x1] sm:$0xff]  ;;  %v6596_v33 = vld [vmem:[%s6451_s22 + $0x19] sm:$0xff]  ;;  %v903_v36 = vld [vmem:[%s6528_s30 + $0x30] sm:$0xff] }
  0x1c   : > { %5942 = vmatmul.mubr.msk.f32.gmra.mrb[4].mxu0 %vm455_vm2, %v446_v8  ;;  %5974 = vmatmul.mubr.msk.f32.gmra.mrb[4].mxu1 %vm455_vm2, %v437_v9  ;;  %v901_v32 = vld [vmem:[%s6528_s30 + $0x20] sm:$0xff]  ;;  %v902_v34 = vld [vmem:[%s6528_s30 + $0x28] sm:$0xff]  ;;  %v904_v38 = vld [vmem:[%s6528_s30 + $0x38] sm:$0xff] }
  0x1d   : > { %5944 = vmatprep.mubr.msk.f32.mxu0 %vm6360_vm1, %v9777_v1  ;;  %5976 = vmatprep.mubr.msk.f32.mxu1 %vm6360_vm1, %v9777_v1  ;;  %v6607_v35 = vld [vmem:[%s6451_s22 + $0x21] sm:$0xff]  ;;  %v6618_v37 = vld [vmem:[%s6451_s22 + $0x29] sm:$0xff]  ;;  %v6629_v39 = vld [vmem:[%s6451_s22 + $0x31] sm:$0xff] }
  0x1e   : > { %v905_v40 = vld [vmem:[%s6528_s30 + $0x40] sm:$0xff]  ;;  %v1218_v45 = vld [vmem:[%s6528_s30 + $0x9] sm:$0xff]  ;;  %v1219_v47 = vld [vmem:[%s6528_s30 + $0x11] sm:$0xff] }
  0x1f   : > { %v6640_v41 = vld [vmem:[%s6451_s22 + $0x39] sm:$0xff]  ;;  %v1217_v42 = vld [vmem:[%s6528_s30 + $0x1] sm:$0xff]  ;;  %v1059_v51 = vld [vmem:[%s6663_s26 + $0x10] sm:$0xff] }
  0x20   : > { %5945 = vmatmul.mubr.msk.f32.gmra.mrb[6].mxu0 %vm455_vm2, %v447_v10  ;;  %5977 = vmatmul.mubr.msk.f32.gmra.mrb[6].mxu1 %vm455_vm2, %v438_v11  ;;  %v6654_v44 = vld [vmem:[%s6451_s22 + $0x41] sm:$0xff]  ;;  %v1220_v50 = vld [vmem:[%s6528_s30 + $0x19] sm:$0xff]  ;;  %v1222_v54 = vld [vmem:[%s6528_s30 + $0x29] sm:$0xff] }
  0x21   : > { %5947 = vmatprep.mubr.msk.f32.mxu0 %vm6360_vm1, %v9777_v1  ;;  %5979 = vmatprep.mubr.msk.f32.mxu1 %vm6360_vm1, %v9777_v1  ;;  %v1057_v46 = vld [vmem:[%s6663_s26] sm:$0xff]  ;;  %v1058_v49 = vld [vmem:[%s6663_s26 + $0x8] sm:$0xff]  ;;  %v1060_v53 = vld [vmem:[%s6663_s26 + $0x18] sm:$0xff] }
  0x22   : > { %v1221_v52 = vld [vmem:[%s6528_s30 + $0x21] sm:$0xff]  ;;  %v1223_v56 = vld [vmem:[%s6528_s30 + $0x31] sm:$0xff]  ;;  %v1224_v58 = vld [vmem:[%s6528_s30 + $0x39] sm:$0xff] }
  0x23   : > { %v1061_v55 = vld [vmem:[%s6663_s26 + $0x20] sm:$0xff]  ;;  %v1062_v57 = vld [vmem:[%s6663_s26 + $0x28] sm:$0xff]  ;;  %v1063_v59 = vld [vmem:[%s6663_s26 + $0x30] sm:$0xff] }
  0x24   : > { %5948 = vmatmul.mubr.msk.f32.gmra.mrb[8].mxu0 %vm455_vm2, %v448_v12  ;;  %5980 = vmatmul.mubr.msk.f32.gmra.mrb[8].mxu1 %vm455_vm2, %v439_v13  ;;  %v1225_v60 = vld [vmem:[%s6528_s30 + $0x41] sm:$0xff]  ;;  %v1064_v61 = vld [vmem:[%s6663_s26 + $0x38] sm:$0xff]  ;;  %v1537_v62 = vld [vmem:[%s6457_s25 + $0x9] sm:$0xff] }
  0x25   : > { %5950 = vmatprep.mubr.msk.f32.mxu0 %vm6360_vm1, %v9777_v1  ;;  %5982 = vmatprep.mubr.msk.f32.mxu1 %vm6360_vm1, %v9777_v1  ;;  %v1065_v63 = vld [vmem:[%s6663_s26 + $0x40] sm:$0xff]  ;;  %v1538_v0 = vld [vmem:[%s6457_s25 + $0x11] sm:$0xff]  ;;  %v1541_v5 = vld [vmem:[%s6457_s25 + $0x29] sm:$0xff]  ;;  %s5806_s26 = sshll.u32 %s10487_s14, 6 }
  0x26   : > { %v1539_v2 = vld [vmem:[%s6457_s25 + $0x19] sm:$0xff]  ;;  %v1540_v4 = vld [vmem:[%s6457_s25 + $0x21] sm:$0xff]  ;;  %v1542_v6 = vld [vmem:[%s6457_s25 + $0x31] sm:$0xff]  ;;  %s9669_s27 = scalar_lea.vmem %s9774_s10, %s5806_s26 }
  0x27   : > { %v5781_v3 = vld [vmem:[%s9768_s4 + $0x20] sm:$0xf]  ;;  %v1545_v9 = vld [vmem:[%s6457_s25 + $0x49] sm:$0xff]  ;;  %v1698_v12 = vld [vmem:[%s6451_s22 + $0x12] sm:$0xff] }
  0x28   : > { %5951 = vmatmul.mubr.msk.f32.gmra.mrb[10].mxu0 %vm455_vm2, %v449_v14  ;;  %5983 = vmatmul.mubr.msk.f32.gmra.mrb[10].mxu1 %vm455_vm2, %v440_v15  ;;  %v1543_v7 = vld [vmem:[%s6457_s25 + $0x39] sm:$0xff]  ;;  %v1544_v8 = vld [vmem:[%s6457_s25 + $0x41] sm:$0xff]  ;;  %v1385_v10 = vld [vmem:[%s6451_s22 + $0x49] sm:$0xff] }
  0x29   : > { %5953 = vmatprep.mubr.msk.f32.mxu0 %vm6360_vm1, %v9777_v1  ;;  %5985 = vmatprep.mubr.msk.f32.mxu1 %vm6360_vm1, %v9777_v1  ;;  %v1697_v11 = vld [vmem:[%s6451_s22 + $0xa] sm:$0xff]  ;;  %v1699_v13 = vld [vmem:[%s6451_s22 + $0x1a] sm:$0xff]  ;;  %v1700_v14 = vld [vmem:[%s6451_s22 + $0x22] sm:$0xff] }
  0x2a   : > { %v1701_v15 = vld [vmem:[%s6451_s22 + $0x2a] sm:$0xff] }
  0x2c   : > { %5954 = vmatmul.mubr.msk.f32.gmra.mrb[12].mxu0 %vm455_vm2, %v450_v16  ;;  %5986 = vmatmul.mubr.msk.f32.gmra.mrb[12].mxu1 %vm455_vm2, %v441_v17  ;;  %v1702_v16 = vld [vmem:[%s6451_s22 + $0x32] sm:$0xff]  ;;  %v1703_v17 = vld [vmem:[%s6451_s22 + $0x3a] sm:$0xff] }
  0x2d   : > { %5956 = vmatprep.mubr.msk.f32.mxu0 %vm6360_vm1, %v9777_v1  ;;  %5988 = vmatprep.mubr.msk.f32.mxu1 %vm6360_vm1, %v9777_v1 }
  0x30   : > { %5957 = vmatmul.mubr.msk.f32.gmra.mrb[14].mxu0 %vm455_vm2, %v451_v18  ;;  %5989 = vmatmul.mubr.msk.f32.gmra.mrb[14].mxu1 %vm455_vm2, %v442_v19  ;;  %v1704_v18 = vld [vmem:[%s6451_s22 + $0x42] sm:$0xff]  ;;  %v1705_v19 = vld [vmem:[%s6451_s22 + $0x4a] sm:$0xff] }
  0x31   : > { %5959 = vmatprep.mubr.msk.f32.mxu0 %vm6360_vm1, %v9777_v1  ;;  %6022 = vmatprep.mubr.msk.f32.mxu1 %vm6360_vm1, %v9777_v1 }
  0x34   : > { %5960 = vmatmul.mubr.msk.f32.gmra.mrb[16].mxu0 %vm455_vm2, %v452_v20  ;;  %6023 = vmatmul.mubr.msk.f32.vlgmr.msra.gmra.mrb[16].mxu1 %vm455_vm2, %v897_v21 }
  0x35   : > { %5964 = vmatprep.mubr.msk.f32.mxu0 %vm6360_vm1, %v9777_v1  ;;  %6025 = vmatprep.mubr.msk.f32.mxu1 %vm6360_vm1, %v9777_v1 }
  0x36   : > { %6079 = vmatpush3.msk.msra.mxu1 %vm483_vm0, %v5748_v22 }
  0x37   : > { %6136 = vmatprep.subr.mxu1 %v9777_v1 }
  0x38   : > { %5965 = vmatmul.mubr.msk.f32.vlgmr.msra.gmra.mrb[18].mxu0 %vm455_vm2, %v434_v23  ;;  %6026 = vmatmul.mubr.msk.f32.gmra.mrb[18].mxu1 %vm455_vm2, %v898_v24 }
  0x39   : > { %5992 = vmatpush3.msk.msra.mxu0 %vm483_vm0, %v5715_v25  ;;  %5993 = vmatprep.mubr.msk.f32.mxu0 %vm6360_vm1, %v9777_v1 }
  0x3a   : > { %6049 = vmatprep.subr.mxu0 %v9777_v1  ;;  %6028 = vmatprep.mubr.msk.f32.mxu1 %vm6360_vm1, %v9777_v1 }
  0x3c   : > { %5994 = vmatmul.mubr.msk.f32.vlgmr.msra.gmra.mrb[20].mxu0 %vm455_vm2, %v737_v26  ;;  %6029 = vmatmul.mubr.msk.f32.gmra.mrb[20].mxu1 %vm455_vm2, %v899_v27 }
  0x3d   : > { %6050 = vmatpush3.msk.msra.mxu0 %vm483_vm0, %v5737_v28  ;;  %5996 = vmatprep.mubr.msk.f32.mxu0 %vm6360_vm1, %v9777_v1 }
  0x3e   : > { %6031 = vmatprep.mubr.msk.f32.mxu1 %vm6360_vm1, %v9777_v1  ;;  %6107 = vmatprep.subr.mxu0 %v9777_v1 }
  0x40   : > { %5997 = vmatmul.mubr.msk.f32.gmra.mrb[22].mxu0 %vm455_vm2, %v6573_v29  ;;  %6032 = vmatmul.mubr.msk.f32.gmra.mrb[22].mxu1 %vm455_vm2, %v900_v30 }
  0x41   : > { %5999 = vmatprep.mubr.msk.f32.mxu0 %vm6360_vm1, %v9777_v1  ;;  %6034 = vmatprep.mubr.msk.f32.mxu1 %vm6360_vm1, %v9777_v1 }
  0x44   : > { %6000 = vmatmul.mubr.msk.f32.gmra.mrb[24].mxu0 %vm455_vm2, %v6585_v31  ;;  %6035 = vmatmul.mubr.msk.f32.gmra.mrb[24].mxu1 %vm455_vm2, %v901_v32 }
  0x45   : > { %6002 = vmatprep.mubr.msk.f32.mxu0 %vm6360_vm1, %v9777_v1  ;;  %6037 = vmatprep.mubr.msk.f32.mxu1 %vm6360_vm1, %v9777_v1 }
  0x48   : > { %6003 = vmatmul.mubr.msk.f32.gmra.mrb[26].mxu0 %vm455_vm2, %v6596_v33  ;;  %6038 = vmatmul.mubr.msk.f32.gmra.mrb[26].mxu1 %vm455_vm2, %v902_v34 }
  0x49   : > { %6005 = vmatprep.mubr.msk.f32.mxu0 %vm6360_vm1, %v9777_v1  ;;  %6040 = vmatprep.mubr.msk.f32.mxu1 %vm6360_vm1, %v9777_v1 }
  0x4c   : > { %6006 = vmatmul.mubr.msk.f32.gmra.mrb[28].mxu0 %vm455_vm2, %v6607_v35  ;;  %6041 = vmatmul.mubr.msk.f32.gmra.mrb[28].mxu1 %vm455_vm2, %v903_v36 }
  0x4d   : > { %6008 = vmatprep.mubr.msk.f32.mxu0 %vm6360_vm1, %v9777_v1  ;;  %6043 = vmatprep.mubr.msk.f32.mxu1 %vm6360_vm1, %v9777_v1 }
  0x50   : > { %6009 = vmatmul.mubr.msk.f32.gmra.mrb[30].mxu0 %vm455_vm2, %v6618_v37  ;;  %6044 = vmatmul.mubr.msk.f32.gmra.mrb[30].mxu1 %vm455_vm2, %v904_v38 }
  0x51   : > { %6011 = vmatprep.mubr.msk.f32.mxu0 %vm6360_vm1, %v9777_v1  ;;  %6046 = vmatprep.mubr.msk.f32.mxu1 %vm6360_vm1, %v9777_v1 }
  0x54   : > { %6012 = vmatmul.mubr.msk.f32.gmra.mrb[32].mxu0 %vm455_vm2, %v6629_v39  ;;  %6047 = vmatmul.mubr.msk.f32.gmra.mrb[32].mxu1 %vm455_vm2, %v905_v40 }
  0x55   : > { %6014 = vmatprep.mubr.msk.f32.mxu0 %vm6360_vm1, %v9777_v1  ;;  %6080 = vmatprep.mubr.msk.f32.mxu1 %vm6360_vm1, %v9777_v1 }
  0x58   : > { %6015 = vmatmul.mubr.msk.f32.gmra.mrb[34].mxu0 %vm455_vm2, %v6640_v41  ;;  %6081 = vmatmul.mubr.msk.f32.vlgmr.msra.gmra.mrb[34].mxu1 %vm455_vm2, %v1217_v42 }
  0x59   : > { %6017 = vmatprep.mubr.msk.f32.mxu0 %vm6360_vm1, %v9777_v1  ;;  %6083 = vmatprep.mubr.msk.f32.mxu1 %vm6360_vm1, %v9777_v1 }
  0x5a   : > { %6137 = vmatpush3.msk.msra.mxu1 %vm483_vm0, %v5770_v43 }
  0x5c   : > { %6018 = vmatmul.mubr.msk.f32.gmra.mrb[36].mxu0 %vm455_vm2, %v6654_v44  ;;  %6084 = vmatmul.mubr.msk.f32.gmra.mrb[36].mxu1 %vm455_vm2, %v1218_v45 }
  0x5d   : > { %6051 = vmatprep.mubr.msk.f32.mxu0 %vm6360_vm1, %v9777_v1  ;;  %6086 = vmatprep.mubr.msk.f32.mxu1 %vm6360_vm1, %v9777_v1 }
  0x60   : > { %6052 = vmatmul.mubr.msk.f32.vlgmr.msra.gmra.mrb[38].mxu0 %vm455_vm2, %v1057_v46  ;;  %6087 = vmatmul.mubr.msk.f32.gmra.mrb[38].mxu1 %vm455_vm2, %v1219_v47 }
  0x61   : > { %6108 = vmatpush3.msk.msra.mxu0 %vm483_vm0, %v5759_v48  ;;  %6054 = vmatprep.mubr.msk.f32.mxu0 %vm6360_vm1, %v9777_v1 }
  0x62   : > { %6089 = vmatprep.mubr.msk.f32.mxu1 %vm6360_vm1, %v9777_v1  ;;  %6165 = vmatprep.subr.mxu0 %v9777_v1 }
  0x64   : > { %6055 = vmatmul.mubr.msk.f32.gmra.mrb[40].mxu0 %vm455_vm2, %v1058_v49  ;;  %6090 = vmatmul.mubr.msk.f32.gmra.mrb[40].mxu1 %vm455_vm2, %v1220_v50 }
  0x65   : > { %6057 = vmatprep.mubr.msk.f32.mxu0 %vm6360_vm1, %v9777_v1  ;;  %6092 = vmatprep.mubr.msk.f32.mxu1 %vm6360_vm1, %v9777_v1 }
  0x68   : > { %6058 = vmatmul.mubr.msk.f32.gmra.mrb[42].mxu0 %vm455_vm2, %v1059_v51  ;;  %6093 = vmatmul.mubr.msk.f32.gmra.mrb[42].mxu1 %vm455_vm2, %v1221_v52 }
  0x69   : > { %6060 = vmatprep.mubr.msk.f32.mxu0 %vm6360_vm1, %v9777_v1  ;;  %6095 = vmatprep.mubr.msk.f32.mxu1 %vm6360_vm1, %v9777_v1 }
  0x6c   : > { %6061 = vmatmul.mubr.msk.f32.gmra.mrb[44].mxu0 %vm455_vm2, %v1060_v53  ;;  %6096 = vmatmul.mubr.msk.f32.gmra.mrb[44].mxu1 %vm455_vm2, %v1222_v54 }
  0x6d   : > { %6063 = vmatprep.mubr.msk.f32.mxu0 %vm6360_vm1, %v9777_v1  ;;  %6098 = vmatprep.mubr.msk.f32.mxu1 %vm6360_vm1, %v9777_v1 }
  0x70   : > { %6064 = vmatmul.mubr.msk.f32.gmra.mrb[46].mxu0 %vm455_vm2, %v1061_v55  ;;  %6099 = vmatmul.mubr.msk.f32.gmra.mrb[46].mxu1 %vm455_vm2, %v1223_v56 }
  0x71   : > { %6066 = vmatprep.mubr.msk.f32.mxu0 %vm6360_vm1, %v9777_v1  ;;  %6101 = vmatprep.mubr.msk.f32.mxu1 %vm6360_vm1, %v9777_v1 }
  0x74   : > { %6067 = vmatmul.mubr.msk.f32.gmra.mrb[48].mxu0 %vm455_vm2, %v1062_v57  ;;  %6102 = vmatmul.mubr.msk.f32.gmra.mrb[48].mxu1 %vm455_vm2, %v1224_v58 }
  0x75   : > { %6069 = vmatprep.mubr.msk.f32.mxu0 %vm6360_vm1, %v9777_v1  ;;  %6104 = vmatprep.mubr.msk.f32.mxu1 %vm6360_vm1, %v9777_v1 }
  0x78   : > { %6070 = vmatmul.mubr.msk.f32.gmra.mrb[50].mxu0 %vm455_vm2, %v1063_v59  ;;  %6105 = vmatmul.mubr.msk.f32.gmra.mrb[50].mxu1 %vm455_vm2, %v1225_v60 }
  0x79   : > { %6072 = vmatprep.mubr.msk.f32.mxu0 %vm6360_vm1, %v9777_v1  ;;  %6138 = vmatprep.mubr.msk.f32.mxu1 %vm6360_vm1, %v9777_v1 }
  0x7c   : > { %6073 = vmatmul.mubr.msk.f32.gmra.mrb[52].mxu0 %vm455_vm2, %v1064_v61  ;;  %6139 = vmatmul.mubr.msk.f32.vlgmr.msra.gmra.mrb[52].mxu1 %vm455_vm2, %v1537_v62 }
  0x7d   : > { %6075 = vmatprep.mubr.msk.f32.mxu0 %vm6360_vm1, %v9777_v1  ;;  %6141 = vmatprep.mubr.msk.f32.mxu1 %vm6360_vm1, %v9777_v1 }
  0x80   : > { %6076 = vmatmul.mubr.msk.f32.gmra.mrb[54].mxu0 %vm455_vm2, %v1065_v63  ;;  %6142 = vmatmul.mubr.msk.f32.gmra.mrb[54].mxu1 %vm455_vm2, %v1538_v0 }
  0x81   : > { %6109 = vmatprep.mubr.msk.f32.mxu0 %vm6360_vm1, %v9777_v1  ;;  %6144 = vmatprep.mubr.msk.f32.mxu1 %vm6360_vm1, %v9777_v1 }
  0x84   : > { %6110 = vmatmul.mubr.msk.f32.vlgmr.msra.gmra.mrb[56].mxu0 %vm455_vm2, %v6573_v29  ;;  %6145 = vmatmul.mubr.msk.f32.gmra.mrb[56].mxu1 %vm455_vm2, %v1539_v2 }
  0x85   : > { %6166 = vmatpush3.msk.msra.mxu0 %vm483_vm0, %v5781_v3  ;;  %6112 = vmatprep.mubr.msk.f32.mxu0 %vm6360_vm1, %v9777_v1 }
  0x86   : > { %6147 = vmatprep.mubr.msk.f32.mxu1 %vm6360_vm1, %v9777_v1 }
  0x88   : > { %6113 = vmatmul.mubr.msk.f32.gmra.mrb[58].mxu0 %vm455_vm2, %v6585_v31  ;;  %6148 = vmatmul.mubr.msk.f32.gmra.mrb[58].mxu1 %vm455_vm2, %v1540_v4 }
  0x89   : > { %6115 = vmatprep.mubr.msk.f32.mxu0 %vm6360_vm1, %v9777_v1  ;;  %6150 = vmatprep.mubr.msk.f32.mxu1 %vm6360_vm1, %v9777_v1 }
  0x8c   : > { %6116 = vmatmul.mubr.msk.f32.gmra.mrb[60].mxu0 %vm455_vm2, %v6596_v33  ;;  %6151 = vmatmul.mubr.msk.f32.gmra.mrb[60].mxu1 %vm455_vm2, %v1541_v5 }
  0x8d   : > { %6118 = vmatprep.mubr.msk.f32.mxu0 %vm6360_vm1, %v9777_v1  ;;  %6153 = vmatprep.mubr.msk.f32.mxu1 %vm6360_vm1, %v9777_v1 }
  0x90   : > { %6119 = vmatmul.mubr.msk.f32.gmra.mrb[62].mxu0 %vm455_vm2, %v6607_v35  ;;  %6154 = vmatmul.mubr.msk.f32.gmra.mrb[62].mxu1 %vm455_vm2, %v1542_v6 }
  0x91   : > { %6121 = vmatprep.mubr.msk.f32.mxu0 %vm6360_vm1, %v9777_v1  ;;  %6156 = vmatprep.mubr.msk.f32.mxu1 %vm6360_vm1, %v9777_v1 }
  0x94   : > { %6122 = vmatmul.mubr.msk.f32.gmra.mrb[64].mxu0 %vm455_vm2, %v6618_v37  ;;  %6157 = vmatmul.mubr.msk.f32.gmra.mrb[64].mxu1 %vm455_vm2, %v1543_v7 }
  0x95   : > { %6124 = vmatprep.mubr.msk.f32.mxu0 %vm6360_vm1, %v9777_v1  ;;  %6159 = vmatprep.mubr.msk.f32.mxu1 %vm6360_vm1, %v9777_v1 }
  0x98   : > { %6125 = vmatmul.mubr.msk.f32.gmra.mrb[66].mxu0 %vm455_vm2, %v6629_v39  ;;  %6160 = vmatmul.mubr.msk.f32.gmra.mrb[66].mxu1 %vm455_vm2, %v1544_v8 }
  0x99   : > { %6127 = vmatprep.mubr.msk.f32.mxu0 %vm6360_vm1, %v9777_v1  ;;  %6162 = vmatprep.mubr.msk.f32.mxu1 %vm6360_vm1, %v9777_v1 }
  0x9c   : > { %6128 = vmatmul.mubr.msk.f32.gmra.mrb[68].mxu0 %vm455_vm2, %v6640_v41  ;;  %6163 = vmatmul.mubr.msk.f32.gmra.mrb[68].mxu1 %vm455_vm2, %v1545_v9 }
  0x9d   : > { %6130 = vmatprep.mubr.msk.f32.mxu0 %vm6360_vm1, %v9777_v1  ;;  %6198 = vmatprep.mubr.msk.f32.mxu1 %vm6360_vm1, %v9777_v1 }
  0xa0   : > { %6131 = vmatmul.mubr.msk.f32.gmra.mrb[70].mxu0 %vm455_vm2, %v6654_v44 }
  0xa1   : > { %6133 = vmatprep.mubr.msk.f32.mxu0 %vm6360_vm1, %v9777_v1 }
  0xa4   : > { %6134 = vmatmul.mubr.msk.f32.gmra.mrb[72].mxu0 %vm455_vm2, %v1385_v10 }
  0xa5   : > { %6167 = vmatprep.mubr.msk.f32.mxu0 %vm6360_vm1, %v9777_v1 }
  0xa8   : > { %6168 = vmatmul.mubr.msk.f32.vlgmr.msra.gmra.mrb[74].mxu0 %vm455_vm2, %v1697_v11 }
  0xa9   : > { %6170 = vmatprep.mubr.msk.f32.mxu0 %vm6360_vm1, %v9777_v1 }
  0xac   : > { %6171 = vmatmul.mubr.msk.f32.gmra.mrb[76].mxu0 %vm455_vm2, %v1698_v12 }
  0xad   : > { %6173 = vmatprep.mubr.msk.f32.mxu0 %vm6360_vm1, %v9777_v1 }
  0xb0   : > { %6174 = vmatmul.mubr.msk.f32.gmra.mrb[78].mxu0 %vm455_vm2, %v1699_v13 }
  0xb1   : > { %6176 = vmatprep.mubr.msk.f32.mxu0 %vm6360_vm1, %v9777_v1 }
  0xb4   : > { %6177 = vmatmul.mubr.msk.f32.gmra.mrb[80].mxu0 %vm455_vm2, %v1700_v14 }
  0xb5   : > { %6179 = vmatprep.mubr.msk.f32.mxu0 %vm6360_vm1, %v9777_v1 }
  0xb8   : > { %6180 = vmatmul.mubr.msk.f32.gmra.mrb[82].mxu0 %vm455_vm2, %v1701_v15 }
  0xb9   : > { %6182 = vmatprep.mubr.msk.f32.mxu0 %vm6360_vm1, %v9777_v1 }
  0xbc   : > { %6183 = vmatmul.mubr.msk.f32.gmra.mrb[84].mxu0 %vm455_vm2, %v1702_v16 }
  0xbd   : > { %6185 = vmatprep.mubr.msk.f32.mxu0 %vm6360_vm1, %v9777_v1 }
  0xc0   : > { %6186 = vmatmul.mubr.msk.f32.gmra.mrb[86].mxu0 %vm455_vm2, %v1703_v17 }
  0xc1   : > { %6188 = vmatprep.mubr.msk.f32.mxu0 %vm6360_vm1, %v9777_v1 }
  0xc4   : > { %6189 = vmatmul.mubr.msk.f32.gmra.mrb[88].mxu0 %vm455_vm2, %v1704_v18 }
  0xc5   : > { %6191 = vmatprep.mubr.msk.f32.mxu0 %vm6360_vm1, %v9777_v1 }
  0xc8   : > { %6192 = vmatmul.mubr.msk.f32.gmra.mrb[90].mxu0 %vm455_vm2, %v1705_v19 }
  0xe7   : > { %v553_v20 = vpop.f32.mrb[0].mxu0  ;;  %v698_v21 = vpop.f32.mrb[0].mxu1 }
  0xe8   : > { %v5937_v22 = vpop.f32.mrb[1].mxu0  ;;  %v5969_v23 = vpop.f32.mrb[1].mxu1 }
  0xeb   : > { %v558_v24 = vpop.f32.mrb[2].mxu0  ;;  %v703_v25 = vpop.f32.mrb[2].mxu1 }
  0xec   : > { %v699_v26 = vadd.f32 %v698_v21, %v558_v24  ;;  %v5940_v27 = vpop.f32.mrb[3].mxu0  ;;  %v5972_v28 = vpop.f32.mrb[3].mxu1 }
  0xef   : > { %v563_v29 = vpop.f32.mrb[4].mxu0  ;;  %v708_v30 = vpop.f32.mrb[4].mxu1 }
  0xf0   : > { %v704_v31 = vadd.f32 %v703_v25, %v563_v29  ;;  %v5943_v32 = vpop.f32.mrb[5].mxu0  ;;  %v5975_v33 = vpop.f32.mrb[5].mxu1 }
  0xf3   : > { %v568_v34 = vpop.f32.mrb[6].mxu0  ;;  %v713_v35 = vpop.f32.mrb[6].mxu1 }
  0xf4   : > { %v709_v36 = vadd.f32 %v708_v30, %v568_v34  ;;  %v5946_v37 = vpop.f32.mrb[7].mxu0  ;;  %v5978_v38 = vpop.f32.mrb[7].mxu1 }
  0xf7   : > { %v573_v39 = vpop.f32.mrb[8].mxu0  ;;  %v718_v40 = vpop.f32.mrb[8].mxu1 }
  0xf8   : > { %v714_v41 = vadd.f32 %v713_v35, %v573_v39  ;;  %v5949_v42 = vpop.f32.mrb[9].mxu0  ;;  %v5981_v43 = vpop.f32.mrb[9].mxu1 }
  0xfb   : > { %v578_v44 = vpop.f32.mrb[10].mxu0  ;;  %v723_v45 = vpop.f32.mrb[10].mxu1 }
  0xfc   : > { %v719_v46 = vadd.f32 %v718_v40, %v578_v44  ;;  %v5952_v47 = vpop.f32.mrb[11].mxu0  ;;  %v5984_v48 = vpop.f32.mrb[11].mxu1 }
  0xff   : > { %v583_v49 = vpop.f32.mrb[12].mxu0  ;;  %v728_v50 = vpop.f32.mrb[12].mxu1 }
 0x100   : > { %v724_v51 = vadd.f32 %v723_v45, %v583_v49  ;;  %v5955_v52 = vpop.f32.mrb[13].mxu0  ;;  %v5987_v53 = vpop.f32.mrb[13].mxu1 }
 0x103   : > { %v588_v54 = vpop.f32.mrb[14].mxu0  ;;  %v733_v55 = vpop.f32.mrb[14].mxu1 }
 0x104   : > { %v729_v56 = vadd.f32 %v728_v50, %v588_v54  ;;  %v5958_v57 = vpop.f32.mrb[15].mxu0  ;;  %v5990_v58 = vpop.f32.mrb[15].mxu1 }
 0x107   : > { %v593_v59 = vpop.f32.mrb[16].mxu0  ;;  %v1004_v60 = vpop.f32.mrb[16].mxu1 }
 0x108   : > { %v734_v61 = vadd.f32 %v733_v55, %v593_v59  ;;  %v5961_v62 = vpop.f32.mrb[17].mxu0  ;;  %v6024_v63 = vpop.f32.mrb[17].mxu1 }
 0x10b   : > { %v693_v0 = vpop.f32.mrb[18].mxu0  ;;  %v1009_v2 = vpop.f32.mrb[18].mxu1 }
 0x10c   : > { %v694_v3 = vadd.f32 %v693_v0, %v553_v20  ;;  %v5966_v4 = vpop.f32.mrb[19].mxu0  ;;  %v6027_v5 = vpop.f32.mrb[19].mxu1 }
 0x10f   : > { %v844_v6 = vpop.f32.mrb[20].mxu0  ;;  %v1014_v7 = vpop.f32.mrb[20].mxu1 }
 0x110   : > { %v888_v8 = vadd.f32 %v844_v6, %v694_v3  ;;  %v5995_v9 = vpop.f32.mrb[21].mxu0  ;;  %v6030_v10 = vpop.f32.mrb[21].mxu1 }
 0x112   : > { %v1048_v11 = vadd.f32 %v1004_v60, %v888_v8 }
 0x113   : > { %v849_v12 = vpop.f32.mrb[22].mxu0  ;;  %v1019_v13 = vpop.f32.mrb[22].mxu1 }
 0x114   : > { %v889_v14 = vadd.f32 %v849_v12, %v699_v26  ;;  %v5998_v15 = vpop.f32.mrb[23].mxu0  ;;  %v6033_v16 = vpop.f32.mrb[23].mxu1 }
 0x116   : > { %v1049_v17 = vadd.f32 %v1009_v2, %v889_v14 }
 0x117   : > { %v854_v18 = vpop.f32.mrb[24].mxu0  ;;  %v1024_v19 = vpop.f32.mrb[24].mxu1 }
 0x118   : > { %v890_v21 = vadd.f32 %v854_v18, %v704_v31  ;;  %v6001_v22 = vpop.f32.mrb[25].mxu0  ;;  %v6036_v23 = vpop.f32.mrb[25].mxu1 }
 0x11a   : > { %v1050_v20 = vadd.f32 %v1014_v7, %v890_v21 }
 0x11b   : > { %v859_v24 = vpop.f32.mrb[26].mxu0  ;;  %v1029_v25 = vpop.f32.mrb[26].mxu1 }
 0x11c   : > { %v891_v27 = vadd.f32 %v859_v24, %v709_v36  ;;  %v6004_v28 = vpop.f32.mrb[27].mxu0  ;;  %v6039_v29 = vpop.f32.mrb[27].mxu1 }
 0x11e   : > { %v1051_v30 = vadd.f32 %v1019_v13, %v891_v27 }
 0x11f   : > { %v864_v32 = vpop.f32.mrb[28].mxu0  ;;  %v1034_v33 = vpop.f32.mrb[28].mxu1 }
 0x120   : > { %v892_v34 = vadd.f32 %v864_v32, %v714_v41  ;;  %v6007_v35 = vpop.f32.mrb[29].mxu0  ;;  %v6042_v26 = vpop.f32.mrb[29].mxu1 }
 0x122   : > { %v1052_v37 = vadd.f32 %v1024_v19, %v892_v34 }
 0x123   : > { %v869_v38 = vpop.f32.mrb[30].mxu0  ;;  %v1039_v39 = vpop.f32.mrb[30].mxu1 }
 0x124   : > { %v893_v40 = vadd.f32 %v869_v38, %v719_v46  ;;  %v6010_v42 = vpop.f32.mrb[31].mxu0  ;;  %v6045_v31 = vpop.f32.mrb[31].mxu1 }
 0x126   : > { %v1053_v43 = vadd.f32 %v1029_v25, %v893_v40 }
 0x127   : > { %v874_v44 = vpop.f32.mrb[32].mxu0  ;;  %v1044_v45 = vpop.f32.mrb[32].mxu1 }
 0x128   : > { %v894_v47 = vadd.f32 %v874_v44, %v724_v51  ;;  %v6013_v48 = vpop.f32.mrb[33].mxu0  ;;  %v6048_v36 = vpop.f32.mrb[33].mxu1 }
 0x12a   : > { %v1054_v49 = vadd.f32 %v1034_v33, %v894_v47 }
 0x12b   : > { %v879_v50 = vpop.f32.mrb[34].mxu0  ;;  %v1324_v52 = vpop.f32.mrb[34].mxu1 }
 0x12c   : > { %v895_v53 = vadd.f32 %v879_v50, %v729_v56  ;;  %v6016_v54 = vpop.f32.mrb[35].mxu0  ;;  %v6082_v41 = vpop.f32.mrb[35].mxu1 }
 0x12e   : > { %v1055_v55 = vadd.f32 %v1039_v39, %v895_v53 }
 0x12f   : > { %v884_v57 = vpop.f32.mrb[36].mxu0  ;;  %v1329_v58 = vpop.f32.mrb[36].mxu1 }
 0x130   : > { %v896_v59 = vadd.f32 %v884_v57, %v734_v61  ;;  %v6019_v60 = vpop.f32.mrb[37].mxu0  ;;  %v6085_v46 = vpop.f32.mrb[37].mxu1 }
 0x132   : > { %v1056_v62 = vadd.f32 %v1044_v45, %v896_v59 }
 0x133   : > { %v1164_v63 = vpop.f32.mrb[38].mxu0  ;;  %v1334_v0 = vpop.f32.mrb[38].mxu1 }
 0x134   : > { %v1208_v2 = vadd.f32 %v1164_v63, %v1048_v11  ;;  %v6053_v3 = vpop.f32.mrb[39].mxu0  ;;  %v6088_v51 = vpop.f32.mrb[39].mxu1 }
 0x136   : > { %v1368_v4 = vadd.f32 %v1324_v52, %v1208_v2 }
 0x137   : > { %v1169_v5 = vpop.f32.mrb[40].mxu0  ;;  %v1339_v6 = vpop.f32.mrb[40].mxu1 }
 0x138   : > { %v1209_v7 = vadd.f32 %v1169_v5, %v1049_v17  ;;  %v6056_v8 = vpop.f32.mrb[41].mxu0  ;;  %v6091_v56 = vpop.f32.mrb[41].mxu1 }
 0x13a   : > { %v1369_v9 = vadd.f32 %v1329_v58, %v1209_v7 }
 0x13b   : > { %v1174_v10 = vpop.f32.mrb[42].mxu0  ;;  %v1344_v12 = vpop.f32.mrb[42].mxu1 }
 0x13c   : > { %v1210_v13 = vadd.f32 %v1174_v10, %v1050_v20  ;;  %v6059_v14 = vpop.f32.mrb[43].mxu0  ;;  %v6094_v61 = vpop.f32.mrb[43].mxu1 }
 0x13e   : > { %v1370_v15 = vadd.f32 %v1334_v0, %v1210_v13 }
 0x13f   : > { %v1179_v16 = vpop.f32.mrb[44].mxu0  ;;  %v1349_v18 = vpop.f32.mrb[44].mxu1 }
 0x140   : > { %v1211_v19 = vadd.f32 %v1179_v16, %v1051_v30  ;;  %v6062_v21 = vpop.f32.mrb[45].mxu0  ;;  %v6097_v11 = vpop.f32.mrb[45].mxu1 }
 0x142   : > { %v1371_v22 = vadd.f32 %v1339_v6, %v1211_v19 }
 0x143   : > { %v1184_v23 = vpop.f32.mrb[46].mxu0  ;;  %v1354_v24 = vpop.f32.mrb[46].mxu1 }
 0x144   : > { %v1212_v25 = vadd.f32 %v1184_v23, %v1052_v37  ;;  %v6065_v27 = vpop.f32.mrb[47].mxu0  ;;  %v6100_v17 = vpop.f32.mrb[47].mxu1 }
 0x146   : > { %v1372_v28 = vadd.f32 %v1344_v12, %v1212_v25 }
 0x147   : > { %v1189_v29 = vpop.f32.mrb[48].mxu0  ;;  %v1359_v32 = vpop.f32.mrb[48].mxu1 }
 0x148   : > { %v1213_v33 = vadd.f32 %v1189_v29, %v1053_v43  ;;  %v6068_v34 = vpop.f32.mrb[49].mxu0  ;;  %v6103_v20 = vpop.f32.mrb[49].mxu1  ;;  %v6861_v29 = vld [vmem:[%s9772_s8] sm:$0xff] }
 0x149   : > { %v9775_v20 = vmov 0.0|0.0  }
 0x14a   : > { %v1373_v35 = vadd.f32 %v1349_v18, %v1213_v33  ;;  %6278 = vmatprep.subr.bf16.mxu1 %v9775_v20 }
 0x14b   : > { %v1194_v26 = vpop.f32.mrb[50].mxu0  ;;  %v1364_v38 = vpop.f32.mrb[50].mxu1 }
 0x14c   : > { %v1214_v39 = vadd.f32 %v1194_v26, %v1054_v49  ;;  %v6071_v40 = vpop.f32.mrb[51].mxu0  ;;  %v6106_v30 = vpop.f32.mrb[51].mxu1 }
 0x14e   : > { %v1374_v42 = vadd.f32 %v1354_v24, %v1214_v39 }
 0x14f   : > { %v1199_v31 = vpop.f32.mrb[52].mxu0  ;;  %v1644_v44 = vpop.f32.mrb[52].mxu1 }
 0x150   : > { %v1215_v45 = vadd.f32 %v1199_v31, %v1055_v55  ;;  %v6074_v47 = vpop.f32.mrb[53].mxu0  ;;  %v6140_v37 = vpop.f32.mrb[53].mxu1 }
 0x151   : > { %v6362_v37 = vmov 1966171168  }
 0x152   : > { %v1375_v48 = vadd.f32 %v1359_v32, %v1215_v45 }
 0x153   : > { %v1204_v36 = vpop.f32.mrb[54].mxu0  ;;  %v1649_v50 = vpop.f32.mrb[54].mxu1 }
 0x154   : > { %v1216_v52 = vadd.f32 %v1204_v36, %v1056_v62  ;;  %v6077_v53 = vpop.f32.mrb[55].mxu0  ;;  %v6143_v43 = vpop.f32.mrb[55].mxu1  ;;  %v1884_v36 = vunpack.c.l.s4 %v6362_v37 }
 0x156   : > { %v1376_v54 = vadd.f32 %v1364_v38, %v1216_v52 }
 0x157   : > { %v1484_v41 = vpop.f32.mrb[56].mxu0  ;;  %v1654_v57 = vpop.f32.mrb[56].mxu1 }
 0x158   : > { %v1528_v58 = vadd.f32 %v1484_v41, %v1368_v4  ;;  %v6111_v59 = vpop.f32.mrb[57].mxu0  ;;  %v6146_v49 = vpop.f32.mrb[57].mxu1 }
 0x15a   : > { %v1688_v60 = vadd.f32 %v1644_v44, %v1528_v58 }
 0x15b   : > { %v1489_v46 = vpop.f32.mrb[58].mxu0  ;;  %v1659_v63 = vpop.f32.mrb[58].mxu1 }
 0x15c   : > { %v1529_v0 = vadd.f32 %v1489_v46, %v1369_v9  ;;  %v6114_v2 = vpop.f32.mrb[59].mxu0  ;;  %v6149_v55 = vpop.f32.mrb[59].mxu1 }
 0x15e   : > { %v1689_v3 = vadd.f32 %v1649_v50, %v1529_v0  ;;  %v1886_v50 = vlaneseq }
 0x15f   : > { %v1494_v51 = vpop.f32.mrb[60].mxu0  ;;  %v1664_v5 = vpop.f32.mrb[60].mxu1 }
 0x160   : > { %v1530_v6 = vadd.f32 %v1494_v51, %v1370_v15  ;;  %v6117_v7 = vpop.f32.mrb[61].mxu0  ;;  %v6152_v62 = vpop.f32.mrb[61].mxu1  ;;  %v6890_v58 = vshrl.u32 %v1886_v50, 7 }
 0x162   : > { %v1690_v8 = vadd.f32 %v1654_v57, %v1530_v6  ;;  %v1885_v57 = vunpack.c.0.s8 %v1884_v36 }
 0x163   : > { %v1499_v56 = vpop.f32.mrb[62].mxu0  ;;  %v1669_v10 = vpop.f32.mrb[62].mxu1 }
 0x164   : > { %v1531_v12 = vadd.f32 %v1499_v56, %v1371_v22  ;;  %v6120_v13 = vpop.f32.mrb[63].mxu0  ;;  %v6155_v4 = vpop.f32.mrb[63].mxu1 }
 0x166   : > { %v6852_v14 = vadd.f32 %v1659_v63, %v1531_v12  ;;  %v6894_v63 = vsub.s32 %v1885_v57, %v6890_v58 }
 0x167   : > { %v1504_v61 = vpop.f32.mrb[64].mxu0  ;;  %v1674_v16 = vpop.f32.mrb[64].mxu1 }
 0x168   : > { %v1532_v18 = vadd.f32 %v1504_v61, %v1372_v28  ;;  %v6123_v9 = vpop.f32.mrb[65].mxu0  ;;  %v6158_v19 = vpop.f32.mrb[65].mxu1  ;;  %v6866_v28 = vld [vmem:[%s9772_s8 + $0x8] sm:$0xff]  ;;  %9948 = vst [vmem:[#allocation2_spill] sm:$0xff] %v6894_v63 }
 0x169   : > { %v9779_v26 = vand.u32 4294901760, %v6866_v28 }
 0x16a   : > { %v6854_v21 = vadd.f32 %v1664_v5, %v1532_v18 }
 0x16b   : > { %v1509_v11 = vpop.f32.mrb[66].mxu0  ;;  %v1679_v23 = vpop.f32.mrb[66].mxu1 }
 0x16c   : > { %v1533_v15 = vadd.f32 %v1509_v11, %v1373_v35  ;;  %v6126_v24 = vpop.f32.mrb[67].mxu0  ;;  %v6161_v25 = vpop.f32.mrb[67].mxu1  ;;  %v9780_v35 = vand.u32 4294901760, %v6861_v29 }
 0x16e   : > { %v6856_v27 = vadd.f32 %v1669_v10, %v1533_v15  ;;  %v6877_v39 = vpack.c.bf16 %v9779_v26, %v9780_v35 }
 0x16f   : > { %v1514_v17 = vpop.f32.mrb[68].mxu0  ;;  %v1684_v22 = vpop.f32.mrb[68].mxu1 }
 0x170   : > { %v1534_v32 = vadd.f32 %v1514_v17, %v1374_v42  ;;  %v6129_v33 = vpop.f32.mrb[69].mxu0  ;;  %v6164_v34 = vpop.f32.mrb[69].mxu1  ;;  %6280 = vmatpush3.bf16.msra.mxu1 %v6877_v39 }
 0x171   : > { %6281 = vmatprep.subr.bf16.mxu1 %v9775_v20 }
 0x172   : > { %v6871_v38 = vadd.f32 %v1674_v16, %v1534_v32 }
 0x173   : > { %v1519_v40 = vpop.f32.mrb[70].mxu0 }
 0x174   : > { %v1535_v30 = vadd.f32 %v1519_v40, %v1375_v48  ;;  %v6132_v42 = vpop.f32.mrb[71].mxu0  ;;  %v6888_v48 = vld [vmem:[%s9769_s5] ss:$0 sm:$0xff] }
 0x176   : > { %v6881_v31 = vadd.f32 %v1679_v23, %v1535_v30 }
 0x177   : > { %v1524_v44 = vpop.f32.mrb[72].mxu0 }
 0x178   : > { %v1536_v45 = vadd.f32 %v1524_v44, %v1376_v54  ;;  %v6135_v47 = vpop.f32.mrb[73].mxu0 }
 0x17a   : > { %v6883_v52 = vadd.f32 %v1684_v22, %v1536_v45 }
 0x17b   : > { %v1804_v53 = vpop.f32.mrb[74].mxu0 }
 0x17c   : > { %v1848_v43 = vadd.f32 %v1804_v53, %v1688_v60  ;;  %v6169_v41 = vpop.f32.mrb[75].mxu0 }
 0x17e   : > { %v1864_v59 = vadd.f32 %v6888_v48, %v1848_v43 }
 0x17f   : > { %v1809_v54 = vpop.f32.mrb[76].mxu0 }
 0x180   : > { %v1849_v49 = vadd.f32 %v1809_v54, %v1689_v3  ;;  %v6172_v46 = vpop.f32.mrb[77].mxu0  ;;  %v1882_v0 = vcombine.high %v1864_v59, %v1864_v59  ;;  %v1889_v51 = vrot.slane %v1864_v59, %v6894_v63 }
 0x182   : > { %v1896_v5 = vrot.slane %v1882_v0, %v6894_v63  ;;  %v1865_v7 = vadd.f32 %v6888_v48, %v1849_v49  ;;  %v1897_v56 = vcombine.high %v1889_v51, %v1889_v51  ;;  %v6902_v3 = vrot.slane %v1889_v51, %v6894_v63 }
 0x183   : > { %v1814_v2 = vpop.f32.mrb[78].mxu0 }
 0x184   : > { %v6175_v55 = vpop.f32.mrb[79].mxu0  ;;  %v1850_v60 = vadd.f32 %v1814_v2, %v1690_v8  ;;  %v1898_v10 = vcombine.high %v1896_v5, %v1896_v5  ;;  %v1938_v13 = vrot.slane %v1865_v7, %v6894_v63  ;;  %v6906_v61 = vrot.slane %v1897_v56, %v6894_v63 }
 0x185   : > { %v6912_v8 = vrot.slane %v1896_v5, %v6894_v63  ;;  %v1931_v18 = vcombine.high %v1865_v7, %v1865_v7  ;;  %v6918_v19 = vcombine.high %v6902_v3, %v6902_v3  ;;  %v2805_v34 = vmul.f32 %v6902_v3, %v6902_v3 }
 0x186   : > { %v6909_v16 = vrot.slane %v1898_v10, %v6894_v63  ;;  %v1946_v11 = vcombine.high %v1938_v13, %v1938_v13  ;;  %v6922_v15 = vcombine.high %v6906_v61, %v6906_v61  ;;  %v2383_v25 = vcombine.low %v6902_v3, %v6906_v61 }
 0x187   : > { %v1819_v6 = vpop.f32.mrb[80].mxu0  ;;  %9950 = vst [vmem:[#allocation4_spill] sm:$0xff] %v6912_v8  ;;  %v5793_v17 = vcombine.high %v6902_v3, %v6906_v61  ;;  %v6934_v22 = vcombine.high %v6912_v8, %v6912_v8  ;;  %v1945_v40 = vrot.slane %v1931_v18, %v6894_v63  ;;  %v2806_v42 = vmul.f32 %v6906_v61, %v6906_v61 }
 0x188   : > { %v6178_v62 = vpop.f32.mrb[81].mxu0  ;;  %9949 = vst [vmem:[#allocation3_spill] sm:$0xff] %v6909_v16  ;;  %v6926_v24 = vcombine.high %v6909_v16, %v6909_v16  ;;  %v2385_v32 = vcombine.low %v6912_v8, %v6909_v16  ;;  %v5794_v33 = vcombine.high %v6912_v8, %v6909_v16  ;;  %v2807_v44 = vmul.f32 %v6918_v19, %v6918_v19 }
 0x189   : > { %9952 = vst [vmem:[#allocation6_spill] sm:$0xff] %v6934_v22  ;;  %v6950_v45 = vrot.slane %v1946_v11, %v6894_v63  ;;  %v1866_v47 = vadd.f32 %v6888_v48, %v1850_v60  ;;  %v2393_v36 = vrot.slane %v2383_v25, %v6894_v63  ;;  %v2400_v50 = vrot.slane %v5793_v17, %v6894_v63 }
 0x18a   : > { %9951 = vst [vmem:[#allocation5_spill] sm:$0xff] %v6926_v24  ;;  %v2808_v53 = vmul.f32 %v6922_v15, %v6922_v15  ;;  %v2812_v43 = vmul.f32 %v6926_v24, %v6926_v24  ;;  %v2810_v41 = vmul.f32 %v6909_v16, %v6909_v16  ;;  %v2811_v57 = vmul.f32 %v6934_v22, %v6934_v22 }
 0x18b   : > { %v6899_v12 = vpop.f32.mrb[82].mxu0  ;;  %v1954_v59 = vrot.slane %v1938_v13, %v6894_v63  ;;  %v1851_v54 = vadd.f32 %v1819_v6, %v6852_v14  ;;  %v2407_v49 = vrot.slane %v2385_v32, %v6894_v63  ;;  %v2414_v46 = vrot.slane %v5794_v33, %v6894_v63 }
 0x18c   : > { %v6181_v4 = vpop.f32.mrb[83].mxu0  ;;  %v1947_v0 = vcombine.high %v1945_v40, %v1945_v40  ;;  %v6968_v2 = vrot.slane %v1945_v40, %v6894_v63  ;;  %v6974_v51 = vcombine.high %v6950_v45, %v6950_v45  ;;  %v1980_v5 = vcombine.high %v1866_v47, %v1866_v47 }
 0x18d   : > { %v1987_v60 = vrot.slane %v1866_v47, %v6894_v63  ;;  %v2809_v14 = vmul.f32 %v6912_v8, %v6912_v8  ;;  %v2933_v6 = vcombine.low %v2805_v34, %v2806_v42  ;;  %v2934_v62 = vcombine.low %v2807_v44, %v2808_v53 }
 0x18e   : > { %9953 = vst [vmem:[#allocation7_spill] sm:$0xff] %v6968_v2  ;;  %9954 = vst [vmem:[#allocation8_spill] sm:$0xff] %v6974_v51  ;;  %v2936_v56 = vcombine.low %v2811_v57, %v2812_v43  ;;  %v2415_v10 = vcombine.low %v2393_v36, %v2400_v50  ;;  %v6979_v13 = vcombine.high %v1954_v59, %v1954_v59 }
 0x18f   : > { %v6914_v9 = vpop.f32.mrb[84].mxu0  ;;  %v2416_v4 = vcombine.low %v2407_v49, %v2414_v46  ;;  %v2935_v18 = vcombine.low %v2809_v14, %v2810_v41  ;;  %v6982_v11 = vrot.slane %v1947_v0, %v6894_v63  ;;  %v2433_v17 = vcombine.low %v6974_v51, %v6968_v2 }
 0x190   : > { %v6184_v23 = vpop.f32.mrb[85].mxu0  ;;  %9955 = vst [vmem:[#allocation9_spill] sm:$0xff] %v6979_v13  ;;  %v2815_v32 = vmul.f32 %v6974_v51, %v6974_v51  ;;  %v1994_v33 = vrot.slane %v1980_v5, %v6894_v63  ;;  %v1995_v34 = vcombine.high %v1987_v60, %v1987_v60  ;;  %v2943_v42 = vrot.slane %v2933_v6, %v6894_v63 }
 0x191   : > { %9956 = vst [vmem:[#allocation10_spill] sm:$0xff] %v6982_v11  ;;  %v6986_v23 = vcombine.high %v6968_v2, %v6968_v2  ;;  %v2950_v44 = vrot.slane %v2934_v62, %v6894_v63  ;;  %v2964_v47 = vrot.slane %v2936_v56, %v6894_v63  ;;  %v2432_v36 = vcombine.low %v6950_v45, %v6979_v13 }
 0x192   : > { %v2813_v50 = vmul.f32 %v6950_v45, %v6950_v45  ;;  %v2814_v53 = vmul.f32 %v6979_v13, %v6979_v13  ;;  %v2816_v43 = vmul.f32 %v6968_v2, %v6968_v2  ;;  %v2957_v41 = vrot.slane %v2935_v18, %v6894_v63 }
 0x193   : > { %v6943_v30 = vpop.f32.mrb[86].mxu0  ;;  %9957 = vst [vmem:[#allocation11_spill] sm:$0xff] %v6986_v23  ;;  %v7010_v57 = vcombine.high %v6982_v11, %v6982_v11  ;;  %v2817_v59 = vmul.f32 %v6982_v11, %v6982_v11  ;;  %v2449_v49 = vrot.slane %v2433_v17, %v6894_v63  ;;  %v1996_v0 = vcombine.high %v1994_v33, %v1994_v33 }
 0x194   : > { %v6187_v37 = vpop.f32.mrb[87].mxu0  ;;  %v2983_v46 = vcombine.low %v2815_v32, %v2816_v43  ;;  %v2017_v5 = vrot.slane %v1995_v34, %v6894_v63  ;;  %v2966_v14 = vcombine.low %v2957_v41, %v2964_v47  ;;  %v7019_v6 = vrot.slane %v1987_v60, %v6894_v63 }
 0x195   : > { %v1867_v37 = vadd.f32 %v6888_v48, %v1851_v54  ;;  %9958 = vst [vmem:[#allocation12_spill] sm:$0xff] %v7010_v57  ;;  %v2818_v54 = vmul.f32 %v6986_v23, %v6986_v23  ;;  %v7023_v56 = vrot.slane %v2415_v10, %v6894_v63  ;;  %v2442_v18 = vrot.slane %v2432_v36, %v6894_v63 }
 0x196   : > { %9959 = vst [vmem:[#allocation13_spill] sm:$0xff] %v7019_v6  ;;  %v7027_v17 = vrot.slane %v2416_v4, %v6894_v63  ;;  %v2434_v32 = vcombine.low %v6982_v11, %v6986_v23  ;;  %v2435_v60 = vcombine.low %v7010_v57, %v7019_v6  ;;  %v7035_v10 = vrot.slane %v1996_v0, %v6894_v63 }
 0x197   : > { %v6970_v55 = vpop.f32.mrb[88].mxu0  ;;  %v2036_v62 = vrot.slane %v1867_v37, %v6894_v63  ;;  %v2029_v20 = vcombine.high %v1867_v37, %v1867_v37  ;;  %v2984_v34 = vcombine.low %v2817_v59, %v2818_v54  ;;  %v7037_v47 = vcombine.high %v2017_v5, %v2017_v5 }
 0x198   : > { %v6190_v7 = vpop.f32.mrb[89].mxu0  ;;  %9960 = vst [vmem:[#allocation14_spill] sm:$0xff] %v7035_v10  ;;  %v7043_v4 = vrot.slane %v2966_v14, %v6894_v63  ;;  %v2819_v36 = vmul.f32 %v7010_v57, %v7010_v57  ;;  %v7049_v43 = vrot.slane %v1994_v33, %v6894_v63  ;;  %v7053_v41 = vcombine.high %v7019_v6, %v7019_v6 }
 0x199   : > { %v2965_v7 = vcombine.low %v2943_v42, %v2950_v44  ;;  %v2464_v42 = vcombine.low %v2442_v18, %v2449_v49  ;;  %v2999_v44 = vrot.slane %v2983_v46, %v6894_v63  ;;  %9961 = vst [vmem:[#allocation15_spill] sm:$0xff] %v7037_v47  ;;  %v2043_v59 = vrot.slane %v2029_v20, %v6894_v63 }
 0x19a   : > { %9962 = vst [vmem:[#allocation16_spill] sm:$0xff] %v7049_v43  ;;  %v2456_v54 = vrot.slane %v2434_v32, %v6894_v63  ;;  %v7058_v49 = vrot.slane %v2984_v34, %v6894_v63  ;;  %v2463_v46 = vrot.slane %v2435_v60, %v6894_v63  ;;  %v2820_v0 = vmul.f32 %v7019_v6, %v7019_v6 }
 0x19b   : > { %v6988_v25 = vpop.f32.mrb[90].mxu0  ;;  %v7040_v37 = vrot.slane %v2965_v7, %v6894_v63  ;;  %v7064_v7 = vrot.slane %v2464_v42, %v6894_v63  ;;  %v2482_v14 = vcombine.low %v7049_v43, %v7035_v10  ;;  %v2822_v20 = vmul.f32 %v7037_v47, %v7037_v47 }
 0x19c   : > { %v6193_v40 = vpop.f32.mrb[91].mxu0  ;;  %v5795_v18 = vcombine.high %v7019_v6, %v2017_v5  ;;  %v2985_v32 = vcombine.low %v2819_v36, %v2820_v0  ;;  %v2821_v60 = vmul.f32 %v7053_v41, %v7053_v41  ;;  %v2045_v42 = vcombine.high %v2043_v59, %v2043_v59 }
 0x19d   : > { %v2982_v40 = vcombine.low %v2813_v50, %v2814_v53  ;;  %v2044_v50 = vcombine.high %v2036_v62, %v2036_v62  ;;  %v7085_v5 = vcombine.high %v7049_v43, %v7049_v43  ;;  %v2465_v1 = vcombine.low %v2456_v54, %v2463_v46 }
 0x19e   : > { %v2823_v36 = vmul.f32 %v7049_v43, %v7049_v43  ;;  %v2498_v26 = vrot.slane %v2482_v14, %v6894_v63  ;;  %v3031_v35 = vcombine.low %v2821_v60, %v2822_v20  ;;  %v3013_v54 = vrot.slane %v2985_v32, %v6894_v63 }
 0x19f   : > { %v2992_v53 = vrot.slane %v2982_v40, %v6894_v63  ;;  %v2824_v40 = vmul.f32 %v7035_v10, %v7035_v10  ;;  %v7074_v34 = vrot.slane %v2044_v50, %v6894_v63  ;;  %9965 = vst [vmem:[#allocation19_spill] sm:$0xff] %v7085_v5  ;;  %v7090_v50 = vrot.slane %v2036_v62, %v6894_v63 }
 0x1a0   : > { %v7105_v62 = vrot.slane %v2045_v42, %v6894_v63  ;;  %v5796_v6 = vcombine.high %v7049_v43, %v7035_v10  ;;  %v1852_v14 = vadd.f32 %v6899_v12, %v6854_v21  ;;  %v2479_v20 = vrot.slane %v2465_v1, %v6894_v63 }
 0x1a1   : > { %v3014_v33 = vcombine.low %v2992_v53, %v2999_v44  ;;  %9963 = vst [vmem:[#allocation17_spill] sm:$0xff] %v7074_v34  ;;  %v7079_v44 = vrot.slane %v2043_v59, %v6894_v63  ;;  %9966 = vst [vmem:[#allocation20_spill] sm:$0xff] %v7090_v50  ;;  %v7097_v59 = vcombine.high %v7035_v10, %v7035_v10 }
 0x1a2   : > { %v2491_v53 = vrot.slane %v5795_v18, %v6894_v63  ;;  %v3032_v46 = vcombine.low %v2823_v36, %v2824_v40  ;;  %v2484_v47 = vcombine.low %v7090_v50, %v7074_v34  ;;  %9968 = vst [vmem:[#allocation22_spill] sm:$0xff] %v7105_v62  ;;  %v7118_v18 = vcombine.high %v7074_v34, %v7074_v34 }
 0x1a3   : > { %9964 = vst [vmem:[#allocation18_spill] sm:$0xff] %v7079_v44  ;;  %v7093_v0 = vrot.slane %v3014_v33, %v6894_v63  ;;  %9967 = vst [vmem:[#allocation21_spill] sm:$0xff] %v7097_v59  ;;  %v7109_v33 = vcombine.high %v7079_v44, %v7079_v44  ;;  %v1853_v40 = vadd.f32 %v6914_v9, %v6856_v27 }
 0x1a4   : > { %v7124_v32 = vadd.f32 %v6943_v30, %v6871_v38  ;;  %v2513_v60 = vcombine.low %v2491_v53, %v2498_v26  ;;  %v3041_v42 = vrot.slane %v3031_v35, %v6894_v63  ;;  %v1868_v36 = vadd.f32 %v6888_v48, %v1852_v14 }
 0x1a5   : > { %9969 = vst [vmem:[#allocation23_spill] sm:$0xff] %v7109_v33  ;;  %v7130_v1 = vadd.f32 %v6970_v55, %v6881_v31  ;;  %v3015_v21 = vcombine.low %v7058_v49, %v3013_v54  ;;  %v3048_v12 = vrot.slane %v3032_v46, %v6894_v63  ;;  %v2512_v10 = vrot.slane %v2484_v47, %v6894_v63 }
 0x1a6   : > { %v7137_v27 = vadd.f32 %v6988_v25, %v6883_v52  ;;  %v2505_v26 = vrot.slane %v5796_v6, %v6894_v63  ;;  %v2531_v35 = vcombine.low %v7105_v62, %v7109_v33  ;;  %v2077_v38 = vcombine.high %v1868_v36, %v1868_v36 }
 0x1a7   : > { %v2084_v9 = vrot.slane %v1868_v36, %v6894_v63  ;;  %v2530_v31 = vcombine.low %v7118_v18, %v7079_v44  ;;  %v2825_v30 = vmul.f32 %v7085_v5, %v7085_v5  ;;  %v2826_v55 = vmul.f32 %v7097_v59, %v7097_v59 }
 0x1a8   : > { %v2828_v52 = vmul.f32 %v7074_v34, %v7074_v34  ;;  %v2827_v25 = vmul.f32 %v7090_v50, %v7090_v50  ;;  %v1869_v49 = vadd.f32 %v6888_v48, %v1853_v40  ;;  %v2514_v53 = vcombine.low %v2505_v26, %v2512_v10 }
 0x1a9   : > { %v2092_v6 = vcombine.high %v2084_v9, %v2084_v9  ;;  %v7154_v47 = vrot.slane %v2084_v9, %v6894_v63  ;;  %v2829_v54 = vmul.f32 %v7118_v18, %v7118_v18  ;;  %v2831_v46 = vmul.f32 %v7105_v62, %v7105_v62 }
 0x1aa   : > { %v2832_v14 = vmul.f32 %v7109_v33, %v7109_v33  ;;  %v7165_v36 = vcombine.high %v7105_v62, %v7105_v62  ;;  %v2480_v34 = vcombine.low %v7064_v7, %v2479_v20  ;;  %v2547_v9 = vrot.slane %v2531_v35, %v6894_v63 }
 0x1ab   : > { %9970 = vst [vmem:[#allocation24_spill] sm:$0xff] %v7154_v47  ;;  %v2091_v40 = vrot.slane %v2077_v38, %v6894_v63  ;;  %v2540_v10 = vrot.slane %v2530_v31, %v6894_v63  ;;  %v2830_v26 = vmul.f32 %v7079_v44, %v7079_v44  ;;  %v3033_v50 = vcombine.low %v2825_v30, %v2826_v55 }
 0x1ac   : > { %9971 = vst [vmem:[#allocation25_spill] sm:$0xff] %v7165_v36  ;;  %v3034_v59 = vcombine.low %v2827_v25, %v2828_v52  ;;  %v7174_v5 = vrot.slane %v2092_v6, %v6894_v63  ;;  %v7178_v33 = vcombine.high %v7154_v47, %v7154_v47  ;;  %v2125_v62 = vcombine.high %v1869_v49, %v1869_v49 }
 0x1ad   : > { %v2132_v7 = vrot.slane %v1869_v49, %v6894_v63  ;;  %v3063_v20 = vcombine.low %v3041_v42, %v3048_v12  ;;  %v2528_v35 = vrot.slane %v2514_v53, %v6894_v63  ;;  %v3080_v38 = vcombine.low %v2829_v54, %v2830_v26 }
 0x1ae   : > { %9972 = vst [vmem:[#allocation26_spill] sm:$0xff] %v7174_v5  ;;  %9973 = vst [vmem:[#allocation27_spill] sm:$0xff] %v7178_v33  ;;  %v3081_v31 = vcombine.low %v2831_v46, %v2832_v14  ;;  %v2521_v43 = vrot.slane %v2513_v60, %v6894_v63  ;;  %v7184_v30 = vrot.slane %v3015_v21, %v6894_v63  ;;  %v2785_v44 = vsel %vm9931_vm3, %v2480_v34, 0.0 }
 0x1af   : > { %v9974_v55 = vcombine.low %v7023_v56, %v7027_v17  ;;  %v2093_v25 = vcombine.high %v2091_v40, %v2091_v40  ;;  %v2562_v6 = vcombine.low %v2540_v10, %v2547_v9  ;;  %v7192_v42 = vrot.slane %v3033_v50, %v6894_v63 }
 0x1b0   : > { %v7195_v12 = vrot.slane %v3034_v59, %v6894_v63  ;;  %v2532_v60 = vcombine.low %v7165_v36, %v7154_v47  ;;  %v2533_v21 = vcombine.low %v7174_v5, %v7178_v33  ;;  %v2139_v56 = vrot.slane %v2125_v62, %v6894_v63 }
 0x1b1   : > { %v2784_v52 = vsel %vm9931_vm3, %v9974_v55, 0.0  ;;  %v2140_v17 = vcombine.high %v2132_v7, %v2132_v7  ;;  %v7203_v49 = vrot.slane %v3063_v20, %v6894_v63  ;;  %v2529_v53 = vcombine.low %v2521_v43, %v2528_v35 }
 0x1b2   : > { %v7206_v34 = vrot.slane %v3080_v38, %v6894_v63  ;;  %v7209_v50 = vrot.slane %v3081_v31, %v6894_v63  ;;  %v2786_v59 = vadd.f32 %v2785_v44, %v2784_v52  ;;  %v7216_v62 = vrot.slane %v2093_v25, %v6894_v63 }
 0x1b3   : > { %v7219_v14 = vrot.slane %v2562_v6, %v6894_v63  ;;  %v3064_v43 = vcombine.low %v7192_v42, %v7195_v12  ;;  %v7224_v9 = vrot.slane %v2091_v40, %v6894_v63  ;;  %v1870_v44 = vadd.f32 %v6888_v48, %v7124_v32 }
 0x1b4   : > { %9975 = vst [vmem:[#allocation28_spill] sm:$0xff] %v7216_v62  ;;  %v2554_v10 = vrot.slane %v2532_v60, %v6894_v63  ;;  %v2561_v26 = vrot.slane %v2533_v21, %v6894_v63  ;;  %v2141_v20 = vcombine.high %v2139_v56, %v2139_v56  ;;  %v7231_v35 = vrot.slane %v2140_v17, %v6894_v63 }
 0x1b5   : > { %9976 = vst [vmem:[#allocation29_spill] sm:$0xff] %v7224_v9  ;;  %v2787_v38 = vsel %vm9931_vm3, %v2529_v53, 0.0  ;;  %v2833_v40 = vmul.f32 %v7165_v36, %v7165_v36  ;;  %v7239_v55 = vrot.slane %v2132_v7, %v6894_v63  ;;  %v2579_v32 = vcombine.low %v7224_v9, %v7216_v62 }
 0x1b6   : > { %9977 = vst [vmem:[#allocation30_spill] sm:$0xff] %v7231_v35  ;;  %v5797_v52 = vcombine.high %v7224_v9, %v7216_v62  ;;  %v2835_v25 = vmul.f32 %v7174_v5, %v7174_v5  ;;  %v2836_v6 = vmul.f32 %v7178_v33, %v7178_v33  ;;  %v7251_v42 = vcombine.high %v7216_v62, %v7216_v62 }
 0x1b7   : > { %9978 = vst [vmem:[#allocation31_spill] sm:$0xff] %v7239_v55  ;;  %v2834_v7 = vmul.f32 %v7154_v47, %v7154_v47  ;;  %v2174_v12 = vcombine.high %v1870_v44, %v1870_v44  ;;  %v2181_v60 = vrot.slane %v1870_v44, %v6894_v63  ;;  %v2563_v21 = vcombine.low %v2554_v10, %v2561_v26 }
 0x1b8   : > { %9979 = vst [vmem:[#allocation32_spill] sm:$0xff] %v7251_v42  ;;  %v7257_v17 = vrot.slane %v2141_v20, %v6894_v63  ;;  %v2581_v53 = vcombine.low %v7239_v55, %v7231_v35  ;;  %v5798_v46 = vcombine.high %v7239_v55, %v7231_v35  ;;  %v7265_v54 = vcombine.high %v7224_v9, %v7224_v9 }
 0x1b9   : > { %v2837_v31 = vmul.f32 %v7224_v9, %v7224_v9  ;;  %v3082_v33 = vcombine.low %v2833_v40, %v2834_v7  ;;  %v2155_v44 = vrot.slane %v2139_v56, %v6894_v63  ;;  %v2589_v10 = vrot.slane %v2579_v32, %v6894_v63 }
 0x1ba   : > { %9980 = vst [vmem:[#allocation33_spill] sm:$0xff] %v7257_v17  ;;  %9981 = vst [vmem:[#allocation34_spill] sm:$0xff] %v7265_v54  ;;  %v2596_v26 = vrot.slane %v5797_v52, %v6894_v63  ;;  %v2838_v20 = vmul.f32 %v7216_v62, %v7216_v62  ;;  %v3083_v5 = vcombine.low %v2835_v25, %v2836_v6 }
 0x1bb   : > { %v2840_v47 = vmul.f32 %v7251_v42, %v7251_v42  ;;  %v2188_v36 = vrot.slane %v2174_v12, %v6894_v63  ;;  %v2189_v57 = vcombine.high %v2181_v60, %v2181_v60  ;;  %v7278_v23 = vrot.slane %v2181_v60, %v6894_v63 }
 0x1bc   : > { %v2577_v40 = vrot.slane %v2563_v21, %v6894_v63  ;;  %v7283_v56 = vcombine.high %v7257_v17, %v7257_v17  ;;  %v2603_v32 = vrot.slane %v2581_v53, %v6894_v63  ;;  %v2610_v52 = vrot.slane %v5798_v46, %v6894_v63 }
 0x1bd   : > { %9982 = vst [vmem:[#allocation35_spill] sm:$0xff] %v7278_v23  ;;  %v2788_v25 = vadd.f32 %v2787_v38, %v2786_v59  ;;  %v2839_v6 = vmul.f32 %v7265_v54, %v7265_v54  ;;  %v7290_v7 = vrot.slane %v2189_v57, %v6894_v63  ;;  %v7294_v12 = vcombine.high %v7278_v23, %v7278_v23 }
 0x1be   : > { %9983 = vst [vmem:[#allocation36_spill] sm:$0xff] %v7283_v56  ;;  %v3104_v60 = vrot.slane %v3082_v33, %v6894_v63  ;;  %v3111_v21 = vrot.slane %v3083_v5, %v6894_v63  ;;  %v3129_v42 = vcombine.low %v2837_v31, %v2838_v20  ;;  %v7298_v62 = vcombine.high %v2155_v44, %v2155_v44 }
 0x1bf   : > { %9984 = vst [vmem:[#allocation37_spill] sm:$0xff] %v7290_v7  ;;  %9985 = vst [vmem:[#allocation38_spill] sm:$0xff] %v7294_v12  ;;  %v2611_v53 = vcombine.low %v2589_v10, %v2596_v26  ;;  %v3130_v46 = vcombine.low %v2839_v6, %v2840_v47  ;;  %v7301_v59 = vrot.slane %v2188_v36, %v6894_v63 }
 0x1c0   : > { %9986 = vst [vmem:[#allocation39_spill] sm:$0xff] %v7298_v62  ;;  %v7305_v57 = vcombine.high %v7290_v7, %v7290_v7  ;;  %v2578_v38 = vcombine.low %v7219_v14, %v2577_v40  ;;  %v2612_v54 = vcombine.low %v2603_v32, %v2610_v52  ;;  %v2629_v33 = vcombine.low %v7283_v56, %v7278_v23 }
 0x1c1   : > { %9987 = vst [vmem:[#allocation40_spill] sm:$0xff] %v7301_v59  ;;  %v2630_v5 = vcombine.low %v7290_v7, %v7294_v12  ;;  %v7313_v31 = vrot.slane %v3064_v43, %v6894_v63  ;;  %v7317_v47 = vcombine.high %v7231_v35, %v7231_v35  ;;  %v1871_v14 = vadd.f32 %v6888_v48, %v7130_v1 }
 0x1c2   : > { %9988 = vst [vmem:[#allocation41_spill] sm:$0xff] %v7305_v57  ;;  %v2631_v44 = vcombine.low %v7305_v57, %v7301_v59  ;;  %v3113_v10 = vcombine.low %v3104_v60, %v3111_v21  ;;  %v7325_v26 = vcombine.high %v7239_v55, %v7239_v55  ;;  %v2628_v20 = vcombine.low %v7257_v17, %v7298_v62 }
 0x1c3   : > { %9989 = vst [vmem:[#allocation42_spill] sm:$0xff] %v7317_v47  ;;  %v2190_v43 = vcombine.high %v2188_v36, %v2188_v36  ;;  %v2619_v40 = vrot.slane %v2611_v53, %v6894_v63  ;;  %v7331_v32 = vrot.slane %v3129_v42, %v6894_v63  ;;  %v7334_v52 = vrot.slane %v3130_v46, %v6894_v63 }
 0x1c4   : > { %9990 = vst [vmem:[#allocation43_spill] sm:$0xff] %v7325_v26  ;;  %v2659_v6 = vrot.slane %v2631_v44, %v6894_v63  ;;  %v2789_v1 = vsel %vm9931_vm3, %v2578_v38, 0.0  ;;  %v2626_v60 = vrot.slane %v2612_v54, %v6894_v63  ;;  %v2645_v21 = vrot.slane %v2629_v33, %v6894_v63 }
 0x1c5   : > { %v2652_v9 = vrot.slane %v2630_v5, %v6894_v63  ;;  %v7343_v36 = vmul.f32 %v7239_v55, %v7239_v55  ;;  %v7347_v42 = vmul.f32 %v7231_v35, %v7231_v35  ;;  %v2844_v53 = vmul.f32 %v7317_v47, %v7317_v47 }
 0x1c6   : > { %v2223_v46 = vcombine.high %v1871_v14, %v1871_v14  ;;  %v2638_v38 = vrot.slane %v2628_v20, %v6894_v63  ;;  %v2218_v54 = vrot.slane %v2190_v43, %v6894_v63  ;;  %v2230_v33 = vrot.slane %v1871_v14, %v6894_v63 }
 0x1c7   : > { %v2661_v44 = vcombine.low %v2652_v9, %v2659_v6  ;;  %v2843_v5 = vmul.f32 %v7325_v26, %v7325_v26  ;;  %v7358_v55 = vmul.f32 %v7257_v17, %v7257_v17  ;;  %v7362_v35 = vmul.f32 %v7298_v62, %v7298_v62 }
 0x1c8   : > { %v2237_v47 = vrot.slane %v2223_v46, %v6894_v63  ;;  %v7366_v20 = vrot.slane %v3113_v10, %v6894_v63  ;;  %v2627_v43 = vcombine.low %v2619_v40, %v2626_v60  ;;  %v2660_v9 = vcombine.low %v2638_v38, %v2645_v21 }
 0x1c9   : > { %v2238_v6 = vcombine.high %v2230_v33, %v2230_v33  ;;  %v2790_v14 = vadd.f32 %v2789_v1, %v2788_v25  ;;  %v3132_v24 = vcombine.low %v2843_v5, %v2844_v53  ;;  %v2675_v17 = vrot.slane %v2661_v44, %v6894_v63 }
 0x1ca   : > { %v2239_v11 = vcombine.high %v2237_v47, %v2237_v47  ;;  %v5799_v2 = vcombine.high %v7301_v59, %v2218_v54  ;;  %v7373_v62 = vrot.slane %v2230_v33, %v6894_v63  ;;  %v7381_v25 = vrot.slane %v2237_v47, %v6894_v63 }
 0x1cb   : > { %v7376_v46 = vrot.slane %v2238_v6, %v6894_v63  ;;  %v1872_v1 = vadd.f32 %v6888_v48, %v7137_v27  ;;  %v2668_v60 = vrot.slane %v2660_v9, %v6894_v63  ;;  %v2791_v21 = vsel %vm9931_vm3, %v2627_v43, 0.0 }
 0x1cc   : > { %9991 = vst [vmem:[#allocation44_spill] sm:$0xff] %v7373_v62  ;;  %9993 = vst [vmem:[#allocation46_spill] sm:$0xff] %v7381_v25  ;;  %v7384_v40 = vrot.slane %v2239_v11, %v6894_v63  ;;  %v7395_v44 = vrot.slane %v3132_v24, %v6894_v63  ;;  %v7399_v11 = vcombine.high %v7301_v59, %v7301_v59 }
 0x1cd   : > { %9992 = vst [vmem:[#allocation45_spill] sm:$0xff] %v7376_v46  ;;  %v2678_v53 = vcombine.low %v7373_v62, %v7376_v46  ;;  %v5800_v38 = vcombine.high %v7373_v62, %v7376_v46  ;;  %v7403_v48 = vmul.f32 %v7283_v56, %v7283_v56  ;;  %v7407_v47 = vcombine.high %v2218_v54, %v2218_v54 }
 0x1ce   : > { %9994 = vst [vmem:[#allocation47_spill] sm:$0xff] %v7384_v40  ;;  %9995 = vst [vmem:[#allocation48_spill] sm:$0xff] %v7399_v11  ;;  %v2680_v27 = vcombine.low %v7381_v25, %v7384_v40  ;;  %v2676_v33 = vcombine.low %v2668_v60, %v2675_v17  ;;  %v2687_v5 = vrot.slane %v5799_v2, %v6894_v63 }
 0x1cf   : > { %9996 = vst [vmem:[#allocation49_spill] sm:$0xff] %v7407_v47  ;;  %v2694_v43 = vrot.slane %v2678_v53, %v6894_v63  ;;  %v2792_v24 = vadd.f32 %v2791_v21, %v2790_v14  ;;  %v2701_v9 = vrot.slane %v5800_v38, %v6894_v63  ;;  %v2271_v10 = vcombine.high %v1872_v1, %v1872_v1 }
 0x1d0   : > { %v2708_v6 = vrot.slane %v2680_v27, %v6894_v63  ;;  %v7415_v26 = vmul.f32 %v7278_v23, %v7278_v23  ;;  %v7419_v56 = vcombine.high %v7384_v40, %v7384_v40  ;;  %v2278_v17 = vrot.slane %v1872_v1, %v6894_v63 }
 0x1d1   : > { %v2709_v54 = vcombine.low %v2687_v5, %v2694_v43  ;;  %v7424_v2 = vmul.f32 %v7290_v7, %v7290_v7  ;;  %v7428_v14 = vmul.f32 %v7294_v12, %v7294_v12  ;;  %v2285_v21 = vrot.slane %v2271_v10, %v6894_v63 }
 0x1d2   : > { %9997 = vst [vmem:[#allocation50_spill] sm:$0xff] %v7419_v56  ;;  %v2710_v60 = vcombine.low %v2701_v9, %v2708_v6  ;;  %v2793_v53 = vsel %vm9931_vm3, %v2676_v33, 0.0  ;;  %v2851_v38 = vmul.f32 %v7305_v57, %v7305_v57  ;;  %v2286_v27 = vcombine.high %v2278_v17, %v2278_v17 }
 0x1d3   : > { %v7435_v5 = vrot.slane %v2278_v17, %v6894_v63  ;;  %v2852_v1 = vmul.f32 %v7301_v59, %v7301_v59  ;;  %v2717_v43 = vrot.slane %v2709_v54, %v6894_v63  ;;  %v2287_v7 = vcombine.high %v2285_v21, %v2285_v21 }
 0x1d4   : > { %v2724_v12 = vrot.slane %v2710_v60, %v6894_v63  ;;  %v7442_v9 = vrot.slane %v2285_v21, %v6894_v63  ;;  %v7445_v10 = vrot.slane %v2286_v27, %v6894_v63  ;;  %v2794_v17 = vadd.f32 %v2793_v53, %v2792_v24 }
 0x1d5   : > { %9998 = vst [vmem:[#allocation51_spill] sm:$0xff] %v7435_v5  ;;  %v7449_v33 = vcombine.high %v7435_v5, %v7435_v5  ;;  %v2726_v6 = vcombine.low %v7419_v56, %v7435_v5  ;;  %v7455_v54 = vcombine.high %v7376_v46, %v7376_v46  ;;  %v7458_v59 = vrot.slane %v2287_v7, %v6894_v63 }
 0x1d6   : > { %9999 = vst [vmem:[#allocation52_spill] sm:$0xff] %v7442_v9  ;;  %10000 = vst [vmem:[#allocation53_spill] sm:$0xff] %v7445_v10  ;;  %v2725_v60 = vcombine.low %v2717_v43, %v2724_v12  ;;  %v7462_v21 = vcombine.high %v7442_v9, %v7442_v9  ;;  %v7466_v27 = vcombine.high %v7445_v10, %v7445_v10 }
 0x1d7   : > { %10001 = vst [vmem:[#allocation54_spill] sm:$0xff] %v7449_v33  ;;  %10002 = vst [vmem:[#allocation55_spill] sm:$0xff] %v7455_v54  ;;  %v2727_v57 = vcombine.low %v7445_v10, %v7449_v33  ;;  %v2736_v24 = vrot.slane %v2726_v6, %v6894_v63  ;;  %v2853_v53 = vmul.f32 %v7399_v11, %v7399_v11 }
 0x1d8   : > { %10003 = vst [vmem:[#allocation56_spill] sm:$0xff] %v7458_v59  ;;  %10004 = vst [vmem:[#allocation57_spill] sm:$0xff] %v7462_v21  ;;  %v2854_v7 = vmul.f32 %v7407_v47, %v7407_v47  ;;  %v7477_v12 = vcombine.high %v7373_v62, %v7373_v62  ;;  %v2795_v43 = vsel %vm9931_vm3, %v2725_v60, 0.0  ;;  %v2728_v22 = vcombine.low %v7466_v27, %v7442_v9 }
 0x1d9   : > { %10005 = vst [vmem:[#allocation58_spill] sm:$0xff] %v7466_v27  ;;  %v2796_v23 = vadd.f32 %v2795_v43, %v2794_v17  ;;  %v2729_v16 = vcombine.low %v7458_v59, %v7462_v21  ;;  %v2743_v6 = vrot.slane %v2727_v57, %v6894_v63  ;;  %v3179_v11 = vcombine.low %v7403_v48, %v7415_v26 }
 0x1da   : > { %10006 = vst [vmem:[#allocation59_spill] sm:$0xff] %v7477_v12  ;;  %v3180_v47 = vcombine.low %v7424_v2, %v7428_v14  ;;  %v2858_v51 = vmul.f32 %v7455_v54, %v7455_v54  ;;  %v2860_v17 = vmul.f32 %v7384_v40, %v7384_v40  ;;  %v3181_v60 = vcombine.low %v2851_v38, %v2852_v1 }
 0x1db   : > { %v2750_v43 = vrot.slane %v2728_v22, %v6894_v63  ;;  %v2757_v13 = vrot.slane %v2729_v16, %v6894_v63  ;;  %v2758_v8 = vcombine.low %v2736_v24, %v2743_v6  ;;  %v2855_v57 = vmul.f32 %v7373_v62, %v7373_v62 }
 0x1dc   : > { %v2856_v26 = vmul.f32 %v7376_v46, %v7376_v46  ;;  %v2857_v48 = vmul.f32 %v7477_v12, %v7477_v12  ;;  %v2859_v2 = vmul.f32 %v7381_v25, %v7381_v25  ;;  %v2865_v38 = vmul.f32 %v7466_v27, %v7466_v27 }
 0x1dd   : > { %v2759_v14 = vcombine.low %v2750_v43, %v2757_v13  ;;  %v2867_v16 = vmul.f32 %v7458_v59, %v7458_v59  ;;  %v2868_v22 = vmul.f32 %v7462_v21, %v7462_v21  ;;  %v2861_v6 = vmul.f32 %v7419_v56, %v7419_v56  ;;  %v10071_v62 = vld [vmem:[#allocation52_spill] sm:$0xff] }
 0x1de   : > { %v3229_v1 = vcombine.low %v2857_v48, %v2858_v51  ;;  %v3230_v24 = vcombine.low %v2859_v2, %v2860_v17  ;;  %v2863_v40 = vmul.f32 %v7445_v10, %v7445_v10  ;;  %v2766_v25 = vrot.slane %v2758_v8, %v6894_v63 }
 0x1df   : > { %v2773_v13 = vrot.slane %v2759_v14, %v6894_v63  ;;  %v2864_v43 = vmul.f32 %v7449_v33, %v7449_v33  ;;  %v2866_v59 = vmul.f32 %v7442_v9, %v7442_v9  ;;  %v10007_v51 = vcombine.low %v7343_v36, %v7347_v42 }
 0x1e0   : > { %v3209_v48 = vrot.slane %v3181_v60, %v6894_v63  ;;  %v3227_v2 = vcombine.low %v2853_v53, %v2854_v7  ;;  %v3228_v21 = vcombine.low %v2855_v57, %v2856_v26  ;;  %v2862_v8 = vmul.f32 %v7435_v5, %v7435_v5 }
 0x1e1   : > { %v3153_v17 = vrot.slane %v10007_v51, %v6894_v63  ;;  %v2774_v27 = vcombine.low %v2766_v25, %v2773_v13  ;;  %v3278_v14 = vcombine.low %v2865_v38, %v2866_v59  ;;  %v3279_v10 = vcombine.low %v2867_v16, %v2868_v22 }
 0x1e2   : > { %v3195_v56 = vrot.slane %v3179_v11, %v6894_v63  ;;  %v3202_v9 = vrot.slane %v3180_v47, %v6894_v63  ;;  %v3251_v54 = vrot.slane %v3229_v1, %v6894_v63  ;;  %v3258_v36 = vrot.slane %v3230_v24, %v6894_v63 }
 0x1e3   : > { %v3162_v33 = vcombine.low %v3153_v17, %v7395_v44  ;;  %v2797_v42 = vsel %vm9931_vm3, %v2774_v27, 0.0  ;;  %v3276_v53 = vcombine.low %v2861_v6, %v2862_v8  ;;  %v3277_v7 = vcombine.low %v2863_v40, %v2864_v43 }
 0x1e4   : > { %v3161_v25 = vcombine.low %v7331_v32, %v7334_v52  ;;  %v10008_v59 = vcombine.low %v7358_v55, %v7362_v35  ;;  %v3237_v11 = vrot.slane %v3227_v2, %v6894_v63  ;;  %v2798_v60 = vadd.f32 %v2797_v42, %v2796_v23 }
 0x1e5   : > { %v3211_v47 = vcombine.low %v3202_v9, %v3209_v48  ;;  %v3244_v57 = vrot.slane %v3228_v21, %v6894_v63  ;;  %v3300_v26 = vrot.slane %v3278_v14, %v6894_v63  ;;  %v3307_v27 = vrot.slane %v3279_v10, %v6894_v63 }
 0x1e6   : > { %v3188_v44 = vrot.slane %v10008_v59, %v6894_v63  ;;  %v3079_v40 = vcombine.low %v7203_v49, %v7313_v31  ;;  %v10009_v32 = vcombine.low %v7206_v34, %v7209_v50  ;;  %v3176_v35 = vrot.slane %v3162_v33, %v6894_v63 }
 0x1e7   : > { %v2799_v55 = vrot.slane %v2798_v60, 4  ;;  %v3260_v23 = vcombine.low %v3251_v54, %v3258_v36  ;;  %v3286_v9 = vrot.slane %v3276_v53, %v6894_v63  ;;  %v3293_v21 = vrot.slane %v3277_v7, %v6894_v63 }
 0x1e8   : > { %v3120_v52 = vrot.slane %v10009_v32, %v6894_v63  ;;  %v3210_v38 = vcombine.low %v3188_v44, %v3195_v56  ;;  %v10010_v10 = vcombine.low %v7040_v37, %v7043_v4  ;;  %v10011_v49 = vcombine.low %v7093_v0, %v7184_v30 }
 0x1e9   : > { %v2800_v31 = vadd.f32 %v2799_v55, %v2798_v60  ;;  %v3169_v56 = vrot.slane %v3161_v25, %v6894_v63  ;;  %v3225_v33 = vrot.slane %v3211_v47, %v6894_v63  ;;  %v3259_v54 = vcombine.low %v3237_v11, %v3244_v57 }
 0x1ea   : > { %v3333_v16 = vsel %vm9931_vm3, %v10010_v10, 0.0  ;;  %v3334_v34 = vsel %vm9931_vm3, %v10011_v49, 0.0  ;;  %v3128_v50 = vcombine.low %v3120_v52, %v7366_v20  ;;  %v3309_v22 = vcombine.low %v3300_v26, %v3307_v27 }
 0x1eb   : > { %v3336_v1 = vsel %vm9931_vm3, %v3079_v40, 0.0  ;;  %v2801_v24 = vrot.slane %v2800_v31, 2  ;;  %v10012_v37 = vand.u32 4294901760, %v6861_v29  ;;  %v10013_v0 = vand.u32 4294901760, %v6866_v28 }
 0x1ec   : > { %v3177_v6 = vcombine.low %v3169_v56, %v3176_v35  ;;  %v3218_v20 = vrot.slane %v3210_v38, %v6894_v63  ;;  %v3274_v13 = vrot.slane %v3260_v23, %v6894_v63  ;;  %v3308_v43 = vcombine.low %v3286_v9, %v3293_v21 }
 0x1ed   : > { %v3438_v4 = vsub.f32 %v6861_v29, %v10012_v37  ;;  %v3445_v30 = vsub.f32 %v6866_v28, %v10013_v0  ;;  %v3335_v51 = vadd.f32 %v3334_v34, %v3333_v16  ;;  %v2802_v17 = vadd.f32 %v2801_v24, %v2800_v31 }
 0x1ee   : > { %v3338_v48 = vsel %vm9931_vm3, %v3128_v50, 0.0  ;;  %v3226_v2 = vcombine.low %v3218_v20, %v3225_v33  ;;  %v3267_v8 = vrot.slane %v3259_v54, %v6894_v63  ;;  %v3323_v14 = vrot.slane %v3309_v22, %v6894_v63 }
 0x1ef   : > { %v3337_v29 = vadd.f32 %v3336_v1, %v3335_v51  ;;  %v2803_v36 = vrot.slane %v2802_v17, 1  ;;  %v3439_v42 = vand.u32 4294901760, %v3438_v4  ;;  %v3446_v53 = vand.u32 4294901760, %v3445_v30 }
 0x1f0   : > { %v3275_v28 = vcombine.low %v3267_v8, %v3274_v13  ;;  %v3316_v7 = vrot.slane %v3308_v43, %v6894_v63  ;;  %v3340_v25 = vsel %vm9931_vm3, %v3177_v6, 0.0  ;;  %v3342_v60 = vsel %vm9931_vm3, %v3226_v2, 0.0 }
 0x1f1   : > { %v3339_v59 = vadd.f32 %v3338_v48, %v3337_v29  ;;  %v2804_v44 = vadd.f32 %v2803_v36, %v2802_v17  ;;  %v3440_v57 = vsub.f32 %v3438_v4, %v3439_v42  ;;  %v3447_v26 = vsub.f32 %v3445_v30, %v3446_v53 }
 0x1f2   : > { %v3324_v11 = vcombine.low %v3316_v7, %v3323_v14  ;;  %v3344_v32 = vsel %vm9931_vm3, %v3275_v28, 0.0  ;;  %v10014_v31 = vmov 0.0   ;;  %v10015_v56 = vmov 0.0|0.0  }
 0x1f3   : > { %v3357_v47 = vsel %vm9931_vm3, %v2804_v44, 0  ;;  %v3341_v27 = vadd.f32 %v3340_v25, %v3339_v59  ;;  %v3441_v38 = vand.u32 4294901760, %v3440_v57  ;;  %v3448_v23 = vand.u32 4294901760, %v3447_v26  ;;  %v7633_v25 = vld [vmem:[%s428_s18] ss:$0 sm:$0xff] }
 0x1f4   : > { %v3426_v40 = vand.u32 4294901760, %v3357_v47  ;;  %v3346_v55 = vsel %vm9931_vm3, %v3324_v11, 0.0  ;;  %v6285_v54 = vpack.c.bf16 %v3445_v30, %v3438_v4  ;;  %v6291_v4 = vpack.c.bf16 %v3446_v53, %v3439_v42  ;;  %10016 = vst [vmem:[#allocation60_spill] sm:$0xff] %v7633_v25  ;;  %v7649_v26 = vld [vmem:[%s9771_s7] ss:$0 sm:$0xff] }
 0x1f5   : > { %v3343_v52 = vadd.f32 %v3342_v60, %v3341_v27  ;;  %v6282_v49 = vpack.c.bf16 %v3448_v23, %v3441_v38  ;;  %v9887_v2 = vsub.s32 0, %v6890_v58  ;;  %v7641_v60 = vld [vmem:[%s9770_s6] ss:$0 sm:$0xff]  ;;  %10018 = vst [vmem:[#allocation62_spill] sm:$0xff] %v7649_v26 }
 0x1f6   : > { %v3427_v35 = vsub.f32 %v3357_v47, %v3426_v40  ;;  %10017 = vst [vmem:[#allocation61_spill] sm:$0xff] %v7641_v60  ;;  %v7669_v23 = vrot.slane %v7641_v60, %v6894_v63  ;;  %v10069_v25 = vld [vmem:[#allocation54_spill] sm:$0xff] }
 0x1f7   : > { %v3345_v9 = vadd.f32 %v3344_v32, %v3343_v52  ;;  %v10034_v32 = vld [vmem:[#allocation19_spill] sm:$0xff] }
 0x1f8   : > { %v3428_v21 = vand.u32 4294901760, %v3427_v35  ;;  %10019 = vst [vmem:[#allocation63_spill] sm:$0xff] %v7669_v23  ;;  %v10059_v23 = vld [vmem:[#allocation41_spill] sm:$0xff] }
 0x1f9   : > { %v3347_v10 = vadd.f32 %v3346_v55, %v3345_v9  ;;  %v10041_v9 = vld [vmem:[#allocation25_spill] sm:$0xff] }
 0x1fa   : > { %v3429_v16 = vsub.f32 %v3427_v35, %v3428_v21 }
 0x1fb   : > { %v3348_v50 = vrot.slane %v3347_v10, 4 }
 0x1fc   : > { %v3430_v34 = vand.u32 4294901760, %v3429_v16  ;;  %v10070_v16 = vld [vmem:[#allocation58_spill] sm:$0xff] }
 0x1fd   : > { %v3349_v33 = vadd.f32 %v3348_v50, %v3347_v10  ;;  %v10057_v10 = vld [vmem:[#allocation37_spill] sm:$0xff] }
 0x1fe   : > { %6199 = vmatmul.mubr.f32.vlgmr.msra.gmra.mrb[70].mxu1 %v3430_v34 }
 0x1ff   : > { %6283 = vmatpush3.bf16.msra.mxu1 %v6282_v49  ;;  %6205 = vmatprep.mubr.msk.f32.mxu1 %vm6360_vm1, %v10014_v31  ;;  %v3350_v22 = vrot.slane %v3349_v33, 2 }
 0x200   : > { %6284 = vmatprep.subr.bf16.mxu1 %v10015_v56 }
 0x201   : > { %v3351_v1 = vadd.f32 %v3350_v22, %v3349_v33  ;;  %v10020_v33 = vld [vmem:[#allocation4_spill] sm:$0xff]  ;;  %v10021_v22 = vld [vmem:[#allocation9_spill] sm:$0xff] }
 0x203   : > { %v3352_v24 = vrot.slane %v3351_v1, 1 }
 0x205   : > { %v3353_v37 = vadd.f32 %v3352_v24, %v3351_v1  ;;  %v10022_v24 = vld [vmem:[#allocation8_spill] sm:$0xff] }
 0x206   : > { %6206 = vmatmul.mubr.f32.vlgmr.msra.gmra.mrb[70].mxu1 %v3426_v40 }
 0x207   : > { %6286 = vmatpush3.bf16.msra.mxu1 %v6285_v54  ;;  %6212 = vmatprep.mubr.msk.f32.mxu1 %vm6360_vm1, %v10014_v31  ;;  %v3820_v0 = vsel %vm9931_vm3, %v3353_v37, 0  ;;  %v10063_v37 = vld [vmem:[#allocation49_spill] sm:$0xff] }
 0x208   : > { %6287 = vmatprep.subr.bf16.mxu1 %v10015_v56  ;;  %v3889_v30 = vand.u32 4294901760, %v3820_v0 }
 0x20a   : > { %v3890_v6 = vsub.f32 %v3820_v0, %v3889_v30  ;;  %v10047_v0 = vld [vmem:[#allocation34_spill] sm:$0xff] }
 0x20c   : > { %v3891_v20 = vand.u32 4294901760, %v3890_v6 }
 0x20e   : > { %6213 = vmatmul.mubr.f32.vlgmr.msra.gmra.mrb[70].mxu1 %v3427_v35  ;;  %v3892_v13 = vsub.f32 %v3890_v6, %v3891_v20  ;;  %v10035_v35 = vld [vmem:[#allocation21_spill] sm:$0xff] }
 0x20f   : > { %6289 = vmatpush3.bf16.msra.mxu1 %v6877_v39  ;;  %6219 = vmatprep.mubr.msk.f32.mxu1 %vm6360_vm1, %v10014_v31 }
 0x210   : > { %6290 = vmatprep.subr.bf16.mxu1 %v10015_v56  ;;  %v3893_v43 = vand.u32 4294901760, %v3892_v13  ;;  %v10045_v13 = vld [vmem:[#allocation29_spill] sm:$0xff] }
 0x216   : > { %6220 = vmatmul.mubr.f32.vlgmr.msra.gmra.mrb[70].mxu1 %v3428_v21 }
 0x217   : > { %6292 = vmatpush3.bf16.msra.mxu1 %v6291_v4  ;;  %6226 = vmatprep.mubr.msk.f32.mxu1 %vm6360_vm1, %v10014_v31 }
 0x218   : > { %6293 = vmatprep.subr.bf16.mxu1 %v10015_v56 }
 0x21e   : > { %6227 = vmatmul.mubr.f32.vlgmr.msra.gmra.mrb[70].mxu1 %v3426_v40 }
 0x21f   : > { %6295 = vmatpush3.bf16.msra.mxu1 %v6877_v39  ;;  %6233 = vmatprep.mubr.msk.f32.mxu1 %vm6360_vm1, %v10014_v31 }
 0x220   : > { %6296 = vmatprep.subr.bf16.mxu1 %v10015_v56 }
 0x226   : > { %6234 = vmatmul.mubr.f32.vlgmr.msra.gmra.mrb[70].mxu1 %v3426_v40 }
 0x227   : > { %6298 = vmatpush3.bf16.msra.mxu1 %v6877_v39  ;;  %6240 = vmatprep.mubr.msk.f32.mxu1 %vm6360_vm1, %v10014_v31 }
 0x228   : > { %6299 = vmatprep.subr.bf16.mxu1 %v10015_v56 }
 0x22a   : > { %6241 = vmatmul.mubr.f32.vlgmr.msra.gmra.mrb[72].mxu1 %v3893_v43  ;;  %v10026_v43 = vld [vmem:[#allocation10_spill] sm:$0xff] }
 0x22b   : > { %6301 = vmatpush3.bf16.msra.mxu1 %v6282_v49  ;;  %6247 = vmatprep.mubr.msk.f32.mxu1 %vm6360_vm1, %v10014_v31 }
 0x22c   : > { %6302 = vmatprep.subr.bf16.mxu1 %v10015_v56 }
 0x232   : > { %6248 = vmatmul.mubr.f32.vlgmr.msra.gmra.mrb[72].mxu1 %v3889_v30 }
 0x233   : > { %6304 = vmatpush3.bf16.msra.mxu1 %v6285_v54  ;;  %6254 = vmatprep.mubr.msk.f32.mxu1 %vm6360_vm1, %v10014_v31  ;;  %v10072_v54 = vld [vmem:[#allocation56_spill] sm:$0xff] }
 0x234   : > { %6305 = vmatprep.subr.bf16.mxu1 %v10015_v56 }
 0x23a   : > { %6255 = vmatmul.mubr.f32.vlgmr.msra.gmra.mrb[72].mxu1 %v3890_v6  ;;  %v10046_v6 = vld [vmem:[#allocation28_spill] sm:$0xff] }
 0x23b   : > { %6307 = vmatpush3.bf16.msra.mxu1 %v6877_v39  ;;  %6261 = vmatprep.mubr.msk.f32.mxu1 %vm6360_vm1, %v10014_v31 }
 0x23c   : > { %6308 = vmatprep.subr.bf16.mxu1 %v10015_v56 }
 0x242   : > { %6262 = vmatmul.mubr.f32.vlgmr.msra.gmra.mrb[72].mxu1 %v3891_v20  ;;  %v10025_v20 = vld [vmem:[#allocation7_spill] sm:$0xff] }
 0x243   : > { %6310 = vmatpush3.bf16.msra.mxu1 %v6291_v4  ;;  %6268 = vmatprep.mubr.msk.f32.mxu1 %vm6360_vm1, %v10014_v31  ;;  %v10023_v4 = vld [vmem:[#allocation3_spill] sm:$0xff] }
 0x244   : > { %6311 = vmatprep.subr.bf16.mxu1 %v10015_v56  ;;  %v10062_v56 = vsub.s32 0, %v6890_v58 }
 0x24a   : > { %6269 = vmatmul.mubr.f32.vlgmr.msra.gmra.mrb[72].mxu1 %v3889_v30 }
 0x24b   : > { %6313 = vmatpush3.bf16.msra.mxu1 %v6877_v39  ;;  %6275 = vmatprep.mubr.msk.f32.mxu1 %vm6360_vm1, %v10014_v31 }
 0x252   : > { %6276 = vmatmul.mubr.f32.vlgmr.msra.gmra.mrb[72].mxu1 %v3889_v30  ;;  %v10024_v30 = vld [vmem:[#allocation6_spill] sm:$0xff] }
 0x2f9   : > { %v3814_v51 = vpop.f32.mrb[70].mxu1 }
 0x2fa   : > { %v6235_v17 = vpop.f32.mrb[71].mxu1  ;;  %v3818_v48 = vmul.f32 0.0078125, %v3814_v51  ;;  %v10044_v51 = vld [vmem:[#allocation27_spill] sm:$0xff] }
 0x2fb   : > { %v10027_v17 = vld [vmem:[#allocation5_spill] sm:$0xff] }
 0x2fc   : > { %v4289_v8 = vrot.slane %v3818_v48, %v9887_v2  ;;  %v4282_v59 = vmul.f32 %v3818_v48, %v3818_v48  ;;  %v10042_v48 = vld [vmem:[#allocation24_spill] sm:$0xff]  ;;  %v10058_v2 = vld [vmem:[#allocation38_spill] sm:$0xff] }
 0x2fe   : > { %v4291_v14 = vcombine.high %v4289_v8, %v4289_v8  ;;  %v4298_v29 = vrot.slane %v4289_v8, %v6894_v63  ;;  %v10028_v8 = vld [vmem:[#allocation11_spill] sm:$0xff] }
 0x300   : > { %v4305_v36 = vrot.slane %v4291_v14, %v6894_v63  ;;  %v4306_v42 = vcombine.high %v4298_v29, %v4298_v29  ;;  %v7628_v53 = vrot.slane %v4298_v29, %v6894_v63  ;;  %v10029_v29 = vld [vmem:[#allocation12_spill] sm:$0xff]  ;;  %v10043_v14 = vld [vmem:[#allocation26_spill] sm:$0xff] }
 0x302   : > { %v4307_v39 = vcombine.high %v4305_v36, %v4305_v36  ;;  %v7631_v28 = vrot.slane %v4306_v42, %v6894_v63  ;;  %v7636_v44 = vrot.slane %v4305_v36, %v6894_v63  ;;  %v7653_v27 = vcombine.high %v7628_v53, %v7628_v53  ;;  %v10030_v42 = vld [vmem:[#allocation13_spill] sm:$0xff]  ;;  %v10036_v36 = vld [vmem:[#allocation20_spill] sm:$0xff] }
 0x303   : > { %v10074_v1 = vsub.f32 %v6902_v3, %v7628_v53  ;;  %v10075_v50 = vsub.f32 %v6950_v45, %v7628_v53  ;;  %v10079_v12 = vsub.f32 %v7118_v18, %v7628_v53 }
 0x304   : > { %v7644_v57 = vrot.slane %v4307_v39, %v6894_v63  ;;  %v7659_v52 = vcombine.high %v7631_v28, %v7631_v28  ;;  %v7665_v55 = vcombine.high %v7636_v44, %v7636_v44  ;;  %v10037_v39 = vld [vmem:[#allocation17_spill] sm:$0xff]  ;;  %v10082_v18 = vsub.f32 %v6918_v19, %v7653_v27 }
 0x306   : > { %v7675_v21 = vcombine.high %v7644_v57, %v7644_v57 }
 0x325   : > { %v4277_v7 = vpop.f32.mrb[72].mxu1 }
 0x326   : > { %v4281_v11 = vmul.f32 0.0078125, %v4277_v7  ;;  %v6277_v47 = vpop.f32.mrb[73].mxu1  ;;  %v10031_v7 = vld [vmem:[#allocation15_spill] sm:$0xff] }
 0x327   : > { %v10039_v47 = vld [vmem:[#allocation22_spill] sm:$0xff] }
 0x328   : > { %v4283_v40 = vsub.f32 %v4281_v11, %v4282_v59  ;;  %v10032_v11 = vld [vmem:[#allocation16_spill] sm:$0xff]  ;;  %v10038_v59 = vld [vmem:[#allocation18_spill] sm:$0xff] }
 0x32a   : > { %v4284_v38 = vadd.f32 1e-05, %v4283_v40  ;;  %v10033_v40 = vld [vmem:[#allocation14_spill] sm:$0xff] }
 0x32c   : > { %6349 = vrsqrt.f32 %v4284_v38  ;;  %v10040_v38 = vld [vmem:[#allocation23_spill] sm:$0xff] }
 0x336   : > { %v6350_v60 = vpop.eup %6349 }
 0x337   : > { %v4415_v49 = vrot.slane %v6350_v60, %v10062_v56 }
 0x339   : > { %v4417_v58 = vcombine.high %v4415_v49, %v4415_v49  ;;  %v4424_v60 = vrot.slane %v4415_v49, %v6894_v63 }
 0x33b   : > { %v4431_v26 = vrot.slane %v4417_v58, %v6894_v63  ;;  %v4432_v31 = vcombine.high %v4424_v60, %v4424_v60  ;;  %v7802_v49 = vrot.slane %v4424_v60, %v6894_v63 }
 0x33d   : > { %v4433_v46 = vcombine.high %v4431_v26, %v4431_v26  ;;  %v7813_v34 = vrot.slane %v4431_v26, %v6894_v63  ;;  %v7816_v58 = vrot.slane %v4432_v31, %v6894_v63  ;;  %v7820_v60 = vcombine.high %v7802_v49, %v7802_v49 }
 0x33e   : > { %v7826_v56 = vmul.f32 %v7802_v49, %v10074_v1  ;;  %v7832_v5 = vmul.f32 %v7802_v49, %v10075_v50  ;;  %v10077_v26 = vsub.f32 %v7053_v41, %v7628_v53  ;;  %v7844_v3 = vmul.f32 %v7802_v49, %v10079_v12 }
 0x33f   : > { %v4461_v1 = vrot.slane %v4433_v46, %v6894_v63  ;;  %v4463_v45 = vcombine.high %v7813_v34, %v7813_v34  ;;  %v4464_v50 = vcombine.high %v7816_v58, %v7816_v58  ;;  %v10081_v41 = vsub.f32 %v6906_v61, %v7631_v28 }
 0x340   : > { %10076 = vst [vmem:[#allocation4_spill] sm:$0xff] %v7832_v5  ;;  %v7838_v31 = vmul.f32 %v7802_v49, %v10077_v26  ;;  %10080 = vst [vmem:[#allocation8_spill] sm:$0xff] %v7844_v3  ;;  %v7861_v12 = vmul.f32 %v7820_v60, %v10082_v18  ;;  %v10083_v46 = vsub.f32 %v10020_v33, %v7636_v44 }
 0x341   : > { %v7855_v26 = vmul.f32 %v7816_v58, %v10081_v41  ;;  %v10086_v41 = vsub.f32 %v10022_v24, %v7653_v27  ;;  %v4465_v18 = vcombine.high %v4461_v1, %v4461_v1  ;;  %v10087_v5 = vsub.f32 %v6922_v15, %v7659_v52 }
 0x342   : > { %10078 = vst [vmem:[#allocation9_spill] sm:$0xff] %v7838_v31  ;;  %v7867_v3 = vmul.f32 %v7813_v34, %v10083_v46  ;;  %v10085_v31 = vsub.f32 %v10021_v22, %v7631_v28  ;;  %v10088_v46 = vsub.f32 %v10023_v4, %v7644_v57  ;;  %v10089_v22 = vsub.f32 %v10024_v30, %v7665_v55 }
 0x343   : > { %v7879_v19 = vmul.f32 %v7820_v60, %v10086_v41  ;;  %v7884_v33 = vmul.f32 %v4464_v50, %v10087_v5  ;;  %v10090_v24 = vsub.f32 %v10025_v20, %v7659_v52  ;;  %v10091_v15 = vsub.f32 %v10026_v43, %v7636_v44 }
 0x344   : > { %10084 = vst [vmem:[#allocation3_spill] sm:$0xff] %v7867_v3  ;;  %v7873_v61 = vmul.f32 %v7816_v58, %v10085_v31  ;;  %v7889_v3 = vmul.f32 %v4461_v1, %v10088_v46  ;;  %v7894_v31 = vmul.f32 %v4463_v45, %v10089_v22  ;;  %v10092_v4 = vsub.f32 %v10028_v8, %v7644_v57 }
 0x345   : > { %v7899_v41 = vmul.f32 %v4464_v50, %v10090_v24  ;;  %v7905_v5 = vmul.f32 %v7813_v34, %v10091_v15  ;;  %v10093_v30 = vsub.f32 %v10029_v29, %v7665_v55  ;;  %v10094_v20 = vsub.f32 %v10027_v17, %v7675_v21 }
 0x346   : > { %v7910_v46 = vmul.f32 %v4461_v1, %v10092_v4  ;;  %v10095_v43 = vsub.f32 %v10030_v42, %v7675_v21  ;;  %v10096_v8 = vsub.f32 %v10031_v7, %v7631_v28  ;;  %v10097_v29 = vsub.f32 %v10032_v11, %v7653_v27 }
 0x347   : > { %v7915_v22 = vmul.f32 %v4463_v45, %v10093_v30  ;;  %v7920_v24 = vmul.f32 %v4465_v18, %v10094_v20  ;;  %v10098_v17 = vsub.f32 %v10033_v40, %v7659_v52  ;;  %v10099_v42 = vsub.f32 %v10034_v32, %v7636_v44 }
 0x348   : > { %v7925_v15 = vmul.f32 %v4465_v18, %v10095_v43  ;;  %v7931_v4 = vmul.f32 %v7816_v58, %v10096_v8  ;;  %v7937_v30 = vmul.f32 %v7820_v60, %v10097_v29  ;;  %v10100_v7 = vsub.f32 %v10035_v35, %v7644_v57 }
 0x349   : > { %v7942_v20 = vmul.f32 %v4464_v50, %v10098_v17  ;;  %v7948_v43 = vmul.f32 %v7813_v34, %v10099_v42  ;;  %v10101_v11 = vsub.f32 %v10036_v36, %v7665_v55  ;;  %v10102_v40 = vsub.f32 %v10037_v39, %v7675_v21 }
 0x34a   : > { %v7953_v8 = vmul.f32 %v4461_v1, %v10100_v7  ;;  %v10103_v32 = vsub.f32 %v10038_v59, %v7631_v28  ;;  %v10104_v35 = vsub.f32 %v10039_v47, %v7653_v27  ;;  %v10105_v36 = vsub.f32 %v10040_v38, %v7659_v52 }
 0x34b   : > { %v7958_v29 = vmul.f32 %v4463_v45, %v10101_v11  ;;  %v7963_v17 = vmul.f32 %v4465_v18, %v10102_v40  ;;  %v10106_v39 = vsub.f32 %v10041_v9, %v7636_v44  ;;  %v10107_v59 = vsub.f32 %v10042_v48, %v7644_v57 }
 0x34c   : > { %v7969_v42 = vmul.f32 %v7816_v58, %v10103_v32  ;;  %v7975_v7 = vmul.f32 %v7820_v60, %v10104_v35  ;;  %v7980_v11 = vmul.f32 %v4464_v50, %v10105_v36  ;;  %v10108_v47 = vsub.f32 %v10043_v14, %v7665_v55 }
 0x34d   : > { %v7986_v40 = vmul.f32 %v7813_v34, %v10106_v39  ;;  %v7991_v32 = vmul.f32 %v4461_v1, %v10107_v59  ;;  %v10110_v38 = vsub.f32 %v10044_v51, %v7675_v21  ;;  %v10112_v9 = vsub.f32 %v10045_v13, %v7628_v53  ;;  %v10118_v51 = vld [vmem:[#allocation32_spill] sm:$0xff]  ;;  %v10121_v13 = vld [vmem:[#allocation31_spill] sm:$0xff] }
 0x34e   : > { %v7996_v35 = vmul.f32 %v4463_v45, %v10108_v47  ;;  %v10114_v48 = vsub.f32 %v10046_v6, %v7631_v28  ;;  %v10116_v14 = vsub.f32 %v10047_v0, %v7653_v27  ;;  %v10124_v6 = vld [vmem:[#allocation30_spill] sm:$0xff]  ;;  %v10126_v0 = vld [vmem:[#allocation43_spill] sm:$0xff] }
 0x34f   : > { %v8001_v36 = vmul.f32 %v4465_v18, %v10110_v38  ;;  %v8007_v39 = vmul.f32 %v7802_v49, %v10112_v9  ;;  %v10119_v38 = vsub.f32 %v10118_v51, %v7659_v52  ;;  %v10122_v9 = vsub.f32 %v10121_v13, %v7636_v44 }
 0x350   : > { %10109 = vst [vmem:[#allocation6_spill] sm:$0xff] %v7996_v35  ;;  %v8013_v59 = vmul.f32 %v7816_v58, %v10114_v48  ;;  %v8019_v47 = vmul.f32 %v7820_v60, %v10116_v14  ;;  %v10125_v48 = vsub.f32 %v10124_v6, %v7644_v57  ;;  %v10127_v14 = vsub.f32 %v10126_v0, %v7665_v55  ;;  %v10129_v35 = vld [vmem:[#allocation42_spill] sm:$0xff]  ;;  %v10136_v0 = vld [vmem:[#allocation36_spill] sm:$0xff] }
 0x351   : > { %10111 = vst [vmem:[#allocation7_spill] sm:$0xff] %v8001_v36  ;;  %10113 = vst [vmem:[#allocation10_spill] sm:$0xff] %v8007_v39  ;;  %v8024_v36 = vmul.f32 %v4464_v50, %v10119_v38  ;;  %v8030_v39 = vmul.f32 %v7813_v34, %v10122_v9  ;;  %v10130_v51 = vsub.f32 %v10129_v35, %v7675_v21  ;;  %v10139_v35 = vld [vmem:[#allocation35_spill] sm:$0xff] }
 0x352   : > { %10115 = vst [vmem:[#allocation5_spill] sm:$0xff] %v8013_v59  ;;  %10117 = vst [vmem:[#allocation11_spill] sm:$0xff] %v8019_v47  ;;  %v8035_v59 = vmul.f32 %v4461_v1, %v10125_v48  ;;  %v8040_v47 = vmul.f32 %v4463_v45, %v10127_v14  ;;  %v10137_v14 = vsub.f32 %v10136_v0, %v7653_v27 }
 0x353   : > { %10120 = vst [vmem:[#allocation12_spill] sm:$0xff] %v8024_v36  ;;  %10123 = vst [vmem:[#allocation13_spill] sm:$0xff] %v8030_v39  ;;  %v8045_v38 = vmul.f32 %v4465_v18, %v10130_v51  ;;  %v10132_v36 = vld [vmem:[#allocation33_spill] sm:$0xff]  ;;  %v10134_v39 = vld [vmem:[#allocation39_spill] sm:$0xff]  ;;  %v10140_v51 = vsub.f32 %v10139_v35, %v7659_v52  ;;  %v10145_v0 = vsub.f32 %v10059_v23, %v7665_v55 }
 0x354   : > { %10128 = vst [vmem:[#allocation15_spill] sm:$0xff] %v8040_v47  ;;  %v10133_v13 = vsub.f32 %v10132_v36, %v7628_v53  ;;  %v10135_v6 = vsub.f32 %v10134_v39, %v7631_v28  ;;  %v8063_v47 = vmul.f32 %v7820_v60, %v10137_v14  ;;  %v10142_v36 = vsub.f32 %v10057_v10, %v7636_v44  ;;  %v10155_v23 = vld [vmem:[#allocation44_spill] sm:$0xff] }
 0x355   : > { %10131 = vst [vmem:[#allocation16_spill] sm:$0xff] %v8045_v38  ;;  %v8068_v38 = vmul.f32 %v4464_v50, %v10140_v51  ;;  %v10143_v39 = vsub.f32 %v10058_v2, %v7644_v57  ;;  %v8084_v14 = vmul.f32 %v4463_v45, %v10145_v0  ;;  %v10153_v2 = vsub.f32 %v10063_v37, %v7631_v28  ;;  %v10164_v37 = vld [vmem:[#allocation55_spill] sm:$0xff] }
 0x356   : > { %v8051_v9 = vmul.f32 %v7802_v49, %v10133_v13  ;;  %v8057_v48 = vmul.f32 %v7816_v58, %v10135_v6  ;;  %10138 = vst [vmem:[#allocation14_spill] sm:$0xff] %v8063_v47  ;;  %v8074_v13 = vmul.f32 %v7813_v34, %v10142_v36  ;;  %v10147_v47 = vld [vmem:[#allocation40_spill] sm:$0xff]  ;;  %v10156_v0 = vsub.f32 %v10155_v23, %v7653_v27  ;;  %v10166_v23 = vld [vmem:[#allocation46_spill] sm:$0xff] }
 0x357   : > { %10141 = vst [vmem:[#allocation19_spill] sm:$0xff] %v8068_v38  ;;  %v8079_v6 = vmul.f32 %v4461_v1, %v10143_v39  ;;  %10146 = vst [vmem:[#allocation20_spill] sm:$0xff] %v8084_v14  ;;  %v10148_v35 = vsub.f32 %v10147_v47, %v7675_v21  ;;  %v10150_v38 = vld [vmem:[#allocation48_spill] sm:$0xff]  ;;  %v8101_v39 = vmul.f32 %v7816_v58, %v10153_v2  ;;  %v10158_v47 = vld [vmem:[#allocation45_spill] sm:$0xff] }
 0x358   : > { %v10151_v10 = vsub.f32 %v10150_v38, %v7628_v53  ;;  %v8107_v14 = vmul.f32 %v7820_v60, %v10156_v0  ;;  %v10161_v38 = vld [vmem:[#allocation59_spill] sm:$0xff]  ;;  %v10165_v2 = vsub.f32 %v10164_v37, %v7644_v57  ;;  %v10167_v0 = vsub.f32 %v10166_v23, %v7665_v55  ;;  %v10175_v23 = vld [vmem:[#allocation53_spill] sm:$0xff] }
 0x359   : > { %10144 = vst [vmem:[#allocation21_spill] sm:$0xff] %v8079_v6  ;;  %v8089_v51 = vmul.f32 %v4465_v18, %v10148_v35  ;;  %10154 = vst [vmem:[#allocation22_spill] sm:$0xff] %v8101_v39  ;;  %v10159_v35 = vsub.f32 %v10158_v47, %v7659_v52  ;;  %v10169_v6 = vld [vmem:[#allocation47_spill] sm:$0xff] }
 0x35a   : > { %v8095_v36 = vmul.f32 %v7802_v49, %v10151_v10  ;;  %10157 = vst [vmem:[#allocation23_spill] sm:$0xff] %v8107_v14  ;;  %v10162_v10 = vsub.f32 %v10161_v38, %v7636_v44  ;;  %v8123_v39 = vmul.f32 %v4461_v1, %v10165_v2  ;;  %v8128_v14 = vmul.f32 %v4463_v45, %v10167_v0 }
 0x35b   : > { %10149 = vst [vmem:[#allocation17_spill] sm:$0xff] %v8089_v51  ;;  %v8112_v51 = vmul.f32 %v4464_v50, %v10159_v35  ;;  %v10170_v47 = vsub.f32 %v10169_v6, %v7675_v21  ;;  %v10176_v0 = vsub.f32 %v10175_v23, %v7653_v27  ;;  %v10177_v6 = vsub.f32 %v10069_v25, %v7659_v52 }
 0x35c   : > { %10152 = vst [vmem:[#allocation18_spill] sm:$0xff] %v8095_v36  ;;  %v8118_v36 = vmul.f32 %v7813_v34, %v10162_v10  ;;  %10168 = vst [vmem:[#allocation26_spill] sm:$0xff] %v8128_v14  ;;  %v10180_v27 = vsub.f32 %v10072_v54, %v7665_v55 }
 0x35d   : > { %10160 = vst [vmem:[#allocation25_spill] sm:$0xff] %v8112_v51  ;;  %v8133_v35 = vmul.f32 %v4465_v18, %v10170_v47  ;;  %v10171_v51 = vld [vmem:[#allocation50_spill] sm:$0xff]  ;;  %v8151_v14 = vmul.f32 %v7820_v60, %v10176_v0  ;;  %v8156_v47 = vmul.f32 %v4464_v50, %v10177_v6 }
 0x35e   : > { %10163 = vst [vmem:[#allocation24_spill] sm:$0xff] %v8118_v36  ;;  %v10172_v38 = vsub.f32 %v10171_v51, %v7628_v53  ;;  %v10173_v36 = vld [vmem:[#allocation51_spill] sm:$0xff]  ;;  %v10178_v53 = vsub.f32 %v10070_v16, %v7636_v44  ;;  %v8172_v60 = vmul.f32 %v4463_v45, %v10180_v27  ;;  %v10181_v51 = vld [vmem:[#allocation57_spill] sm:$0xff]  ;;  %v10185_v50 = vld [vmem:[#allocation62_spill] sm:$0xff] }
 0x35f   : > { %v10174_v37 = vsub.f32 %v10173_v36, %v7631_v28  ;;  %v10179_v28 = vsub.f32 %v10071_v62, %v7644_v57  ;;  %v10182_v25 = vsub.f32 %v10181_v51, %v7675_v21  ;;  %v10183_v44 = vld [vmem:[#allocation61_spill] sm:$0xff]  ;;  %v4678_v62 = vrot.slane %v10185_v50, %v6894_v63  ;;  %v10186_v57 = vld [vmem:[#allocation60_spill] sm:$0xff] }
 0x360   : > { %v8139_v10 = vmul.f32 %v7802_v49, %v10172_v38  ;;  %v8162_v49 = vmul.f32 %v7813_v34, %v10178_v53  ;;  %v10184_v16 = vcombine.high %v10183_v44, %v10183_v44  ;;  %v10187_v55 = vcombine.high %v10185_v50, %v10185_v50 }
 0x361   : > { %v8145_v2 = vmul.f32 %v7816_v58, %v10174_v37  ;;  %v8167_v58 = vmul.f32 %v4461_v1, %v10179_v28  ;;  %v8177_v52 = vmul.f32 %v4465_v18, %v10182_v25  ;;  %v4997_v1 = vrot.slane %v10186_v57, %v6894_v63  ;;  %v10189_v18 = vld [vmem:[#allocation63_spill] sm:$0xff] }
 0x362   : > { %v4558_v34 = vrot.slane %v10184_v16, %v6894_v63  ;;  %v4685_v54 = vrot.slane %v10187_v55, %v6894_v63  ;;  %v10188_v21 = vcombine.high %v10186_v57, %v10186_v57  ;;  %v4559_v36 = vcombine.high %v10189_v18, %v10189_v18 }
 0x363   : > { %v4686_v37 = vcombine.high %v4678_v62, %v4678_v62  ;;  %v5005_v23 = vcombine.high %v4997_v1, %v4997_v1  ;;  %v8199_v53 = vrot.slane %v10189_v18, %v6894_v63  ;;  %v8211_v25 = vrot.slane %v4678_v62, %v6894_v63 }
 0x364   : > { %v5004_v45 = vrot.slane %v10188_v21, %v6894_v63  ;;  %v4560_v38 = vcombine.high %v4558_v34, %v4558_v34  ;;  %v4687_v0 = vcombine.high %v4685_v54, %v4685_v54  ;;  %v8202_v28 = vrot.slane %v4558_v34, %v6894_v63 }
 0x365   : > { %v8205_v27 = vrot.slane %v4559_v36, %v6894_v63  ;;  %v8214_v44 = vrot.slane %v4685_v54, %v6894_v63  ;;  %v8217_v16 = vrot.slane %v4686_v37, %v6894_v63  ;;  %v8220_v50 = vrot.slane %v4997_v1, %v6894_v63 }
 0x366   : > { %v5006_v6 = vcombine.high %v5004_v45, %v5004_v45  ;;  %v8208_v51 = vrot.slane %v4560_v38, %v6894_v63  ;;  %v8223_v34 = vrot.slane %v5004_v45, %v6894_v63  ;;  %v8226_v57 = vrot.slane %v5005_v23, %v6894_v63 }
 0x367   : > { %10190 = vst [vmem:[#allocation27_spill] sm:$0xff] %v8220_v50  ;;  %v8229_v55 = vrot.slane %v4687_v0, %v6894_v63  ;;  %v8236_v54 = vcombine.high %v8199_v53, %v8199_v53  ;;  %v8240_v1 = vcombine.high %v8202_v28, %v8202_v28  ;;  %v8244_v21 = vcombine.high %v8205_v27, %v8205_v27 }
 0x368   : > { %10191 = vst [vmem:[#allocation29_spill] sm:$0xff] %v8223_v34  ;;  %10192 = vst [vmem:[#allocation28_spill] sm:$0xff] %v8226_v57  ;;  %v8232_v62 = vrot.slane %v5006_v6, %v6894_v63  ;;  %v8248_v45 = vcombine.high %v8208_v51, %v8208_v51  ;;  %v8252_v18 = vcombine.high %v8211_v25, %v8211_v25 }
 0x369   : > { %v8256_v36 = vcombine.high %v8214_v44, %v8214_v44  ;;  %v8260_v38 = vcombine.high %v8217_v16, %v8217_v16  ;;  %v8264_v37 = vcombine.high %v8229_v55, %v8229_v55  ;;  %v8268_v23 = vcombine.high %v8220_v50, %v8220_v50 }
 0x36a   : > { %10193 = vst [vmem:[#allocation34_spill] sm:$0xff] %v8232_v62  ;;  %v8272_v0 = vcombine.high %v8223_v34, %v8223_v34  ;;  %v8276_v6 = vcombine.high %v8226_v57, %v8226_v57  ;;  %v8280_v63 = vmul.f32 %v8199_v53, %v7826_v56  ;;  %v8288_v50 = vmul.f32 %v8236_v54, %v7861_v12  ;;  %v10202_v57 = vld [vmem:[#allocation8_spill] sm:$0xff] }
 0x36b   : > { %10194 = vst [vmem:[#allocation37_spill] sm:$0xff] %v8256_v36  ;;  %10195 = vst [vmem:[#allocation38_spill] sm:$0xff] %v8268_v23  ;;  %v8284_v36 = vmul.f32 %v8205_v27, %v7855_v26  ;;  %v8292_v34 = vcombine.high %v8232_v62, %v8232_v62  ;;  %v8304_v26 = vmul.f32 %v8208_v51, %v7889_v3  ;;  %v10201_v23 = vld [vmem:[#allocation9_spill] sm:$0xff] }
 0x36c   : > { %10196 = vst [vmem:[#allocation41_spill] sm:$0xff] %v8272_v0  ;;  %10197 = vst [vmem:[#allocation49_spill] sm:$0xff] %v8276_v6  ;;  %v8296_v0 = vmul.f32 %v8244_v21, %v7884_v33  ;;  %v10199_v6 = vld [vmem:[#allocation3_spill] sm:$0xff]  ;;  %v8308_v12 = vmul.f32 %v8240_v1, %v7894_v31  ;;  %v8312_v62 = vmul.f32 %v8248_v45, %v7920_v24 }
 0x36d   : > { %10198 = vst [vmem:[#allocation54_spill] sm:$0xff] %v8292_v34  ;;  %v8300_v56 = vmul.f32 %v8202_v28, %v10199_v6  ;;  %v10200_v34 = vld [vmem:[#allocation4_spill] sm:$0xff]  ;;  %v8320_v6 = vmul.f32 %v8205_v27, %v7873_v61  ;;  %v8324_v3 = vmul.f32 %v8236_v54, %v7879_v19  ;;  %v8328_v31 = vmul.f32 %v8244_v21, %v7899_v41 }
 0x36e   : > { %v8316_v33 = vmul.f32 %v8199_v53, %v10200_v34  ;;  %v8332_v24 = vmul.f32 %v8202_v28, %v7905_v5  ;;  %v8336_v34 = vmul.f32 %v8208_v51, %v7910_v46  ;;  %v8340_v61 = vmul.f32 %v8240_v1, %v7915_v22 }
 0x36f   : > { %v8344_v19 = vmul.f32 %v8248_v45, %v7925_v15  ;;  %v8348_v41 = vmul.f32 %v8199_v53, %v10201_v23  ;;  %v8352_v5 = vmul.f32 %v8205_v27, %v7931_v4  ;;  %v8356_v46 = vmul.f32 %v8236_v54, %v7937_v30 }
 0x370   : > { %v8360_v22 = vmul.f32 %v8244_v21, %v7942_v20  ;;  %v8364_v15 = vmul.f32 %v8202_v28, %v7948_v43  ;;  %v8368_v23 = vmul.f32 %v8208_v51, %v7953_v8  ;;  %v8372_v4 = vmul.f32 %v8240_v1, %v7958_v29 }
 0x371   : > { %v8376_v30 = vmul.f32 %v8248_v45, %v7963_v17  ;;  %v8380_v20 = vmul.f32 %v8199_v53, %v10202_v57  ;;  %v8384_v43 = vmul.f32 %v8205_v27, %v7969_v42  ;;  %v8388_v8 = vmul.f32 %v8236_v54, %v7975_v7 }
 0x372   : > { %v8392_v29 = vmul.f32 %v8244_v21, %v7980_v11  ;;  %v8396_v17 = vmul.f32 %v8202_v28, %v7986_v40  ;;  %v8400_v57 = vmul.f32 %v8208_v51, %v7991_v32 }
 0x373   : > { %10203 = vst [vmem:[#allocation58_spill] sm:$0xff] %v8380_v20  ;;  %10204 = vst [vmem:[#allocation52_spill] sm:$0xff] %v8384_v43  ;;  %v10209_v20 = vld [vmem:[#allocation6_spill] sm:$0xff]  ;;  %v10211_v43 = vld [vmem:[#allocation7_spill] sm:$0xff] }
 0x374   : > { %10205 = vst [vmem:[#allocation56_spill] sm:$0xff] %v8388_v8  ;;  %10206 = vst [vmem:[#allocation32_spill] sm:$0xff] %v8392_v29  ;;  %v8404_v42 = vmul.f32 %v8240_v1, %v10209_v20  ;;  %v8408_v7 = vmul.f32 %v8248_v45, %v10211_v43  ;;  %v10212_v8 = vld [vmem:[#allocation10_spill] sm:$0xff]  ;;  %v10214_v29 = vld [vmem:[#allocation5_spill] sm:$0xff] }
 0x375   : > { %10207 = vst [vmem:[#allocation31_spill] sm:$0xff] %v8396_v17  ;;  %10208 = vst [vmem:[#allocation30_spill] sm:$0xff] %v8400_v57  ;;  %v8412_v11 = vmul.f32 %v8199_v53, %v10212_v8  ;;  %v8416_v40 = vmul.f32 %v8205_v27, %v10214_v29  ;;  %v10216_v17 = vld [vmem:[#allocation11_spill] sm:$0xff]  ;;  %v10217_v57 = vld [vmem:[#allocation12_spill] sm:$0xff]  ;;  %v8432_v8 = vmul.f32 %v8208_v51, %v8035_v59 }
 0x376   : > { %10210 = vst [vmem:[#allocation43_spill] sm:$0xff] %v8404_v42  ;;  %v8420_v32 = vmul.f32 %v8236_v54, %v10216_v17  ;;  %v8424_v20 = vmul.f32 %v8244_v21, %v10217_v57  ;;  %v10218_v42 = vld [vmem:[#allocation13_spill] sm:$0xff]  ;;  %v8444_v57 = vmul.f32 %v8199_v53, %v8051_v9 }
 0x377   : > { %10213 = vst [vmem:[#allocation42_spill] sm:$0xff] %v8412_v11  ;;  %10215 = vst [vmem:[#allocation33_spill] sm:$0xff] %v8416_v40  ;;  %v8428_v43 = vmul.f32 %v8202_v28, %v10218_v42  ;;  %v10221_v11 = vld [vmem:[#allocation15_spill] sm:$0xff]  ;;  %v10222_v40 = vld [vmem:[#allocation16_spill] sm:$0xff]  ;;  %v8448_v42 = vmul.f32 %v8205_v27, %v8057_v48 }
 0x378   : > { %10220 = vst [vmem:[#allocation36_spill] sm:$0xff] %v8432_v8  ;;  %v8436_v29 = vmul.f32 %v8240_v1, %v10221_v11  ;;  %v8440_v17 = vmul.f32 %v8248_v45, %v10222_v40  ;;  %10224 = vst [vmem:[#allocation40_spill] sm:$0xff] %v8444_v57  ;;  %v10228_v8 = vld [vmem:[#allocation19_spill] sm:$0xff]  ;;  %v8460_v40 = vmul.f32 %v8202_v28, %v8074_v13  ;;  %v10233_v57 = vld [vmem:[#allocation20_spill] sm:$0xff] }
 0x379   : > { %10219 = vst [vmem:[#allocation39_spill] sm:$0xff] %v8428_v43  ;;  %10225 = vst [vmem:[#allocation48_spill] sm:$0xff] %v8448_v42  ;;  %v10226_v43 = vld [vmem:[#allocation14_spill] sm:$0xff]  ;;  %v8456_v11 = vmul.f32 %v8244_v21, %v10228_v8  ;;  %v8468_v48 = vmul.f32 %v8240_v1, %v10233_v57  ;;  %v10235_v42 = vld [vmem:[#allocation17_spill] sm:$0xff] }
 0x37a   : > { %10223 = vst [vmem:[#allocation35_spill] sm:$0xff] %v8440_v17  ;;  %v8452_v59 = vmul.f32 %v8236_v54, %v10226_v43  ;;  %10230 = vst [vmem:[#allocation59_spill] sm:$0xff] %v8460_v40  ;;  %v10231_v17 = vld [vmem:[#allocation21_spill] sm:$0xff]  ;;  %v8472_v43 = vmul.f32 %v8248_v45, %v10235_v42  ;;  %v10239_v40 = vld [vmem:[#allocation23_spill] sm:$0xff] }
 0x37b   : > { %10229 = vst [vmem:[#allocation45_spill] sm:$0xff] %v8456_v11  ;;  %v8464_v9 = vmul.f32 %v8208_v51, %v10231_v17  ;;  %10234 = vst [vmem:[#allocation46_spill] sm:$0xff] %v8468_v48  ;;  %v10238_v11 = vld [vmem:[#allocation22_spill] sm:$0xff]  ;;  %v8484_v17 = vmul.f32 %v8236_v54, %v10239_v40  ;;  %v10241_v48 = vld [vmem:[#allocation24_spill] sm:$0xff]  ;;  %v8504_v40 = vmul.f32 %v8248_v45, %v8133_v35 }
 0x37c   : > { %10227 = vst [vmem:[#allocation44_spill] sm:$0xff] %v8452_v59  ;;  %v10236_v59 = vld [vmem:[#allocation18_spill] sm:$0xff]  ;;  %v8480_v13 = vmul.f32 %v8205_v27, %v10238_v11  ;;  %v8492_v42 = vmul.f32 %v8202_v28, %v10241_v48  ;;  %v8512_v48 = vmul.f32 %v8205_v27, %v8145_v2  ;;  %v8524_v35 = vmul.f32 %v8202_v28, %v8162_v49 }
 0x37d   : > { %10232 = vst [vmem:[#allocation55_spill] sm:$0xff] %v8464_v9  ;;  %v8476_v8 = vmul.f32 %v8199_v53, %v10236_v59  ;;  %v10240_v9 = vld [vmem:[#allocation25_spill] sm:$0xff]  ;;  %v8496_v59 = vmul.f32 %v8208_v51, %v8123_v39  ;;  %v8516_v39 = vmul.f32 %v8236_v54, %v8151_v14  ;;  %v8532_v2 = vmul.f32 %v8240_v1, %v8172_v60 }
 0x37e   : > { %v8488_v57 = vmul.f32 %v8244_v21, %v10240_v9  ;;  %v8508_v9 = vmul.f32 %v8199_v53, %v8139_v10  ;;  %v8528_v10 = vmul.f32 %v8208_v51, %v8167_v58  ;;  %v8536_v14 = vmul.f32 %v8248_v45, %v8177_v52  ;;  %v10243_v53 = vld [vmem:[#allocation37_spill] sm:$0xff] }
 0x37f   : > { %10237 = vst [vmem:[#allocation47_spill] sm:$0xff] %v8476_v8  ;;  %v10242_v8 = vld [vmem:[#allocation26_spill] sm:$0xff]  ;;  %v8544_v49 = vadd.f32 %v8217_v16, %v8284_v36  ;;  %v8548_v58 = vadd.f32 %v8252_v18, %v8288_v50  ;;  %v8552_v60 = vadd.f32 %v8260_v38, %v8296_v0  ;;  %v8556_v52 = vadd.f32 %v8214_v44, %v8300_v56 }
 0x380   : > { %v8500_v11 = vmul.f32 %v8240_v1, %v10242_v8  ;;  %v8520_v8 = vmul.f32 %v8244_v21, %v8156_v47  ;;  %v8540_v47 = vadd.f32 %v8211_v25, %v8280_v63  ;;  %v8560_v63 = vadd.f32 %v8229_v55, %v8304_v26 }
 0x381   : > { %v8564_v28 = vadd.f32 %v10243_v53, %v8308_v12  ;;  %v8568_v27 = vadd.f32 %v8264_v37, %v8312_v62  ;;  %v8572_v51 = vadd.f32 %v8211_v25, %v8316_v33  ;;  %v8576_v50 = vadd.f32 %v8217_v16, %v8320_v6 }
 0x382   : > { %v8580_v54 = vadd.f32 %v8252_v18, %v8324_v3  ;;  %v8584_v1 = vadd.f32 %v8260_v38, %v8328_v31  ;;  %v8588_v62 = vadd.f32 %v8214_v44, %v8332_v24  ;;  %v8592_v21 = vadd.f32 %v8229_v55, %v8336_v34  ;;  %v10244_v24 = vld [vmem:[#allocation58_spill] sm:$0xff] }
 0x383   : > { %v8596_v45 = vadd.f32 %v10243_v53, %v8340_v61  ;;  %v8600_v36 = vadd.f32 %v8264_v37, %v8344_v19  ;;  %v8604_v0 = vadd.f32 %v8211_v25, %v8348_v41  ;;  %v8608_v56 = vadd.f32 %v8217_v16, %v8352_v5  ;;  %v10245_v61 = vld [vmem:[#allocation52_spill] sm:$0xff] }
 0x384   : > { %v8612_v26 = vadd.f32 %v8252_v18, %v8356_v46  ;;  %v8616_v12 = vadd.f32 %v8260_v38, %v8360_v22  ;;  %v8620_v33 = vadd.f32 %v8214_v44, %v8364_v15  ;;  %v8624_v6 = vadd.f32 %v8229_v55, %v8368_v23  ;;  %v10247_v41 = vld [vmem:[#allocation56_spill] sm:$0xff]  ;;  %v10251_v15 = vld [vmem:[#allocation31_spill] sm:$0xff] }
 0x385   : > { %v8628_v3 = vadd.f32 %v10243_v53, %v8372_v4  ;;  %v8632_v31 = vadd.f32 %v8264_v37, %v8376_v30  ;;  %v8636_v34 = vadd.f32 %v8211_v25, %v10244_v24  ;;  %v8640_v19 = vadd.f32 %v8217_v16, %v10245_v61  ;;  %v10249_v46 = vld [vmem:[#allocation32_spill] sm:$0xff]  ;;  %v10252_v4 = vld [vmem:[#allocation30_spill] sm:$0xff]  ;;  %v10253_v24 = vld [vmem:[#allocation43_spill] sm:$0xff] }
 0x386   : > { %v8644_v5 = vadd.f32 %v8252_v18, %v10247_v41  ;;  %v8648_v22 = vadd.f32 %v8260_v38, %v10249_v46  ;;  %v8652_v23 = vadd.f32 %v8214_v44, %v10251_v15  ;;  %v8656_v30 = vadd.f32 %v8229_v55, %v10252_v4 }
 0x387   : > { %10246 = vst [vmem:[#allocation50_spill] sm:$0xff] %v8640_v19  ;;  %v8660_v61 = vadd.f32 %v10243_v53, %v10253_v24  ;;  %v8664_v41 = vadd.f32 %v8264_v37, %v8408_v7  ;;  %v8676_v4 = vadd.f32 %v8252_v18, %v8420_v32  ;;  %v8680_v24 = vadd.f32 %v8260_v38, %v8424_v20 }
 0x388   : > { %10248 = vst [vmem:[#allocation51_spill] sm:$0xff] %v8644_v5  ;;  %10250 = vst [vmem:[#allocation53_spill] sm:$0xff] %v8648_v22  ;;  %v10256_v5 = vld [vmem:[#allocation42_spill] sm:$0xff]  ;;  %v10257_v22 = vld [vmem:[#allocation33_spill] sm:$0xff]  ;;  %vm4792_vm4 = vcmp.ge.f32.partialorder %v8540_v47, 0.0  ;;  %vm4793_vm5 = vcmp.ge.f32.partialorder %v8544_v49, 0.0 }
 0x389   : > { %10254 = vst [vmem:[#allocation57_spill] sm:$0xff] %v8660_v61  ;;  %10255 = vst [vmem:[#allocation61_spill] sm:$0xff] %v8664_v41  ;;  %v8668_v46 = vadd.f32 %v8211_v25, %v10256_v5  ;;  %v8672_v15 = vadd.f32 %v8217_v16, %v10257_v22  ;;  %v10261_v61 = vld [vmem:[#allocation39_spill] sm:$0xff]  ;;  %v10263_v41 = vld [vmem:[#allocation36_spill] sm:$0xff]  ;;  %v8692_v22 = vadd.f32 %v10243_v53, %v8436_v29  ;;  %vm4794_vm6 = vcmp.ge.f32.partialorder %v8548_v58, 0.0 }
 0x38a   : > { %10259 = vst [vmem:[#allocation60_spill] sm:$0xff] %v8676_v4  ;;  %10260 = vst [vmem:[#allocation63_spill] sm:$0xff] %v8680_v24  ;;  %v8684_v7 = vadd.f32 %v8214_v44, %v10261_v61  ;;  %v8688_v5 = vadd.f32 %v8229_v55, %v10263_v41  ;;  %v10268_v4 = vld [vmem:[#allocation40_spill] sm:$0xff]  ;;  %vm4795_vm7 = vcmp.ge.f32.partialorder %v8552_v60, 0.0  ;;  %vm4796_vm8 = vcmp.ge.f32.partialorder %v8556_v52, 0.0 }
 0x38b   : > { %10258 = vst [vmem:[#allocation62_spill] sm:$0xff] %v8672_v15  ;;  %10265 = vst [vmem:[#allocation9_spill] sm:$0xff] %v8692_v22  ;;  %v10266_v15 = vld [vmem:[#allocation35_spill] sm:$0xff]  ;;  %v8700_v20 = vadd.f32 %v8211_v25, %v10268_v4  ;;  %v10270_v24 = vld [vmem:[#allocation48_spill] sm:$0xff]  ;;  %vm4797_vm9 = vcmp.ge.f32.partialorder %v8560_v63, 0.0  ;;  %vm4798_vm10 = vcmp.ge.f32.partialorder %v8564_v28, 0.0 }
 0x38c   : > { %10262 = vst [vmem:[#allocation3_spill] sm:$0xff] %v8684_v7  ;;  %10264 = vst [vmem:[#allocation4_spill] sm:$0xff] %v8688_v5  ;;  %v8696_v32 = vadd.f32 %v8264_v37, %v10266_v15  ;;  %v8704_v61 = vadd.f32 %v8217_v16, %v10270_v24  ;;  %v10271_v7 = vld [vmem:[#allocation44_spill] sm:$0xff]  ;;  %v10273_v5 = vld [vmem:[#allocation45_spill] sm:$0xff]  ;;  %vm4799_vm11 = vcmp.ge.f32.partialorder %v8568_v27, 0.0  ;;  %vm4800_vm12 = vcmp.ge.f32.partialorder %v8572_v51, 0.0 }
 0x38d   : > { %10269 = vst [vmem:[#allocation6_spill] sm:$0xff] %v8700_v20  ;;  %v8708_v41 = vadd.f32 %v8252_v18, %v10271_v7  ;;  %v8712_v29 = vadd.f32 %v8260_v38, %v10273_v5  ;;  %v10274_v22 = vld [vmem:[#allocation59_spill] sm:$0xff]  ;;  %v10276_v20 = vld [vmem:[#allocation46_spill] sm:$0xff]  ;;  %v8728_v7 = vadd.f32 %v8264_v37, %v8472_v43  ;;  %v8748_v43 = vadd.f32 %v8214_v44, %v8492_v42 }
 0x38e   : > { %10267 = vst [vmem:[#allocation8_spill] sm:$0xff] %v8696_v32  ;;  %v8716_v15 = vadd.f32 %v8214_v44, %v10274_v22  ;;  %v10275_v32 = vld [vmem:[#allocation55_spill] sm:$0xff]  ;;  %v8724_v24 = vadd.f32 %v10243_v53, %v10276_v20  ;;  %v8736_v22 = vadd.f32 %v8217_v16, %v8480_v13  ;;  %v8744_v20 = vadd.f32 %v8260_v38, %v8488_v57 }
 0x38f   : > { %10272 = vst [vmem:[#allocation7_spill] sm:$0xff] %v8708_v41  ;;  %v8720_v4 = vadd.f32 %v8229_v55, %v10275_v32  ;;  %v10277_v41 = vld [vmem:[#allocation47_spill] sm:$0xff]  ;;  %v8740_v32 = vadd.f32 %v8252_v18, %v8484_v17  ;;  %v8756_v13 = vadd.f32 %v10243_v53, %v8500_v11  ;;  %v8760_v17 = vadd.f32 %v8264_v37, %v8504_v40 }
 0x390   : > { %v8732_v5 = vadd.f32 %v8211_v25, %v10277_v41  ;;  %v8752_v41 = vadd.f32 %v8229_v55, %v8496_v59  ;;  %v8764_v57 = vadd.f32 %v8211_v25, %v8508_v9  ;;  %v8768_v42 = vadd.f32 %v8217_v16, %v8512_v48 }
 0x391   : > { %10279 = vst [vmem:[#allocation5_spill] sm:$0xff] %v8756_v13  ;;  %10280 = vst [vmem:[#allocation11_spill] sm:$0xff] %v8760_v17  ;;  %v8772_v59 = vadd.f32 %v8252_v18, %v8516_v39  ;;  %v8776_v11 = vadd.f32 %v8260_v38, %v8520_v8  ;;  %v8780_v40 = vadd.f32 %v8214_v44, %v8524_v35  ;;  %vm4801_vm13 = vcmp.ge.f32.partialorder %v8576_v50, 0.0 }
 0x392   : > { %10278 = vst [vmem:[#allocation10_spill] sm:$0xff] %v8752_v41  ;;  %10281 = vst [vmem:[#allocation12_spill] sm:$0xff] %v8764_v57  ;;  %v8784_v25 = vadd.f32 %v8229_v55, %v8528_v10  ;;  %v8797_v44 = vadd.f32 %v10243_v53, %v8532_v2  ;;  %v4856_v16 = vmul.f32 0.01, %v8540_v47  ;;  %v4857_v55 = vmul.f32 0.01, %v8544_v49 }
 0x393   : > { %10282 = vst [vmem:[#allocation13_spill] sm:$0xff] %v8768_v42  ;;  %10283 = vst [vmem:[#allocation15_spill] sm:$0xff] %v8776_v11  ;;  %v4858_v18 = vmul.f32 0.01, %v8548_v58  ;;  %v8805_v38 = vadd.f32 %v8264_v37, %v8536_v14  ;;  %vm4802_vm14 = vcmp.ge.f32.partialorder %v8580_v54, 0.0  ;;  %vm4803_vm15 = vcmp.ge.f32.partialorder %v8584_v1, 0.0 }
 0x394   : > { %10284 = vst [vmem:[#allocation16_spill] sm:$0xff] %v8780_v40  ;;  %10285 = vst [vmem:[#allocation14_spill] sm:$0xff] %v8784_v25  ;;  %v4859_v9 = vmul.f32 0.01, %v8552_v60  ;;  %v4860_v48 = vmul.f32 0.01, %v8556_v52  ;;  %v8818_v37 = vsel %vm4792_vm4, %v8540_v47, %v4856_v16 }
 0x395   : > { %10286 = vst [vmem:[#allocation19_spill] sm:$0xff] %v8797_v44  ;;  %10287 = vst [vmem:[#allocation21_spill] sm:$0xff] %v8805_v38  ;;  %v4861_v39 = vmul.f32 0.01, %v8560_v63  ;;  %v4862_v8 = vmul.f32 0.01, %v8564_v28  ;;  %v8829_v38 = vsel %vm4793_vm5, %v8544_v49, %v4857_v55 }
 0x396   : > { %v4863_v35 = vmul.f32 0.01, %v8568_v27  ;;  %v4864_v10 = vmul.f32 0.01, %v8572_v51  ;;  %10288 = vst [vmem:[#allocation20_spill] sm:$0xff] %v8818_v37  ;;  %vm4804_vm0 = vcmp.ge.f32.partialorder %v8588_v62, 0.0  ;;  %v8844_v37 = vsel %vm4794_vm6, %v8548_v58, %v4858_v18 }
 0x397   : > { %v4865_v2 = vmul.f32 0.01, %v8576_v50  ;;  %v4866_v14 = vmul.f32 0.01, %v8580_v54  ;;  %v8824_v53 = vmul.f32 0.01, %v8584_v1  ;;  %v8859_v25 = vsel %vm4795_vm7, %v8552_v60, %v4859_v9 }
 0x398   : > { %10289 = vst [vmem:[#allocation17_spill] sm:$0xff] %v8829_v38  ;;  %vm4805_vm1 = vcmp.ge.f32.partialorder %v8592_v21, 0.0  ;;  %v8833_v44 = vmul.f32 0.01, %v8588_v62  ;;  %v8836_v47 = vmul.f32 0.01, %v8592_v21  ;;  %v8874_v40 = vsel %vm4796_vm8, %v8556_v52, %v4860_v48 }
 0x399   : > { %v8839_v16 = vmul.f32 0.01, %v8596_v45  ;;  %10290 = vst [vmem:[#allocation18_spill] sm:$0xff] %v8844_v37  ;;  %vm4806_vm2 = vcmp.ge.f32.partialorder %v8596_v45, 0.0  ;;  %v8848_v49 = vmul.f32 0.01, %v8600_v36 }
 0x39a   : > { %v8851_v55 = vmul.f32 0.01, %v8604_v0  ;;  %v8854_v38 = vmul.f32 0.01, %v8608_v56  ;;  %10291 = vst [vmem:[#allocation22_spill] sm:$0xff] %v8859_v25  ;;  %vm4807_vm4 = vcmp.ge.f32.partialorder %v8600_v36, 0.0 }
 0x39b   : > { %v8863_v58 = vmul.f32 0.01, %v8612_v26  ;;  %v8866_v18 = vmul.f32 0.01, %v8616_v12  ;;  %v8869_v37 = vmul.f32 0.01, %v8620_v33 }
 0x39c   : > { %10293 = vst [vmem:[#allocation25_spill] sm:$0xff] %v8874_v40  ;;  %vm4808_vm5 = vcmp.ge.f32.partialorder %v8604_v0, 0.0  ;;  %v8878_v60 = vmul.f32 0.01, %v8624_v6  ;;  %v8881_v9 = vmul.f32 0.01, %v8628_v3 }
 0x39d   : > { %10292 = vst [vmem:[#allocation23_spill] sm:$0xff] %v8869_v37  ;;  %v8884_v25 = vmul.f32 0.01, %v8632_v31  ;;  %v8889_v37 = vsel %vm4797_vm9, %v8560_v63, %v4861_v39  ;;  %vm4809_vm6 = vcmp.ge.f32.partialorder %v8608_v56, 0.0  ;;  %v8893_v52 = vmul.f32 0.01, %v8636_v34 }
 0x39e   : > { %10294 = vst [vmem:[#allocation24_spill] sm:$0xff] %v8878_v60  ;;  %10296 = vst [vmem:[#allocation37_spill] sm:$0xff] %v8889_v37  ;;  %v8896_v48 = vmul.f32 0.01, %v8640_v19  ;;  %v10298_v40 = vld [vmem:[#allocation51_spill] sm:$0xff]  ;;  %vm4810_vm7 = vcmp.ge.f32.partialorder %v8612_v26, 0.0 }
 0x39f   : > { %10295 = vst [vmem:[#allocation26_spill] sm:$0xff] %v8884_v25  ;;  %10297 = vst [vmem:[#allocation58_spill] sm:$0xff] %v8893_v52  ;;  %v8899_v60 = vmul.f32 0.01, %v10298_v40  ;;  %v8904_v25 = vsel %vm4798_vm10, %v8564_v28, %v4862_v8  ;;  %v10301_v63 = vld [vmem:[#allocation53_spill] sm:$0xff]  ;;  %vm4811_vm8 = vcmp.ge.f32.partialorder %v8616_v12, 0.0 }
 0x3a0   : > { %10300 = vst [vmem:[#allocation56_spill] sm:$0xff] %v8904_v25  ;;  %v8908_v39 = vmul.f32 0.01, %v10301_v63  ;;  %v8911_v37 = vmul.f32 0.01, %v8652_v23  ;;  %v10306_v28 = vld [vmem:[#allocation57_spill] sm:$0xff] }
 0x3a1   : > { %10299 = vst [vmem:[#allocation52_spill] sm:$0xff] %v8899_v60  ;;  %v8914_v52 = vmul.f32 0.01, %v8656_v30  ;;  %v8919_v60 = vsel %vm4799_vm11, %v8568_v27, %v4863_v35  ;;  %v8925_v8 = vmul.f32 0.01, %v10306_v28  ;;  %v10308_v25 = vld [vmem:[#allocation61_spill] sm:$0xff]  ;;  %v8936_v27 = vsel %vm4800_vm12, %v8572_v51, %v4864_v10 }
 0x3a2   : > { %10302 = vst [vmem:[#allocation32_spill] sm:$0xff] %v8908_v39  ;;  %10303 = vst [vmem:[#allocation31_spill] sm:$0xff] %v8911_v37  ;;  %v8928_v39 = vmul.f32 0.01, %v10308_v25  ;;  %v8931_v37 = vmul.f32 0.01, %v8668_v46  ;;  %v8954_v51 = vsel %vm4801_vm13, %v8576_v50, %v4865_v2  ;;  %v8972_v50 = vsel %vm4802_vm14, %v8580_v54, %v4866_v14 }
 0x3a3   : > { %10304 = vst [vmem:[#allocation30_spill] sm:$0xff] %v8914_v52  ;;  %10305 = vst [vmem:[#allocation43_spill] sm:$0xff] %v8919_v60  ;;  %vm4814_vm11 = vcmp.ge.f32.partialorder %v8628_v3, 0.0  ;;  %v10312_v35 = vld [vmem:[#allocation62_spill] sm:$0xff]  ;;  %vm4818_vm12 = vcmp.ge.f32.partialorder %v10298_v40, 0.0  ;;  %v10319_v10 = vld [vmem:[#allocation3_spill] sm:$0xff]  ;;  %v8991_v54 = vsel %vm4803_vm15, %v8584_v1, %v8824_v53  ;;  %v9010_v1 = vsel %vm4804_vm0, %v8588_v62, %v8833_v44 }
 0x3a4   : > { %10307 = vst [vmem:[#allocation42_spill] sm:$0xff] %v8925_v8  ;;  %10309 = vst [vmem:[#allocation33_spill] sm:$0xff] %v8928_v39  ;;  %v8943_v60 = vmul.f32 0.01, %v10312_v35  ;;  %v10314_v39 = vld [vmem:[#allocation60_spill] sm:$0xff]  ;;  %vm4822_vm13 = vcmp.ge.f32.partialorder %v10306_v28, 0.0  ;;  %v9029_v62 = vsel %vm4805_vm1, %v8592_v21, %v8836_v47  ;;  %v9048_v21 = vsel %vm4806_vm2, %v8596_v45, %v8839_v16 }
 0x3a5   : > { %10310 = vst [vmem:[#allocation39_spill] sm:$0xff] %v8931_v37  ;;  %10311 = vst [vmem:[#allocation36_spill] sm:$0xff] %v8936_v27  ;;  %v8946_v8 = vmul.f32 0.01, %v10314_v39  ;;  %v10316_v37 = vld [vmem:[#allocation63_spill] sm:$0xff]  ;;  %v10326_v2 = vld [vmem:[#allocation8_spill] sm:$0xff]  ;;  %v9067_v45 = vsel %vm4807_vm4, %v8600_v36, %v8848_v49  ;;  %v9080_v36 = vsel %vm4808_vm5, %v8604_v0, %v8851_v55  ;;  %v9093_v0 = vsel %vm4809_vm6, %v8608_v56, %v8854_v38 }
 0x3a6   : > { %10313 = vst [vmem:[#allocation35_spill] sm:$0xff] %v8943_v60  ;;  %v8949_v52 = vmul.f32 0.01, %v10316_v37  ;;  %10318 = vst [vmem:[#allocation44_spill] sm:$0xff] %v8954_v51  ;;  %v8961_v27 = vmul.f32 0.01, %v10319_v10  ;;  %v9106_v56 = vsel %vm4810_vm7, %v8612_v26, %v8863_v58 }
 0x3a7   : > { %10315 = vst [vmem:[#allocation40_spill] sm:$0xff] %v8946_v8  ;;  %v10321_v8 = vld [vmem:[#allocation4_spill] sm:$0xff]  ;;  %10325 = vst [vmem:[#allocation46_spill] sm:$0xff] %v8972_v50  ;;  %v8979_v51 = vmul.f32 0.01, %v10326_v2  ;;  %vm4826_vm14 = vcmp.ge.f32.partialorder %v10314_v39, 0.0 }
 0x3a8   : > { %10317 = vst [vmem:[#allocation48_spill] sm:$0xff] %v8949_v52  ;;  %10320 = vst [vmem:[#allocation45_spill] sm:$0xff] %v8961_v27  ;;  %v8964_v60 = vmul.f32 0.01, %v10321_v8  ;;  %v10323_v52 = vld [vmem:[#allocation9_spill] sm:$0xff]  ;;  %v10331_v14 = vld [vmem:[#allocation7_spill] sm:$0xff] }
 0x3a9   : > { %v8967_v19 = vmul.f32 0.01, %v10323_v52  ;;  %10330 = vst [vmem:[#allocation53_spill] sm:$0xff] %v8991_v54  ;;  %v8998_v50 = vmul.f32 0.01, %v10331_v14  ;;  %10333 = vst [vmem:[#allocation61_spill] sm:$0xff] %v9010_v1 }
 0x3aa   : > { %10322 = vst [vmem:[#allocation59_spill] sm:$0xff] %v8964_v60  ;;  %v10327_v60 = vld [vmem:[#allocation6_spill] sm:$0xff]  ;;  %vm4830_vm15 = vcmp.ge.f32.partialorder %v10323_v52, 0.0  ;;  %v9017_v53 = vmul.f32 0.01, %v8720_v4  ;;  %10335 = vst [vmem:[#allocation60_spill] sm:$0xff] %v9029_v62 }
 0x3ab   : > { %10324 = vst [vmem:[#allocation55_spill] sm:$0xff] %v8967_v19  ;;  %v8982_v27 = vmul.f32 0.01, %v10327_v60  ;;  %v8985_v19 = vmul.f32 0.01, %v8704_v61  ;;  %vm4834_vm0 = vcmp.ge.f32.partialorder %v10331_v14, 0.0 }
 0x3ac   : > { %v9020_v54 = vmul.f32 0.01, %v8724_v24  ;;  %v9036_v44 = vmul.f32 0.01, %v8732_v5  ;;  %v9039_v1 = vmul.f32 0.01, %v8736_v22 }
 0x3ad   : > { %10328 = vst [vmem:[#allocation47_spill] sm:$0xff] %v8982_v27  ;;  %10329 = vst [vmem:[#allocation51_spill] sm:$0xff] %v8985_v19  ;;  %v9001_v27 = vmul.f32 0.01, %v8712_v29  ;;  %v9004_v19 = vmul.f32 0.01, %v8716_v15 }
 0x3ae   : > { %10337 = vst [vmem:[#allocation3_spill] sm:$0xff] %v9048_v21  ;;  %vm4838_vm1 = vcmp.ge.f32.partialorder %v8724_v24, 0.0  ;;  %v9055_v47 = vmul.f32 0.01, %v8744_v20  ;;  %v9058_v62 = vmul.f32 0.01, %v8748_v43 }
 0x3af   : > { %10332 = vst [vmem:[#allocation57_spill] sm:$0xff] %v9004_v19  ;;  %v9023_v19 = vmul.f32 0.01, %v8728_v7  ;;  %10339 = vst [vmem:[#allocation9_spill] sm:$0xff] %v9067_v45  ;;  %vm4842_vm2 = vcmp.ge.f32.partialorder %v8740_v32, 0.0  ;;  %vm4846_vm4 = vcmp.ge.f32.partialorder %v8756_v13, 0.0 }
 0x3b0   : > { %v4910_v16 = vmul.f32 0.01, %v8756_v13  ;;  %v4911_v21 = vmul.f32 0.01, %v8760_v17  ;;  %10340 = vst [vmem:[#allocation8_spill] sm:$0xff] %v9080_v36  ;;  %10341 = vst [vmem:[#allocation6_spill] sm:$0xff] %v9093_v0 }
 0x3b1   : > { %10334 = vst [vmem:[#allocation62_spill] sm:$0xff] %v9023_v19  ;;  %v9042_v19 = vmul.f32 0.01, %v8740_v32  ;;  %v4913_v49 = vmul.f32 0.01, %v8768_v42  ;;  %vm4850_vm5 = vcmp.ge.f32.partialorder %v8772_v59, 0.0 }
 0x3b2   : > { %v4914_v45 = vmul.f32 0.01, %v8772_v59  ;;  %v10342_v55 = vld [vmem:[#allocation16_spill] sm:$0xff]  ;;  %v10343_v36 = vld [vmem:[#allocation14_spill] sm:$0xff]  ;;  %v10344_v17 = vld [vmem:[#allocation19_spill] sm:$0xff]  ;;  %10345 = vst [vmem:[#allocation7_spill] sm:$0xff] %v9106_v56  ;;  %v9133_v56 = vsel %vm4814_vm11, %v8628_v3, %v8881_v9 }
 0x3b3   : > { %10336 = vst [vmem:[#allocation63_spill] sm:$0xff] %v9042_v19  ;;  %v9061_v19 = vmul.f32 0.01, %v8752_v41  ;;  %v4915_v41 = vmul.f32 0.01, %v8776_v11  ;;  %vm4852_vm9 = vcmp.ge.f32.partialorder %v10342_v55, 0.0 }
 0x3b4   : > { %v4916_v42 = vmul.f32 0.01, %v10342_v55  ;;  %v4918_v13 = vmul.f32 0.01, %v10344_v17  ;;  %vm4854_vm6 = vcmp.ge.f32.partialorder %v10344_v17, 0.0  ;;  %v10346_v38 = vld [vmem:[#allocation21_spill] sm:$0xff]  ;;  %v9115_v55 = vsel %vm4811_vm8, %v8616_v12, %v8866_v18 }
 0x3b5   : > { %10338 = vst [vmem:[#allocation4_spill] sm:$0xff] %v9061_v19  ;;  %v4912_v19 = vmul.f32 0.01, %v8764_v57  ;;  %v4917_v57 = vmul.f32 0.01, %v10343_v36  ;;  %vm4855_vm10 = vcmp.ge.f32.partialorder %v10346_v38, 0.0 }
 0x3b6   : > { %v4919_v0 = vmul.f32 0.01, %v10346_v38  ;;  %v10347_v36 = vld [vmem:[#allocation23_spill] sm:$0xff]  ;;  %vm10348_vm3 = vcmp.ge.f32.partialorder %v8620_v33, 0.0  ;;  %v10349_v26 = vld [vmem:[#allocation24_spill] sm:$0xff]  ;;  %vm10350_vm7 = vcmp.ge.f32.partialorder %v8624_v6, 0.0 }
 0x3b7   : > { %v9121_v11 = vsel %vm10348_vm3, %v8620_v33, %v10347_v36  ;;  %v9127_v58 = vsel %vm10350_vm7, %v8624_v6, %v10349_v26  ;;  %v10351_v12 = vld [vmem:[#allocation26_spill] sm:$0xff]  ;;  %vm10352_vm8 = vcmp.ge.f32.partialorder %v8632_v31, 0.0  ;;  %vm10354_vm3 = vcmp.ge.f32.partialorder %v8636_v34, 0.0  ;;  %v10357_v3 = vld [vmem:[#allocation52_spill] sm:$0xff] }
 0x3b8   : > { %v9139_v18 = vsel %vm10352_vm8, %v8632_v31, %v10351_v12  ;;  %v10353_v33 = vld [vmem:[#allocation58_spill] sm:$0xff]  ;;  %v9157_v9 = vsel %vm4818_vm12, %v10298_v40, %v10357_v3  ;;  %v10358_v31 = vld [vmem:[#allocation32_spill] sm:$0xff]  ;;  %vm10359_vm11 = vcmp.ge.f32.partialorder %v10301_v63, 0.0  ;;  %vm10361_vm8 = vcmp.ge.f32.partialorder %v8652_v23, 0.0 }
 0x3b9   : > { %v9145_v36 = vsel %vm10354_vm3, %v8636_v34, %v10353_v33  ;;  %v10355_v6 = vld [vmem:[#allocation50_spill] sm:$0xff]  ;;  %v9163_v12 = vsel %vm10359_vm11, %v10301_v63, %v10358_v31  ;;  %v10360_v34 = vld [vmem:[#allocation31_spill] sm:$0xff]  ;;  %vm10363_vm3 = vcmp.ge.f32.partialorder %v8656_v30, 0.0  ;;  %v10365_v63 = vld [vmem:[#allocation33_spill] sm:$0xff]  ;;  %vm10366_vm12 = vcmp.ge.f32.partialorder %v10308_v25, 0.0 }
 0x3ba   : > { %vm10356_vm7 = vcmp.ge.f32.partialorder %v10355_v6, 0.0  ;;  %v9169_v33 = vsel %vm10361_vm8, %v8652_v23, %v10360_v34  ;;  %v10364_v40 = vld [vmem:[#allocation42_spill] sm:$0xff]  ;;  %v9187_v31 = vsel %vm10366_vm12, %v10308_v25, %v10365_v63  ;;  %v10367_v23 = vld [vmem:[#allocation39_spill] sm:$0xff]  ;;  %vm10370_vm11 = vcmp.ge.f32.partialorder %v10312_v35, 0.0  ;;  %v10372_v25 = vld [vmem:[#allocation48_spill] sm:$0xff] }
 0x3bb   : > { %v9151_v26 = vsel %vm10356_vm7, %v10355_v6, %v8896_v48  ;;  %v10362_v48 = vld [vmem:[#allocation30_spill] sm:$0xff]  ;;  %v9181_v3 = vsel %vm4822_vm13, %v10306_v28, %v10364_v40  ;;  %vm10368_vm7 = vcmp.ge.f32.partialorder %v8668_v46, 0.0  ;;  %v10371_v28 = vld [vmem:[#allocation40_spill] sm:$0xff]  ;;  %vm10373_vm13 = vcmp.ge.f32.partialorder %v10316_v37, 0.0 }
 0x3bc   : > { %v9175_v6 = vsel %vm10363_vm3, %v8656_v30, %v10362_v48  ;;  %v9193_v34 = vsel %vm10368_vm7, %v8668_v46, %v10367_v23  ;;  %v10369_v30 = vld [vmem:[#allocation35_spill] sm:$0xff]  ;;  %v9205_v40 = vsel %vm4826_vm14, %v10314_v39, %v10371_v28  ;;  %v9211_v63 = vsel %vm10373_vm13, %v10316_v37, %v10372_v25  ;;  %v10374_v46 = vld [vmem:[#allocation45_spill] sm:$0xff] }
 0x3bd   : > { %v9199_v48 = vsel %vm10370_vm11, %v10312_v35, %v10369_v30  ;;  %vm10375_vm8 = vcmp.ge.f32.partialorder %v10319_v10, 0.0  ;;  %v10376_v35 = vld [vmem:[#allocation59_spill] sm:$0xff]  ;;  %vm10377_vm3 = vcmp.ge.f32.partialorder %v10321_v8, 0.0  ;;  %vm10379_vm14 = vcmp.ge.f32.partialorder %v10326_v2, 0.0 }
 0x3be   : > { %v9217_v23 = vsel %vm10375_vm8, %v10319_v10, %v10374_v46  ;;  %v9223_v30 = vsel %vm10377_vm3, %v10321_v8, %v10376_v35  ;;  %v10378_v39 = vld [vmem:[#allocation55_spill] sm:$0xff]  ;;  %v9235_v37 = vsel %vm10379_vm14, %v10326_v2, %v8979_v51  ;;  %vm10381_vm12 = vcmp.ge.f32.partialorder %v10327_v60, 0.0 }
 0x3bf   : > { %v9229_v28 = vsel %vm4830_vm15, %v10323_v52, %v10378_v39  ;;  %v10380_v10 = vld [vmem:[#allocation47_spill] sm:$0xff]  ;;  %vm10383_vm7 = vcmp.ge.f32.partialorder %v8704_v61, 0.0  ;;  %v9253_v52 = vsel %vm4834_vm0, %v10331_v14, %v8998_v50  ;;  %vm10384_vm15 = vcmp.ge.f32.partialorder %v8712_v29, 0.0  ;;  %v10396_v14 = vld [vmem:[#allocation10_spill] sm:$0xff] }
 0x3c0   : > { %v9241_v25 = vsel %vm10381_vm12, %v10327_v60, %v10380_v10  ;;  %v10382_v8 = vld [vmem:[#allocation51_spill] sm:$0xff]  ;;  %v9259_v51 = vsel %vm10384_vm15, %v8712_v29, %v9001_v27  ;;  %v10385_v60 = vld [vmem:[#allocation57_spill] sm:$0xff]  ;;  %vm10386_vm11 = vcmp.ge.f32.partialorder %v8716_v15, 0.0  ;;  %vm10387_vm13 = vcmp.ge.f32.partialorder %v8720_v4, 0.0  ;;  %v10388_v29 = vld [vmem:[#allocation62_spill] sm:$0xff] }
 0x3c1   : > { %v9247_v46 = vsel %vm10383_vm7, %v8704_v61, %v10382_v8  ;;  %v9265_v2 = vsel %vm10386_vm11, %v8716_v15, %v10385_v60  ;;  %v9271_v61 = vsel %vm10387_vm13, %v8720_v4, %v9017_v53  ;;  %v9277_v50 = vsel %vm4838_vm1, %v8724_v24, %v9020_v54  ;;  %v10392_v24 = vld [vmem:[#allocation63_spill] sm:$0xff]  ;;  %v10407_v10 = vld [vmem:[#allocation16_spill] sm:$0xff]  ;;  %v10408_v8 = vld [vmem:[#allocation14_spill] sm:$0xff] }
 0x3c2   : > { %vm10389_vm0 = vcmp.ge.f32.partialorder %v8728_v7, 0.0  ;;  %vm10390_vm8 = vcmp.ge.f32.partialorder %v8732_v5, 0.0  ;;  %vm10391_vm3 = vcmp.ge.f32.partialorder %v8736_v22, 0.0  ;;  %v9301_v54 = vsel %vm4842_vm2, %v8740_v32, %v10392_v24  ;;  %v10398_v32 = vld [vmem:[#allocation5_spill] sm:$0xff]  ;;  %v10405_v39 = vld [vmem:[#allocation15_spill] sm:$0xff]  ;;  %v10414_v24 = vld [vmem:[#allocation28_spill] sm:$0xff] }
 0x3c3   : > { %v9283_v27 = vsel %vm10389_vm0, %v8728_v7, %v10388_v29  ;;  %v9289_v15 = vsel %vm10390_vm8, %v8732_v5, %v9036_v44  ;;  %v9295_v4 = vsel %vm10391_vm3, %v8736_v22, %v9039_v1  ;;  %vm10393_vm1 = vcmp.ge.f32.partialorder %v8744_v20, 0.0  ;;  %v10395_v22 = vld [vmem:[#allocation4_spill] sm:$0xff]  ;;  %v10399_v44 = vld [vmem:[#allocation11_spill] sm:$0xff] }
 0x3c4   : > { %v9307_v7 = vsel %vm10393_vm1, %v8744_v20, %v9055_v47  ;;  %vm10394_vm14 = vcmp.ge.f32.partialorder %v8748_v43, 0.0  ;;  %vm10397_vm12 = vcmp.ge.f32.partialorder %v10396_v14, 0.0  ;;  %v9324_v53 = vsel %vm4846_vm4, %v10398_v32, %v4910_v16  ;;  %v10401_v47 = vld [vmem:[#allocation12_spill] sm:$0xff]  ;;  %v10411_v60 = vld [vmem:[#allocation27_spill] sm:$0xff] }
 0x3c5   : > { %v9313_v5 = vsel %vm10394_vm14, %v8748_v43, %v9058_v62  ;;  %v9319_v1 = vsel %vm10397_vm12, %v10396_v14, %v10395_v22  ;;  %vm10400_vm2 = vcmp.ge.f32.partialorder %v10399_v44, 0.0  ;;  %vm10402_vm7 = vcmp.ge.f32.partialorder %v10401_v47, 0.0  ;;  %v10403_v62 = vld [vmem:[#allocation13_spill] sm:$0xff]  ;;  %v10417_v14 = vld [vmem:[#allocation38_spill] sm:$0xff] }
 0x3c6   : > { %v9329_v20 = vsel %vm10400_vm2, %v10399_v44, %v4911_v21  ;;  %v9334_v43 = vsel %vm10402_vm7, %v10401_v47, %v4912_v19  ;;  %vm10404_vm15 = vcmp.ge.f32.partialorder %v10403_v62, 0.0  ;;  %v9344_v16 = vsel %vm4850_vm5, %v8772_v59, %v4914_v45  ;;  %v10410_v45 = vld [vmem:[#allocation20_spill] sm:$0xff]  ;;  %v10419_v44 = vld [vmem:[#allocation22_spill] sm:$0xff]  ;;  %v10422_v47 = vld [vmem:[#allocation25_spill] sm:$0xff] }
 0x3c7   : > { %v9339_v35 = vsel %vm10404_vm15, %v10403_v62, %v4913_v49  ;;  %vm10406_vm4 = vcmp.ge.f32.partialorder %v10405_v39, 0.0  ;;  %v9354_v19 = vsel %vm4852_vm9, %v10407_v10, %v4916_v42  ;;  %vm10409_vm11 = vcmp.ge.f32.partialorder %v10408_v8, 0.0  ;;  %v10413_v42 = vld [vmem:[#allocation17_spill] sm:$0xff] }
 0x3c8   : > { %v9349_v21 = vsel %vm10406_vm4, %v10405_v39, %v4915_v41  ;;  %v9359_v49 = vsel %vm10409_vm11, %v10408_v8, %v4917_v57  ;;  %v9364_v59 = vsel %vm4854_vm6, %v10344_v17, %v4918_v13  ;;  %v9369_v41 = vsel %vm4855_vm10, %v10346_v38, %v4919_v0  ;;  %v10416_v57 = vld [vmem:[#allocation18_spill] sm:$0xff]  ;;  %v10420_v13 = vld [vmem:[#allocation49_spill] sm:$0xff]  ;;  %v10428_v8 = vld [vmem:[#allocation56_spill] sm:$0xff] }
 0x3c9   : > { %v9373_v29 = vadd.f32 %v10411_v60, %v10410_v45  ;;  %v9377_v22 = vadd.f32 %v10414_v24, %v10413_v42  ;;  %v9381_v32 = vadd.f32 %v10417_v14, %v10416_v57  ;;  %v9385_v17 = vadd.f32 %v10420_v13, %v10419_v44  ;;  %v10423_v62 = vld [vmem:[#allocation29_spill] sm:$0xff]  ;;  %v10426_v39 = vld [vmem:[#allocation34_spill] sm:$0xff] }
 0x3ca   : > { %v9389_v0 = vadd.f32 %v10423_v62, %v10422_v47  ;;  %v10425_v38 = vld [vmem:[#allocation37_spill] sm:$0xff]  ;;  %vm10471_vm9 = vcmask 130048  }
 0x3cb   : > { %10412 = vst [vmem:[#allocation19_spill] sm:$0xff] %v9373_v29  ;;  %10415 = vst [vmem:[#allocation21_spill] sm:$0xff] %v9377_v22  ;;  %v9393_v10 = vadd.f32 %v10426_v39, %v10425_v38  ;;  %v10429_v45 = vld [vmem:[#allocation41_spill] sm:$0xff]  ;;  %v10431_v29 = vld [vmem:[#allocation43_spill] sm:$0xff] }
 0x3cc   : > { %10418 = vst [vmem:[#allocation23_spill] sm:$0xff] %v9381_v32  ;;  %10421 = vst [vmem:[#allocation24_spill] sm:$0xff] %v9385_v17  ;;  %v9397_v42 = vadd.f32 %v10429_v45, %v10428_v8  ;;  %v10432_v22 = vld [vmem:[#allocation54_spill] sm:$0xff]  ;;  %v10434_v32 = vld [vmem:[#allocation36_spill] sm:$0xff] }
 0x3cd   : > { %10424 = vst [vmem:[#allocation26_spill] sm:$0xff] %v9389_v0  ;;  %10427 = vst [vmem:[#allocation58_spill] sm:$0xff] %v9393_v10  ;;  %v9401_v57 = vadd.f32 %v10432_v22, %v10431_v29  ;;  %v9405_v44 = vadd.f32 %v10411_v60, %v10434_v32  ;;  %v10436_v17 = vld [vmem:[#allocation44_spill] sm:$0xff]  ;;  %v10438_v0 = vld [vmem:[#allocation46_spill] sm:$0xff] }
 0x3ce   : > { %10430 = vst [vmem:[#allocation50_spill] sm:$0xff] %v9397_v42  ;;  %v9409_v47 = vadd.f32 %v10414_v24, %v10436_v17  ;;  %v9413_v38 = vadd.f32 %v10417_v14, %v10438_v0  ;;  %v10440_v10 = vld [vmem:[#allocation53_spill] sm:$0xff]  ;;  %vm10472_vm10 = vmmov %vm10471_vm9 }
 0x3cf   : > { %10433 = vst [vmem:[#allocation52_spill] sm:$0xff] %v9401_v57  ;;  %10435 = vst [vmem:[#allocation32_spill] sm:$0xff] %v9405_v44  ;;  %v9417_v8 = vadd.f32 %v10420_v13, %v10440_v10  ;;  %v10442_v42 = vld [vmem:[#allocation61_spill] sm:$0xff]  ;;  %v10444_v57 = vld [vmem:[#allocation60_spill] sm:$0xff] }
 0x3d0   : > { %10437 = vst [vmem:[#allocation31_spill] sm:$0xff] %v9409_v47  ;;  %10439 = vst [vmem:[#allocation30_spill] sm:$0xff] %v9413_v38  ;;  %v9421_v29 = vadd.f32 %v10423_v62, %v10442_v42  ;;  %v9425_v32 = vadd.f32 %v10426_v39, %v10444_v57  ;;  %v10445_v44 = vld [vmem:[#allocation3_spill] sm:$0xff]  ;;  %v10446_v47 = vld [vmem:[#allocation9_spill] sm:$0xff] }
 0x3d1   : > { %10441 = vst [vmem:[#allocation42_spill] sm:$0xff] %v9417_v8  ;;  %v9429_v17 = vadd.f32 %v10429_v45, %v10445_v44  ;;  %v9433_v0 = vadd.f32 %v10432_v22, %v10446_v47  ;;  %v10447_v38 = vld [vmem:[#allocation8_spill] sm:$0xff]  ;;  %v10448_v8 = vld [vmem:[#allocation6_spill] sm:$0xff]  ;;  %v9449_v44 = vadd.f32 %v10420_v13, %v9115_v55  ;;  %v9453_v47 = vadd.f32 %v10423_v62, %v9121_v11  ;;  %vm10473_vm5 = vmmov %vm10471_vm9 }
 0x3d2   : > { %10443 = vst [vmem:[#allocation33_spill] sm:$0xff] %v9421_v29  ;;  %v9437_v10 = vadd.f32 %v10411_v60, %v10447_v38  ;;  %v9441_v42 = vadd.f32 %v10414_v24, %v10448_v8  ;;  %v10449_v29 = vld [vmem:[#allocation7_spill] sm:$0xff]  ;;  %v9457_v38 = vadd.f32 %v10426_v39, %v9127_v58  ;;  %v9461_v8 = vadd.f32 %v10429_v45, %v9133_v56  ;;  %vm10474_vm6 = vmmov %vm10473_vm5 }
 0x3d3   : > { %v9445_v57 = vadd.f32 %v10417_v14, %v10449_v29  ;;  %v9465_v29 = vadd.f32 %v10432_v22, %v9139_v18  ;;  %v9469_v55 = vadd.f32 %v10411_v60, %v9145_v36  ;;  %v9473_v11 = vadd.f32 %v10414_v24, %v9151_v26  ;;  %vm10482_vm13 = vmmov %vm10473_vm5 }
 0x3d4   : > { %v9477_v58 = vadd.f32 %v10417_v14, %v9157_v9  ;;  %v9481_v56 = vadd.f32 %v10420_v13, %v9163_v12  ;;  %v9485_v18 = vadd.f32 %v10423_v62, %v9169_v33  ;;  %v9489_v36 = vadd.f32 %v10426_v39, %v9175_v6  ;;  %vm10483_vm0 = vmmov %vm10473_vm5 }
 0x3d5   : > { %v9493_v26 = vadd.f32 %v10429_v45, %v9181_v3  ;;  %v9497_v9 = vadd.f32 %v10432_v22, %v9187_v31  ;;  %v9501_v12 = vadd.f32 %v10411_v60, %v9193_v34  ;;  %v9505_v33 = vadd.f32 %v10414_v24, %v9199_v48  ;;  %vm10484_vm8 = vmmov %vm10483_vm0 }
 0x3d6   : > { %v9509_v6 = vadd.f32 %v10417_v14, %v9205_v40  ;;  %v9513_v3 = vadd.f32 %v10420_v13, %v9211_v63  ;;  %v9517_v31 = vadd.f32 %v10423_v62, %v9217_v23  ;;  %v9521_v34 = vadd.f32 %v10426_v39, %v9223_v30  ;;  %vm10485_vm3 = vmmov %vm10483_vm0 }
 0x3d7   : > { %v9525_v48 = vadd.f32 %v10429_v45, %v9229_v28  ;;  %v9529_v40 = vadd.f32 %v10432_v22, %v9235_v37  ;;  %v9533_v63 = vadd.f32 %v10411_v60, %v9241_v25  ;;  %v9537_v23 = vadd.f32 %v10414_v24, %v9247_v46 }
 0x3d8   : > { %v9541_v30 = vadd.f32 %v10417_v14, %v9253_v52  ;;  %v9545_v28 = vadd.f32 %v10420_v13, %v9259_v51  ;;  %v9549_v37 = vadd.f32 %v10423_v62, %v9265_v2  ;;  %v9553_v25 = vadd.f32 %v10426_v39, %v9271_v61 }
 0x3d9   : > { %v9557_v46 = vadd.f32 %v10429_v45, %v9277_v50  ;;  %v9561_v52 = vadd.f32 %v10432_v22, %v9283_v27  ;;  %v9565_v51 = vadd.f32 %v10411_v60, %v9289_v15  ;;  %v9569_v2 = vadd.f32 %v10414_v24, %v9295_v4 }
 0x3da   : > { %v9573_v61 = vadd.f32 %v10417_v14, %v9301_v54  ;;  %v9577_v50 = vadd.f32 %v10420_v13, %v9307_v7  ;;  %v9581_v27 = vadd.f32 %v10423_v62, %v9313_v5  ;;  %v9585_v15 = vadd.f32 %v10426_v39, %v9319_v1 }
 0x3db   : > { %v9589_v4 = vadd.f32 %v10429_v45, %v9324_v53  ;;  %v9593_v54 = vadd.f32 %v10432_v22, %v9329_v20  ;;  %v9597_v7 = vadd.f32 %v10411_v60, %v9334_v43  ;;  %v9601_v5 = vadd.f32 %v10414_v24, %v9339_v35  ;;  %v10457_v60 = vld [vmem:[#allocation21_spill] sm:$0xff]  ;;  %v10458_v24 = vld [vmem:[#allocation19_spill] sm:$0xff] }
 0x3dc   : > { %v9605_v1 = vadd.f32 %v10417_v14, %v9344_v16  ;;  %v9609_v53 = vadd.f32 %v10420_v13, %v9349_v21  ;;  %v9613_v20 = vadd.f32 %v10423_v62, %v9354_v19  ;;  %v9617_v43 = vadd.f32 %v10426_v39, %v9359_v49  ;;  %v10459_v14 = vld [vmem:[#allocation24_spill] sm:$0xff]  ;;  %v10460_v13 = vld [vmem:[#allocation23_spill] sm:$0xff]  ;;  %v10461_v19 = vld [vmem:[#allocation58_spill] sm:$0xff] }
 0x3dd   : > { %10450 = vst [vmem:[#allocation39_spill] sm:$0xff] %v9597_v7  ;;  %v9621_v35 = vadd.f32 %v10429_v45, %v9364_v59  ;;  %v9625_v16 = vadd.f32 %v10432_v22, %v9369_v41  ;;  %v5175_v21 = vcombine.low %v10458_v24, %v10457_v60  ;;  %v10462_v62 = vld [vmem:[#allocation26_spill] sm:$0xff]  ;;  %v10466_v59 = vld [vmem:[#allocation32_spill] sm:$0xff]  ;;  %v10470_v24 = vld [vmem:[#allocation33_spill] sm:$0xff] }
 0x3de   : > { %10451 = vst [vmem:[#allocation35_spill] sm:$0xff] %v9605_v1  ;;  %10452 = vst [vmem:[#allocation40_spill] sm:$0xff] %v9609_v53  ;;  %v5176_v1 = vcombine.low %v10460_v13, %v10459_v14  ;;  %v10463_v53 = vld [vmem:[#allocation52_spill] sm:$0xff]  ;;  %v10464_v49 = vld [vmem:[#allocation50_spill] sm:$0xff]  ;;  %v5226_v14 = vcombine.low %v10470_v24, %v9425_v32  ;;  %v5227_v13 = vcombine.low %v9429_v17, %v9433_v0 }
 0x3df   : > { %10453 = vst [vmem:[#allocation48_spill] sm:$0xff] %v9613_v20  ;;  %10454 = vst [vmem:[#allocation45_spill] sm:$0xff] %v9617_v43  ;;  %v5177_v20 = vcombine.low %v10462_v62, %v10461_v19  ;;  %v5178_v39 = vcombine.low %v10464_v49, %v10463_v53  ;;  %v10465_v43 = vld [vmem:[#allocation31_spill] sm:$0xff]  ;;  %v10468_v7 = vld [vmem:[#allocation30_spill] sm:$0xff]  ;;  %v5274_v17 = vcombine.low %v9445_v57, %v9449_v44 }
 0x3e0   : > { %10455 = vst [vmem:[#allocation59_spill] sm:$0xff] %v9621_v35  ;;  %10456 = vst [vmem:[#allocation55_spill] sm:$0xff] %v9625_v16  ;;  %v5224_v45 = vcombine.low %v10466_v59, %v10465_v43  ;;  %v10467_v35 = vld [vmem:[#allocation42_spill] sm:$0xff]  ;;  %v5275_v0 = vcombine.low %v9453_v47, %v9457_v38  ;;  %v5322_v47 = vcombine.low %v9469_v55, %v9473_v11 }
 0x3e1   : > { %v5225_v41 = vcombine.low %v10468_v7, %v10467_v35  ;;  %v10469_v22 = vld [vmem:[#allocation2_spill] sm:$0xff]  ;;  %v5323_v38 = vcombine.low %v9477_v58, %v9481_v56  ;;  %v5325_v24 = vcombine.low %v9493_v26, %v9497_v9  ;;  %v5371_v56 = vcombine.low %v9501_v12, %v9505_v33 }
 0x3e2   : > { %v5185_v16 = vrot.slane %v5175_v21, %v10469_v22  ;;  %v5192_v60 = vrot.slane %v5176_v1, %v10469_v22  ;;  %v5199_v19 = vrot.slane %v5177_v20, %v10469_v22  ;;  %v5206_v53 = vrot.slane %v5178_v39, %v10469_v22 }
 0x3e3   : > { %v5234_v62 = vrot.slane %v5224_v45, %v10469_v22  ;;  %v5241_v43 = vrot.slane %v5225_v41, %v10469_v22  ;;  %v5248_v7 = vrot.slane %v5226_v14, %v10469_v22  ;;  %v5255_v35 = vrot.slane %v5227_v13, %v10469_v22 }
 0x3e4   : > { %v5207_v49 = vcombine.low %v5185_v16, %v5192_v60  ;;  %v5273_v1 = vcombine.low %v9437_v10, %v9441_v42  ;;  %v5208_v32 = vcombine.low %v5199_v19, %v5206_v53  ;;  %v5276_v16 = vcombine.low %v9461_v8, %v9465_v29 }
 0x3e5   : > { %v5256_v21 = vcombine.low %v5234_v62, %v5241_v43  ;;  %v5257_v39 = vcombine.low %v5248_v7, %v5255_v35  ;;  %v5290_v42 = vrot.slane %v5274_v17, %v10469_v22  ;;  %v5297_v41 = vrot.slane %v5275_v0, %v10469_v22 }
 0x3e6   : > { %v5215_v20 = vrot.slane %v5207_v49, %v10469_v22  ;;  %v5283_v59 = vrot.slane %v5273_v1, %v10469_v22  ;;  %v5222_v45 = vrot.slane %v5208_v32, %v10469_v22  ;;  %v5304_v44 = vrot.slane %v5276_v16, %v10469_v22 }
 0x3e7   : > { %v5264_v10 = vrot.slane %v5256_v21, %v10469_v22  ;;  %v5271_v57 = vrot.slane %v5257_v39, %v10469_v22  ;;  %v5324_v60 = vcombine.low %v9485_v18, %v9489_v36  ;;  %v5332_v19 = vrot.slane %v5322_v47, %v10469_v22  ;;  %v10480_v47 = vld [vmem:[#allocation55_spill] sm:$0xff] }
 0x3e8   : > { %v5223_v8 = vcombine.low %v5215_v20, %v5222_v45  ;;  %v5305_v29 = vcombine.low %v5283_v59, %v5290_v42  ;;  %v5306_v13 = vcombine.low %v5297_v41, %v5304_v44  ;;  %v5339_v53 = vrot.slane %v5323_v38, %v10469_v22  ;;  %v10476_v45 = vld [vmem:[#allocation40_spill] sm:$0xff]  ;;  %v10478_v41 = vld [vmem:[#allocation45_spill] sm:$0xff]  ;;  %v10481_v38 = vld [vmem:[#allocation59_spill] sm:$0xff] }
 0x3e9   : > { %v5272_v14 = vcombine.low %v5264_v10, %v5271_v57  ;;  %v5346_v11 = vrot.slane %v5324_v60, %v10469_v22  ;;  %v5353_v58 = vrot.slane %v5325_v24, %v10469_v22  ;;  %v5372_v26 = vcombine.low %v9509_v6, %v9513_v3  ;;  %v10479_v57 = vld [vmem:[#allocation48_spill] sm:$0xff] }
 0x3ea   : > { %v5313_v55 = vrot.slane %v5305_v29, %v10469_v22  ;;  %5575 = vst.msk [vmem:[%s9669_s27] sm:$0xff] %vm10471_vm9, %v5223_v8  ;;  %v5320_v18 = vrot.slane %v5306_v13, %v10469_v22  ;;  %v5354_v36 = vcombine.low %v5332_v19, %v5339_v53  ;;  %v5373_v9 = vcombine.low %v9517_v31, %v9521_v34 }
 0x3eb   : > { %5576 = vst.msk [vmem:[%s9669_s27 + $0x8] sm:$0xff] %vm10472_vm10, %v5272_v14  ;;  %v5355_v62 = vcombine.low %v5346_v11, %v5353_v58  ;;  %v5374_v43 = vcombine.low %v9525_v48, %v9529_v40  ;;  %v5381_v12 = vrot.slane %v5371_v56, %v10469_v22  ;;  %v5420_v33 = vcombine.low %v9533_v63, %v9537_v23 }
 0x3ec   : > { %v5321_v49 = vcombine.low %v5313_v55, %v5320_v18  ;;  %v5362_v7 = vrot.slane %v5354_v36, %v10469_v22  ;;  %v5388_v6 = vrot.slane %v5372_v26, %v10469_v22  ;;  %v5395_v3 = vrot.slane %v5373_v9, %v10469_v22 }
 0x3ed   : > { %v5369_v31 = vrot.slane %v5355_v62, %v10469_v22  ;;  %v5402_v34 = vrot.slane %v5374_v43, %v10469_v22  ;;  %v5421_v35 = vcombine.low %v9541_v30, %v9545_v28  ;;  %v5422_v48 = vcombine.low %v9549_v37, %v9553_v25 }
 0x3ee   : > { %v5403_v40 = vcombine.low %v5381_v12, %v5388_v6  ;;  %v5423_v63 = vcombine.low %v9557_v46, %v9561_v52  ;;  %v5430_v23 = vrot.slane %v5420_v33, %v10469_v22  ;;  %v5469_v1 = vcombine.low %v9565_v51, %v9569_v2  ;;  %5577 = vst.msk [vmem:[%s9669_s27 + $0x10] sm:$0xff] %vm10473_vm5, %v5321_v49 }
 0x3ef   : > { %v5370_v32 = vcombine.low %v5362_v7, %v5369_v31  ;;  %v5404_v21 = vcombine.low %v5395_v3, %v5402_v34  ;;  %v5437_v17 = vrot.slane %v5421_v35, %v10469_v22  ;;  %v5444_v30 = vrot.slane %v5422_v48, %v10469_v22 }
 0x3f0   : > { %v5411_v28 = vrot.slane %v5403_v40, %v10469_v22  ;;  %v5451_v37 = vrot.slane %v5423_v63, %v10469_v22  ;;  %v5470_v25 = vcombine.low %v9573_v61, %v9577_v50  ;;  %v5471_v46 = vcombine.low %v9581_v27, %v9585_v15  ;;  %v10475_v61 = vld [vmem:[#allocation39_spill] sm:$0xff] }
 0x3f1   : > { %v5418_v52 = vrot.slane %v5404_v21, %v10469_v22  ;;  %v5452_v51 = vcombine.low %v5430_v23, %v5437_v17  ;;  %v5472_v2 = vcombine.low %v9589_v4, %v9593_v54  ;;  %v5479_v0 = vrot.slane %v5469_v1, %v10469_v22  ;;  %5578 = vst.msk [vmem:[%s9669_s27 + $0x18] sm:$0xff] %vm10474_vm6, %v5370_v32  ;;  %v10477_v4 = vld [vmem:[#allocation35_spill] sm:$0xff] }
 0x3f2   : > { %v5453_v20 = vcombine.low %v5444_v30, %v5451_v37  ;;  %v5486_v39 = vrot.slane %v5470_v25, %v10469_v22  ;;  %v5493_v16 = vrot.slane %v5471_v46, %v10469_v22  ;;  %v5518_v50 = vcombine.low %v10475_v61, %v9601_v5 }
 0x3f3   : > { %v5419_v27 = vcombine.low %v5411_v28, %v5418_v52  ;;  %v5460_v15 = vrot.slane %v5452_v51, %v10469_v22  ;;  %v5500_v59 = vrot.slane %v5472_v2, %v10469_v22  ;;  %v5519_v54 = vcombine.low %v10477_v4, %v10476_v45 }
 0x3f4   : > { %v5467_v10 = vrot.slane %v5453_v20, %v10469_v22  ;;  %v5501_v42 = vcombine.low %v5479_v0, %v5486_v39  ;;  %v5520_v44 = vcombine.low %v10479_v57, %v10478_v41  ;;  %v5521_v8 = vcombine.low %v10481_v38, %v10480_v47 }
 0x3f5   : > { %v5502_v5 = vcombine.low %v5493_v16, %v5500_v59  ;;  %v5528_v29 = vrot.slane %v5518_v50, %v10469_v22  ;;  %v5535_v60 = vrot.slane %v5519_v54, %v10469_v22  ;;  %5579 = vst.msk [vmem:[%s9669_s27 + $0x20] sm:$0xff] %vm10482_vm13, %v5419_v27 }
 0x3f6   : > { %v5468_v24 = vcombine.low %v5460_v15, %v5467_v10  ;;  %v5542_v14 = vrot.slane %v5520_v44, %v10469_v22  ;;  %v5549_v13 = vrot.slane %v5521_v8, %v10469_v22  ;;  %v5509_v19 = vrot.slane %v5501_v42, %v10469_v22 }
 0x3f7   : > { %v5516_v53 = vrot.slane %v5502_v5, %v10469_v22  ;;  %v5550_v55 = vcombine.low %v5528_v29, %v5535_v60 }
 0x3f8   : > { %v5551_v11 = vcombine.low %v5542_v14, %v5549_v13  ;;  %5580 = vst.msk [vmem:[%s9669_s27 + $0x28] sm:$0xff] %vm10483_vm0, %v5468_v24 }
 0x3f9   : > { %v5517_v58 = vcombine.low %v5509_v19, %v5516_v53  ;;  %v5558_v56 = vrot.slane %v5550_v55, %v10469_v22 }
 0x3fa   : > { %v5565_v18 = vrot.slane %v5551_v11, %v10469_v22 }
 0x3fb   : > { %5581 = vst.msk [vmem:[%s9669_s27 + $0x30] sm:$0xff] %vm10484_vm8, %v5517_v58 }
 0x3fc   : > { %v5566_v36 = vcombine.low %v5558_v56, %v5565_v18 }
 0x3fe   : > { %5582 = vst.msk [vmem:[%s9669_s27 + $0x38] sm:$0xff] %vm10485_vm3, %v5566_v36 }
 0x3ff PF: > { %s20_s13 = sadd.s32 1, %s6357_s13  }
 0x400   : > { %p17_p4 = scmp.ge.s32.totalorder %s20_s13, 4  }
 0x402   :  { %19 = sbr.rel (!%p17_p4) target bundleno = 1 (0x1), region = 110 }

</bundles_post_ra>
